<compile_context>
chip_gen: v5e
topology: v5e:2x2
jax: 0.10.0
libtpu: 0.0.40
codegen_flags: <defaults>
</compile_context>

<pallas_src>
import math
from functools import partial

import jax
import jax.numpy as jnp
from jax import lax
from jax.experimental import pallas as pl
from jax.experimental.pallas import tpu as pltpu

NEG_INF = -1e30          # additive mask value; kept in f32 only (bf16-unsafe)


def _round_up(n, m):
    return ((n + m - 1) // m) * m


# ----------------------------- in-kernel helpers -----------------------------

_GELU_C = math.sqrt(2.0 / math.pi)


def _gelu_tanh(z):
    # tanh-form GELU (PyTorch F.gelu(approximate='tanh')); |err| ~1e-3 vs exact
    # erf.  jnp.tanh lowers to the EUP slot, relieving the VALU on the layer's
    # largest elementwise tensor ([L, 4d]).
    return 0.5 * z * (1.0 + jnp.tanh(_GELU_C * (z + 0.044715 * (z * z * z))))


# -------------------------- fused decoder-layer kernel ------------------------

def _decoder_layer_kernel(len_ref, x_ref, mem_ref, ng_ref, nb_ref,
                          s_wqkv_ref, s_bqkv_ref, s_wo_ref, s_bo_ref,
                          c_wq_ref, c_bq_ref, c_wkv_ref, c_bkv_ref, c_wo_ref, c_bo_ref,
                          ff1_w_ref, ff1_b_ref, ff2_w_ref, ff2_b_ref,
                          o_ref, *, nhead, eps):
    b = pl.program_id(0)
    d = x_ref.shape[-1]
    dh = d // nhead

    x = x_ref[0]                                  # [L, d]  f32 residual stream
    mem = mem_ref[0]                              # [Lm, d] bf16 image memory
    L = x.shape[0]

    ng = ng_ref[...]                              # [3, d] f32
    nb = nb_ref[...]                              # [3, d] f32

    def layer_norm(v, idx):
        g = ng[idx:idx + 1, :]
        beta = nb[idx:idx + 1, :]
        mu = jnp.mean(v, axis=-1, keepdims=True)
        c = v - mu
        var = jnp.mean(c * c, axis=-1, keepdims=True)
        return c * lax.rsqrt(var + eps) * g + beta

    def mha(q, k, v, wo_ref, bo_ref, mask):
        """Multi-head attention.  q already carries the 1/sqrt(dh) scale
        (folded into the weights at init).  Heads are processed with static
        lane slices; the softmax runs once over a sublane-stacked
        [nhead*Lq, Lk] score buffer; per-head PV outputs are concatenated back
        onto lanes so the out-projection is a single K=d MXU matmul."""
        Lq = q.shape[0]

        # 1) all heads' QK^T scores, stacked along sublanes.
        s_parts = []
        for h in range(nhead):
            lo, hi = h * dh, (h + 1) * dh
            qh = q[:, lo:hi].astype(jnp.bfloat16)
            kh = k[:, lo:hi].astype(jnp.bfloat16)
            sh = lax.dot_general(qh, kh, (((1,), (1,)), ((), ())),
                                 preferred_element_type=jnp.float32)
            if mask is not None:
                sh = sh + mask
            s_parts.append(sh)
        s = jnp.concatenate(s_parts, axis=0)                 # [nhead*Lq, Lk]

        # 2) one softmax pass over the whole head stack.
        s = s - jnp.max(s, axis=-1, keepdims=True)
        p = jnp.exp(s)
        inv = pl.reciprocal(jnp.sum(p, axis=-1, keepdims=True), approx=True)
        p = p * inv                                          # normalize before bf16 cast

        # 3) per-head PV, heads concatenated back onto lanes.
        o_parts = []
        for h in range(nhead):
            lo, hi = h * dh, (h + 1) * dh
            ph = p[h * Lq:(h + 1) * Lq, :].astype(jnp.bfloat16)
            vh = v[:, lo:hi].astype(jnp.bfloat16)
            o_parts.append(jnp.dot(ph, vh, preferred_element_type=jnp.float32))
        o = jnp.concatenate(o_parts, axis=1).astype(jnp.bfloat16)   # [Lq, d]

        # 4) single out-projection matmul (K = d).
        return jnp.dot(o, wo_ref[...],
                       preferred_element_type=jnp.float32) + bo_ref[...]

    # ---- self-attention: causal + key-padding mask built in-kernel (f32) ----
    valid = len_ref[b]                                        # scalar int32
    row = lax.broadcasted_iota(jnp.int32, (L, L), 0)
    col = lax.broadcasted_iota(jnp.int32, (L, L), 1)
    self_mask = jnp.where((col > row) | (col >= valid), NEG_INF, 0.0)

    h1 = layer_norm(x, 0).astype(jnp.bfloat16)
    qkv = jnp.dot(h1, s_wqkv_ref[...],
                  preferred_element_type=jnp.float32) + s_bqkv_ref[...]
    q = qkv[:, 0:d]                 # 1/sqrt(dh) folded into W/b at init
    k = qkv[:, d:2 * d]
    v = qkv[:, 2 * d:3 * d]
    x = x + mha(q, k, v, s_wo_ref, s_bo_ref, self_mask)

    # ---- cross-attention over image memory (no mask, matching the module) ----
    h2 = layer_norm(x, 1).astype(jnp.bfloat16)
    q = jnp.dot(h2, c_wq_ref[...],
                preferred_element_type=jnp.float32) + c_bq_ref[...]
    kv = jnp.dot(mem, c_wkv_ref[...],
                 preferred_element_type=jnp.float32) + c_bkv_ref[...]
    k = kv[:, 0:d]
    v = kv[:, d:2 * d]
    x = x + mha(q, k, v, c_wo_ref, c_bo_ref, None)

    # ---- feed-forward (LN3 -> linear -> GELU -> linear -> residual) ----------
    h3 = layer_norm(x, 2).astype(jnp.bfloat16)
    f = jnp.dot(h3, ff1_w_ref[...],
                preferred_element_type=jnp.float32) + ff1_b_ref[...]
    f = _gelu_tanh(f).astype(jnp.bfloat16)
    f = jnp.dot(f, ff2_w_ref[...],
                preferred_element_type=jnp.float32) + ff2_b_ref[...]
    o_ref[0] = x + f


def decoder_layer(x, mem_b, seq_len_i32, lp, *, nhead, eps):
    """One fused pallas_call per nn.TransformerDecoderLayer (norm_first, gelu)."""
    B, Lp, d = x.shape
    Lm = mem_b.shape[1]

    def wspec(shape):
        return pl.BlockSpec(shape, lambda b, sl: (0,) * len(shape))

    grid_spec = pltpu.PrefetchScalarGridSpec(
        num_scalar_prefetch=1,
        grid=(B,),
        in_specs=[
            pl.BlockSpec((1, Lp, d), lambda b, sl: (b, 0, 0)),    # x
            pl.BlockSpec((1, Lm, d), lambda b, sl: (b, 0, 0)),    # image memory
            wspec((3, d)), wspec((3, d)),                         # LN gammas / betas
            wspec((d, 3 * d)), wspec((1, 3 * d)),                 # self  W_qkv, b_qkv
            wspec((d, d)), wspec((1, d)),                         # self  W_o,  b_o
            wspec((d, d)), wspec((1, d)),                         # cross W_q,  b_q
            wspec((d, 2 * d)), wspec((1, 2 * d)),                 # cross W_kv, b_kv
            wspec((d, d)), wspec((1, d)),                         # cross W_o,  b_o
            wspec((d, 4 * d)), wspec((1, 4 * d)),                 # FF1
            wspec((4 * d, d)), wspec((1, d)),                     # FF2
        ],
        out_specs=pl.BlockSpec((1, Lp, d), lambda b, sl: (b, 0, 0)),
    )

    # Explicit VMEM budget sized from the real working set (double-buffered
    # weights + per-batch activation blocks + headroom), clamped so it also
    # fits v7x's 64 MiB physical VMEM.
    weight_bytes = 16 * d * d * 2                              # bf16 weights / layer
    bias_bytes = (3 * d * 2 + 3 * d + d + d + 2 * d + d + 4 * d + d) * 4
    blk_bytes = (Lp * d + Lm * d + Lp * d) * 4                 # x, mem, out blocks
    vmem_limit = min(64 << 20,
                     2 * (weight_bytes + bias_bytes + blk_bytes) + (16 << 20))

    return pl.pallas_call(
        partial(_decoder_layer_kernel, nhead=nhead, eps=eps),
        grid_spec=grid_spec,
        out_shape=jax.ShapeDtypeStruct((B, Lp, d), jnp.float32),
        compiler_params=pltpu.CompilerParams(
            dimension_semantics=("parallel",),
            vmem_limit_bytes=vmem_limit),
    )(seq_len_i32, x, mem_b,
      lp['norm_g'], lp['norm_b'],
      lp['s_wqkv'], lp['s_bqkv'], lp['s_wo'], lp['s_bo'],
      lp['c_wq'], lp['c_bq'], lp['c_wkv'], lp['c_bkv'], lp['c_wo'], lp['c_bo'],
      lp['ff1_w'], lp['ff1_b'], lp['ff2_w'], lp['ff2_b'])


# ---------------------------- dense / LN+dense kernels ------------------------

def _dense_kernel(x_ref, w_ref, b_ref, o_ref):
    x = x_ref[...].astype(w_ref.dtype)
    o_ref[...] = jnp.dot(x, w_ref[...],
                         preferred_element_type=jnp.float32) + b_ref[...]


def _ln_dense_kernel(x_ref, g_ref, beta_ref, w_ref, b_ref, o_ref, *, eps):
    x = x_ref[...]
    mu = jnp.mean(x, axis=-1, keepdims=True)
    c = x - mu
    var = jnp.mean(c * c, axis=-1, keepdims=True)
    h = c * lax.rsqrt(var + eps) * g_ref[...] + beta_ref[...]
    o_ref[...] = jnp.dot(h.astype(w_ref.dtype), w_ref[...],
                         preferred_element_type=jnp.float32) + b_ref[...]


def _pad_mn(x2, w, b, tile_m):
    """Pick an M tile up to tile_m rows (one grid step when M fits) and pad
    M / N to tile multiples.  N padded to lane multiples for dense stores."""
    M, K = x2.shape
    N = w.shape[1]
    tm = min(tile_m, _round_up(M, 8))
    Mp = _round_up(M, tm)
    Np = _round_up(N, 128)
    if Mp != M:
        x2 = jnp.pad(x2, ((0, Mp - M), (0, 0)))
    if Np != N:
        w = jnp.pad(w, ((0, 0), (0, Np - N)))
        b = jnp.pad(b, ((0, 0), (0, Np - N)))
    return x2, w, b, M, N, Mp, Np, tm


def dense(x, w, b, *, tile_m=128):
    """y = x @ w + b. Up-to-128-row M tiles on a parallel grid axis."""
    lead = x.shape[:-1]
    K = x.shape[-1]
    x2, wp, bp, M, N, Mp, Np, tm = _pad_mn(x.reshape(-1, K), w, b, tile_m)
    out = pl.pallas_call(
        _dense_kernel,
        grid=(Mp // tm,),
        in_specs=[pl.BlockSpec((tm, K), lambda i: (i, 0)),
                  pl.BlockSpec((K, Np), lambda i: (0, 0)),
                  pl.BlockSpec((1, Np), lambda i: (0, 0))],
        out_specs=pl.BlockSpec((tm, Np), lambda i: (i, 0)),
        out_shape=jax.ShapeDtypeStruct((Mp, Np), jnp.float32),
        compiler_params=pltpu.CompilerParams(dimension_semantics=("parallel",)),
    )(x2, wp, bp)
    return out[:M, :N].reshape(lead + (N,))


def ln_dense(x, g, beta, w, b, *, eps, tile_m=128):
    """Fused LayerNorm + linear (used for final decoder norm + classifier)."""
    lead = x.shape[:-1]
    D = x.shape[-1]
    x2, wp, bp, M, N, Mp, Np, tm = _pad_mn(x.reshape(-1, D), w, b, tile_m)
    out = pl.pallas_call(
        partial(_ln_dense_kernel, eps=eps),
        grid=(Mp // tm,),
        in_specs=[pl.BlockSpec((tm, D), lambda i: (i, 0)),
                  pl.BlockSpec((1, D), lambda i: (0, 0)),
                  pl.BlockSpec((1, D), lambda i: (0, 0)),
                  pl.BlockSpec((D, Np), lambda i: (0, 0)),
                  pl.BlockSpec((1, Np), lambda i: (0, 0))],
        out_specs=pl.BlockSpec((tm, Np), lambda i: (i, 0)),
        out_shape=jax.ShapeDtypeStruct((Mp, Np), jnp.float32),
        compiler_params=pltpu.CompilerParams(dimension_semantics=("parallel",)),
    )(x2, g.reshape(1, D), beta.reshape(1, D), wp, bp)
    return out[:M, :N].reshape(lead + (N,))


# --------------------------- model building blocks ---------------------------

def image_encoder(params, imgs, grid_size):
    """Stand-in for DinoResEncoder: adaptive avg-pool to SxS grid + projection.
    use_global_feature=False, so gx is not needed downstream."""
    # TODO(synk): DinoResEncoder wraps a pretrained ResNet backbone (not available
    # here); replaced by adaptive average pooling + a learned linear projection.
    B, C, H, W = imgs.shape
    S = grid_size
    pooled = imgs.reshape(B, C, S, H // S, S, W // S).mean(axis=(3, 5))   # [B,C,S,S]
    tokens = pooled.reshape(B, C, S * S).transpose(0, 2, 1)               # [B,S*S,C]
    return dense(tokens, params['img_w'], params['img_b'])                # [B,S*S,d]


def positional_encoding_table(d_model, max_len):
    position = jnp.arange(max_len, dtype=jnp.float32)[:, None]
    div_term = jnp.exp(jnp.arange(0, d_model, 2, dtype=jnp.float32)
                       * (-math.log(10000.0) / d_model))
    pe = jnp.zeros((max_len, d_model), jnp.float32)
    pe = pe.at[:, 0::2].set(jnp.sin(position * div_term))
    pe = pe.at[:, 1::2].set(jnp.cos(position * div_term))
    return pe


# --------------------------------- forward ----------------------------------

@partial(jax.jit, static_argnames=("nhead", "eps", "grid_size", "vocab_size"))
def _forward_core(params, imgs, seq_t, seq_len_sorted, *,
                  nhead, eps, grid_size, vocab_size):
    B, L = seq_t.shape
    Lp = _round_up(L, 8)

    # embedding + positional encoding (dropout == identity at inference)
    x = params['embed'][seq_t] + params['pe'][:L][None, :, :]       # [B, L, d]
    if Lp != L:
        x = jnp.pad(x, ((0, 0), (0, Lp - L), (0, 0)))               # sublane align

    mem = image_encoder(params, imgs, grid_size)                    # [B, S*S, d]
    mem_b = mem.astype(jnp.bfloat16)                                # cast once

    seq_len_i32 = seq_len_sorted.astype(jnp.int32)
    for lp in params['layers']:
        x = decoder_layer(x, mem_b, seq_len_i32, lp, nhead=nhead, eps=eps)

    # fused final decoder LayerNorm + classifier (vocab padded to 128 at init)
    logits = ln_dense(x, params['final_g'], params['final_b'],
                      params['cls_w'], params['cls_b'], eps=eps)
    return logits[:, :L, :vocab_size]


def transformer_conditioned_lm_forward(params, imgs, seq, seq_padding_mask, seq_len,
                                       *, nhead, layer_norm_eps, img_grid_size,
                                       vocab_size):
    # Sort-by-length bookkeeping (module returns a python list of decode lengths),
    # done once up front; the heavy forward is a single jitted call below.
    sort_ind = jnp.argsort(-seq_len)
    seq_len_sorted = seq_len[sort_ind]
    encoded_seq = seq[sort_ind]
    imgs_sorted = imgs[sort_ind]
    decode_lengths = [int(v) for v in (seq_len_sorted - 1)]
    max_length = max(decode_lengths)
    seq_t = encoded_seq[:, :max_length]
    # seq_padding_mask == (arange(L) >= seq_len); the equivalent key-padding mask
    # is rebuilt in-kernel from seq_len_sorted instead of DMAing a [B,H,L,L] tensor.
    del seq_padding_mask

    logits = _forward_core(params, imgs_sorted, seq_t, seq_len_sorted,
                           nhead=nhead, eps=layer_norm_eps,
                           grid_size=img_grid_size, vocab_size=vocab_size)
    return logits, encoded_seq, decode_lengths, sort_ind


# ------------------------------ parameter init -------------------------------

def init_params(key, vocab_size, d_model, nhead, num_layers, in_channels, pe_max_len):
    assert d_model % 128 == 0, "fused layer kernel expects lane-aligned d_model"
    assert d_model % nhead == 0
    keys = iter(jax.random.split(key, 3 + num_layers * 7))
    attn_scale = 1.0 / math.sqrt(d_model // nhead)

    def lin_f32(k, fan_in, fan_out):
        bound = 1.0 / math.sqrt(fan_in)
        k1, k2 = jax.random.split(k)
        w = jax.random.uniform(k1, (fan_in, fan_out), jnp.float32, -bound, bound)
        b = jax.random.uniform(k2, (1, fan_out), jnp.float32, -bound, bound)
        return w, b

    def to_bf16(w, b):
        return w.astype(jnp.bfloat16), b        # bf16 MXU weights, f32 bias

    params = {
        'embed': jax.random.uniform(next(keys), (vocab_size, d_model),
                                    jnp.float32, -0.1, 0.1),
        'pe': positional_encoding_table(d_model, pe_max_len),
    }
    params['img_w'], params['img_b'] = to_bf16(*lin_f32(next(keys), in_channels, d_model))

    layers = []
    for _ in range(num_layers):
        lp = {}
        # fused Q|K|V; 1/sqrt(dh) folded into the Q columns (exact weight-side fold)
        wqkv, bqkv = lin_f32(next(keys), d_model, 3 * d_model)
        wqkv = wqkv.at[:, :d_model].multiply(attn_scale)
        bqkv = bqkv.at[:, :d_model].multiply(attn_scale)
        lp['s_wqkv'], lp['s_bqkv'] = to_bf16(wqkv, bqkv)
        lp['s_wo'], lp['s_bo'] = to_bf16(*lin_f32(next(keys), d_model, d_model))
        # cross-attn Q with the same scale fold
        wq, bq = lin_f32(next(keys), d_model, d_model)
        lp['c_wq'], lp['c_bq'] = to_bf16(wq * attn_scale, bq * attn_scale)
        lp['c_wkv'], lp['c_bkv'] = to_bf16(*lin_f32(next(keys), d_model, 2 * d_model))
        lp['c_wo'], lp['c_bo'] = to_bf16(*lin_f32(next(keys), d_model, d_model))
        lp['norm_g'] = jnp.ones((3, d_model), jnp.float32)                  # LN1/2/3
        lp['norm_b'] = jnp.zeros((3, d_model), jnp.float32)
        lp['ff1_w'], lp['ff1_b'] = to_bf16(*lin_f32(next(keys), d_model, 4 * d_model))
        lp['ff2_w'], lp['ff2_b'] = to_bf16(*lin_f32(next(keys), 4 * d_model, d_model))
        layers.append(lp)
    params['layers'] = layers

    params['final_g'] = jnp.ones((d_model,), jnp.float32)
    params['final_b'] = jnp.zeros((d_model,), jnp.float32)
    # classifier: init_weights() -> uniform(-0.1, 0.1), bias = 0; vocab padded to
    # a lane multiple at init so the classifier store is lane-dense.
    vp = _round_up(vocab_size, 128)
    cls_w = jax.random.uniform(next(keys), (d_model, vocab_size),
                               jnp.float32, -0.1, 0.1)
    params['cls_w'] = jnp.pad(cls_w, ((0, 0), (0, vp - vocab_size))).astype(jnp.bfloat16)
    params['cls_b'] = jnp.zeros((1, vp), jnp.float32)
    return params


# ----------------------------------- main ------------------------------------

if __name__ == "__main__":
    vocab_size = 40
    d_model = 128              # lane-aligned model dim (nhead=4 -> dh=32)
    nhead = 4
    num_layers = 2
    layer_norm_eps = 1e-5
    B, C, H, W = 2, 4, 16, 16
    img_grid_size = 4          # "input_resolution" of refine_encoder_params
    L_pad = 10                 # padded sequence length

    key = jax.random.PRNGKey(0)
    kp, ki, ks = jax.random.split(key, 3)

    params = init_params(kp, vocab_size, d_model, nhead, num_layers, C, pe_max_len=128)

    imgs = jax.random.normal(ki, (B, C, H, W), jnp.float32)
    seq = jax.random.randint(ks, (B, L_pad), 0, vocab_size, dtype=jnp.int32)
    seq_len = jnp.array([7, 9], dtype=jnp.int32)
    seq_padding_mask = jnp.arange(L_pad)[None, :] >= seq_len[:, None]   # True == pad

    logits, encoded_seq, decode_lengths, sort_ind = transformer_conditioned_lm_forward(
        params, imgs, seq, seq_padding_mask, seq_len,
        nhead=nhead, layer_norm_eps=layer_norm_eps,
        img_grid_size=img_grid_size, vocab_size=vocab_size)

    jax.block_until_ready(logits)
    assert logits.shape == (B, max(decode_lengths), vocab_size)
    assert encoded_seq.shape == (B, L_pad)
    assert not bool(jnp.isnan(logits).any())
    print("KERNEL_OK")
</pallas_src>

<mosaic_0001>
module attributes {stable_mosaic.version = 11 : i64} {
  func.func @_dense_kernel(%arg0: i32, %arg1: memref<32x4xf32, #tpu.memory_space<vmem>>, %arg2: memref<4x128xbf16, #tpu.memory_space<vmem>>, %arg3: memref<1x128xf32, #tpu.memory_space<vmem>>, %arg4: memref<32x128xf32, #tpu.memory_space<vmem>>) attributes {dimension_semantics = [#tpu.dimension_semantics<parallel>], iteration_bounds = array<i64: 1>, scalar_prefetch = 0 : i64, scratch_operands = 0 : i64, tpu.core_type = #tpu.core_type<tc>, window_params = [{transform_indices = @transform_0, window_bounds = array<i64: 32, 4>}, {pipeline_mode = #tpu.pipeline_mode<synchronous>, transform_indices = @transform_1, window_bounds = array<i64: 4, 128>}, {pipeline_mode = #tpu.pipeline_mode<synchronous>, transform_indices = @transform_2, window_bounds = array<i64: 1, 128>}, {transform_indices = @transform_3, window_bounds = array<i64: 32, 128>}]} {
    %c0 = arith.constant 0 : index
    %c0_0 = arith.constant 0 : index
    %0 = vector.load %arg1[%c0, %c0_0] : memref<32x4xf32, #tpu.memory_space<vmem>>, vector<32x4xf32>
    %1 = arith.truncf %0 : vector<32x4xf32> to vector<32x4xbf16>
    %c0_1 = arith.constant 0 : index
    %c0_2 = arith.constant 0 : index
    %2 = vector.load %arg2[%c0_1, %c0_2] : memref<4x128xbf16, #tpu.memory_space<vmem>>, vector<4x128xbf16>
    %cst = arith.constant dense<0.000000e+00> : vector<32x128xf32>
    %3 = tpu.matmul %1, %2, %cst {dimension_numbers = #tpu.dot_dimension_numbers<[1], [0], [0], [1], [0, 0, 1, 1], [], []>} : vector<32x4xbf16>, vector<4x128xbf16>, vector<32x128xf32> -> vector<32x128xf32>
    %c0_3 = arith.constant 0 : index
    %c0_4 = arith.constant 0 : index
    %4 = vector.load %arg3[%c0_3, %c0_4] : memref<1x128xf32, #tpu.memory_space<vmem>>, vector<1x128xf32>
    %5 = vector.broadcast %4 : vector<1x128xf32> to vector<32x128xf32>
    %6 = arith.addf %3, %5 : vector<32x128xf32>
    %c0_5 = arith.constant 0 : index
    %c0_6 = arith.constant 0 : index
    %7 = vector.load %arg4[%c0_5, %c0_6] : memref<32x128xf32, #tpu.memory_space<vmem>>, vector<32x128xf32>
    tpu.vector_store %arg4[%c0_5, %c0_6], %6 {strides = array<i32>} : memref<32x128xf32, #tpu.memory_space<vmem>>, vector<32x128xf32>,
    return
  }
  func.func @transform_0(%arg0: i32) -> (i32, i32) {
    %c0_i32 = arith.constant 0 : i32
    %c0_i32_0 = arith.constant 0 : i32
    return %arg0, %c0_i32 : i32, i32
  }
  func.func @transform_1(%arg0: i32) -> (i32, i32) {
    %c0_i32 = arith.constant 0 : i32
    %c0_i32_0 = arith.constant 0 : i32
    %c0_i32_1 = arith.constant 0 : i32
    return %c0_i32, %c0_i32_0 : i32, i32
  }
  func.func @transform_2(%arg0: i32) -> (i32, i32) {
    %c0_i32 = arith.constant 0 : i32
    %c0_i32_0 = arith.constant 0 : i32
    %c0_i32_1 = arith.constant 0 : i32
    return %c0_i32, %c0_i32_0 : i32, i32
  }
  func.func @transform_3(%arg0: i32) -> (i32, i32) {
    %c0_i32 = arith.constant 0 : i32
    %c0_i32_0 = arith.constant 0 : i32
    return %arg0, %c0_i32 : i32, i32
  }
}

module attributes {stable_mosaic.version = 11 : i64} {
  func.func @_ln_dense_kernel(%arg0: i32, %arg1: memref<16x128xf32, #tpu.memory_space<vmem>>, %arg2: memref<1x128xf32, #tpu.memory_space<vmem>>, %arg3: memref<1x128xf32, #tpu.memory_space<vmem>>, %arg4: memref<128x128xbf16, #tpu.memory_space<vmem>>, %arg5: memref<1x128xf32, #tpu.memory_space<vmem>>, %arg6: memref<16x128xf32, #tpu.memory_space<vmem>>) attributes {dimension_semantics = [#tpu.dimension_semantics<parallel>], iteration_bounds = array<i64: 1>, scalar_prefetch = 0 : i64, scratch_operands = 0 : i64, tpu.core_type = #tpu.core_type<tc>, window_params = [{transform_indices = @transform_0, window_bounds = array<i64: 16, 128>}, {pipeline_mode = #tpu.pipeline_mode<synchronous>, transform_indices = @transform_1, window_bounds = array<i64: 1, 128>}, {pipeline_mode = #tpu.pipeline_mode<synchronous>, transform_indices = @transform_2, window_bounds = array<i64: 1, 128>}, {pipeline_mode = #tpu.pipeline_mode<synchronous>, transform_indices = @transform_3, window_bounds = array<i64: 128, 128>}, {pipeline_mode = #tpu.pipeline_mode<synchronous>, transform_indices = @transform_4, window_bounds = array<i64: 1, 128>}, {transform_indices = @transform_5, window_bounds = array<i64: 16, 128>}]} {
    %c0 = arith.constant 0 : index
    %c0_0 = arith.constant 0 : index
    %0 = vector.load %arg1[%c0, %c0_0] : memref<16x128xf32, #tpu.memory_space<vmem>>, vector<16x128xf32>
    %cst = arith.constant dense<0.000000e+00> : vector<16xf32>
    %1 = vector.multi_reduction <add>, %0, %cst [1] : vector<16x128xf32> to vector<16xf32>
    %2 = vector.shape_cast %1 : vector<16xf32> to vector<16x1xf32>
    %cst_1 = arith.constant 1.280000e+02 : f32
    %3 = vector.broadcast %cst_1 : f32 to vector<16x1xf32>
    %4 = arith.divf %2, %3 : vector<16x1xf32>
    %5 = vector.broadcast %4 : vector<16x1xf32> to vector<16x128xf32>
    %6 = arith.subf %0, %5 : vector<16x128xf32>
    %7 = arith.mulf %6, %6 : vector<16x128xf32>
    %cst_2 = arith.constant dense<0.000000e+00> : vector<16xf32>
    %8 = vector.multi_reduction <add>, %7, %cst_2 [1] : vector<16x128xf32> to vector<16xf32>
    %9 = vector.shape_cast %8 : vector<16xf32> to vector<16x1xf32>
    %cst_3 = arith.constant 1.280000e+02 : f32
    %10 = vector.broadcast %cst_3 : f32 to vector<16x1xf32>
    %11 = arith.divf %9, %10 : vector<16x1xf32>
    %cst_4 = arith.constant 9.99999974E-6 : f32
    %12 = vector.broadcast %cst_4 : f32 to vector<16x1xf32>
    %13 = arith.addf %11, %12 : vector<16x1xf32>
    %14 = math.rsqrt %13 : vector<16x1xf32>
    %15 = vector.broadcast %14 : vector<16x1xf32> to vector<16x128xf32>
    %16 = arith.mulf %6, %15 : vector<16x128xf32>
    %c0_5 = arith.constant 0 : index
    %c0_6 = arith.constant 0 : index
    %17 = vector.load %arg2[%c0_5, %c0_6] : memref<1x128xf32, #tpu.memory_space<vmem>>, vector<1x128xf32>
    %18 = vector.broadcast %17 : vector<1x128xf32> to vector<16x128xf32>
    %19 = arith.mulf %16, %18 : vector<16x128xf32>
    %c0_7 = arith.constant 0 : index
    %c0_8 = arith.constant 0 : index
    %20 = vector.load %arg3[%c0_7, %c0_8] : memref<1x128xf32, #tpu.memory_space<vmem>>, vector<1x128xf32>
    %21 = vector.broadcast %20 : vector<1x128xf32> to vector<16x128xf32>
    %22 = arith.addf %19, %21 : vector<16x128xf32>
    %23 = arith.truncf %22 : vector<16x128xf32> to vector<16x128xbf16>
    %c0_9 = arith.constant 0 : index
    %c0_10 = arith.constant 0 : index
    %24 = vector.load %arg4[%c0_9, %c0_10] : memref<128x128xbf16, #tpu.memory_space<vmem>>, vector<128x128xbf16>
    %cst_11 = arith.constant dense<0.000000e+00> : vector<16x128xf32>
    %25 = tpu.matmul %23, %24, %cst_11 {dimension_numbers = #tpu.dot_dimension_numbers<[1], [0], [0], [1], [0, 0, 1, 1], [], []>} : vector<16x128xbf16>, vector<128x128xbf16>, vector<16x128xf32> -> vector<16x128xf32>
    %c0_12 = arith.constant 0 : index
    %c0_13 = arith.constant 0 : index
    %26 = vector.load %arg5[%c0_12, %c0_13] : memref<1x128xf32, #tpu.memory_space<vmem>>, vector<1x128xf32>
    %27 = vector.broadcast %26 : vector<1x128xf32> to vector<16x128xf32>
    %28 = arith.addf %25, %27 : vector<16x128xf32>
    %c0_14 = arith.constant 0 : index
    %c0_15 = arith.constant 0 : index
    %29 = vector.load %arg6[%c0_14, %c0_15] : memref<16x128xf32, #tpu.memory_space<vmem>>, vector<16x128xf32>
    tpu.vector_store %arg6[%c0_14, %c0_15], %28 {strides = array<i32>} : memref<16x128xf32, #tpu.memory_space<vmem>>, vector<16x128xf32>,
    return
  }
  func.func @transform_0(%arg0: i32) -> (i32, i32) {
    %c0_i32 = arith.constant 0 : i32
    %c0_i32_0 = arith.constant 0 : i32
    return %arg0, %c0_i32 : i32, i32
  }
  func.func @transform_1(%arg0: i32) -> (i32, i32) {
    %c0_i32 = arith.constant 0 : i32
    %c0_i32_0 = arith.constant 0 : i32
    %c0_i32_1 = arith.constant 0 : i32
    return %c0_i32, %c0_i32_0 : i32, i32
  }
  func.func @transform_2(%arg0: i32) -> (i32, i32) {
    %c0_i32 = arith.constant 0 : i32
    %c0_i32_0 = arith.constant 0 : i32
    %c0_i32_1 = arith.constant 0 : i32
    return %c0_i32, %c0_i32_0 : i32, i32
  }
  func.func @transform_3(%arg0: i32) -> (i32, i32) {
    %c0_i32 = arith.constant 0 : i32
    %c0_i32_0 = arith.constant 0 : i32
    %c0_i32_1 = arith.constant 0 : i32
    return %c0_i32, %c0_i32_0 : i32, i32
  }
  func.func @transform_4(%arg0: i32) -> (i32, i32) {
    %c0_i32 = arith.constant 0 : i32
    %c0_i32_0 = arith.constant 0 : i32
    %c0_i32_1 = arith.constant 0 : i32
    return %c0_i32, %c0_i32_0 : i32, i32
  }
  func.func @transform_5(%arg0: i32) -> (i32, i32) {
    %c0_i32 = arith.constant 0 : i32
    %c0_i32_0 = arith.constant 0 : i32
    return %arg0, %c0_i32 : i32, i32
  }
}

module attributes {stable_mosaic.version = 11 : i64} {
  func.func @_decoder_layer_kernel(%arg0: i32, %arg1: memref<2xi32, #tpu.memory_space<smem>>, %arg2: memref<1x8x128xf32, #tpu.memory_space<vmem>>, %arg3: memref<1x16x128xbf16, #tpu.memory_space<vmem>>, %arg4: memref<3x128xf32, #tpu.memory_space<vmem>>, %arg5: memref<3x128xf32, #tpu.memory_space<vmem>>, %arg6: memref<128x384xbf16, #tpu.memory_space<vmem>>, %arg7: memref<1x384xf32, #tpu.memory_space<vmem>>, %arg8: memref<128x128xbf16, #tpu.memory_space<vmem>>, %arg9: memref<1x128xf32, #tpu.memory_space<vmem>>, %arg10: memref<128x128xbf16, #tpu.memory_space<vmem>>, %arg11: memref<1x128xf32, #tpu.memory_space<vmem>>, %arg12: memref<128x256xbf16, #tpu.memory_space<vmem>>, %arg13: memref<1x256xf32, #tpu.memory_space<vmem>>, %arg14: memref<128x128xbf16, #tpu.memory_space<vmem>>, %arg15: memref<1x128xf32, #tpu.memory_space<vmem>>, %arg16: memref<128x512xbf16, #tpu.memory_space<vmem>>, %arg17: memref<1x512xf32, #tpu.memory_space<vmem>>, %arg18: memref<512x128xbf16, #tpu.memory_space<vmem>>, %arg19: memref<1x128xf32, #tpu.memory_space<vmem>>, %arg20: memref<1x8x128xf32, #tpu.memory_space<vmem>>) attributes {dimension_semantics = [#tpu.dimension_semantics<parallel>], iteration_bounds = array<i64: 2>, scalar_prefetch = 1 : i64, scratch_operands = 0 : i64, tpu.core_type = #tpu.core_type<tc>, window_params = [{transform_indices = @transform_0, window_bounds = array<i64: 1, 8, 128>}, {transform_indices = @transform_1, window_bounds = array<i64: 1, 16, 128>}, {pipeline_mode = #tpu.pipeline_mode<synchronous>, transform_indices = @transform_2, window_bounds = array<i64: 3, 128>}, {pipeline_mode = #tpu.pipeline_mode<synchronous>, transform_indices = @transform_3, window_bounds = array<i64: 3, 128>}, {pipeline_mode = #tpu.pipeline_mode<synchronous>, transform_indices = @transform_4, window_bounds = array<i64: 128, 384>}, {pipeline_mode = #tpu.pipeline_mode<synchronous>, transform_indices = @transform_5, window_bounds = array<i64: 1, 384>}, {pipeline_mode = #tpu.pipeline_mode<synchronous>, transform_indices = @transform_6, window_bounds = array<i64: 128, 128>}, {pipeline_mode = #tpu.pipeline_mode<synchronous>, transform_indices = @transform_7, window_bounds = array<i64: 1, 128>}, {pipeline_mode = #tpu.pipeline_mode<synchronous>, transform_indices = @transform_8, window_bounds = array<i64: 128, 128>}, {pipeline_mode = #tpu.pipeline_mode<synchronous>, transform_indices = @transform_9, window_bounds = array<i64: 1, 128>}, {pipeline_mode = #tpu.pipeline_mode<synchronous>, transform_indices = @transform_10, window_bounds = array<i64: 128, 256>}, {pipeline_mode = #tpu.pipeline_mode<synchronous>, transform_indices = @transform_11, window_bounds = array<i64: 1, 256>}, {pipeline_mode = #tpu.pipeline_mode<synchronous>, transform_indices = @transform_12, window_bounds = array<i64: 128, 128>}, {pipeline_mode = #tpu.pipeline_mode<synchronous>, transform_indices = @transform_13, window_bounds = array<i64: 1, 128>}, {pipeline_mode = #tpu.pipeline_mode<synchronous>, transform_indices = @transform_14, window_bounds = array<i64: 128, 512>}, {pipeline_mode = #tpu.pipeline_mode<synchronous>, transform_indices = @transform_15, window_bounds = array<i64: 1, 512>}, {pipeline_mode = #tpu.pipeline_mode<synchronous>, transform_indices = @transform_16, window_bounds = array<i64: 512, 128>}, {pipeline_mode = #tpu.pipeline_mode<synchronous>, transform_indices = @transform_17, window_bounds = array<i64: 1, 128>}, {transform_indices = @transform_18, window_bounds = array<i64: 1, 8, 128>}]} {
    %c0 = arith.constant 0 : index
    %c0_0 = arith.constant 0 : index
    %c0_1 = arith.constant 0 : index
    %0 = vector.load %arg2[%c0, %c0_0, %c0_1] : memref<1x8x128xf32, #tpu.memory_space<vmem>>, vector<1x8x128xf32>
    %1 = vector.shape_cast %0 : vector<1x8x128xf32> to vector<8x128xf32>
    %c0_2 = arith.constant 0 : index
    %c0_3 = arith.constant 0 : index
    %c0_4 = arith.constant 0 : index
    %2 = vector.load %arg3[%c0_2, %c0_3, %c0_4] : memref<1x16x128xbf16, #tpu.memory_space<vmem>>, vector<1x16x128xbf16>
    %3 = vector.shape_cast %2 : vector<1x16x128xbf16> to vector<16x128xbf16>
    %c0_5 = arith.constant 0 : index
    %c0_6 = arith.constant 0 : index
    %4 = vector.load %arg4[%c0_5, %c0_6] : memref<3x128xf32, #tpu.memory_space<vmem>>, vector<3x128xf32>
    %c0_7 = arith.constant 0 : index
    %c0_8 = arith.constant 0 : index
    %5 = vector.load %arg5[%c0_7, %c0_8] : memref<3x128xf32, #tpu.memory_space<vmem>>, vector<3x128xf32>
    %6 = arith.index_cast %arg0 : i32 to index
    %7 = memref.load %arg1[%6] : memref<2xi32, #tpu.memory_space<smem>>
    %8 = tpu.iota {dimensions = array<i32: 0>} : vector<8x8xi32>
    %9 = tpu.iota {dimensions = array<i32: 1>} : vector<8x8xi32>
    %10 = arith.cmpi sgt, %9, %8 : vector<8x8xi32>
    %11 = vector.broadcast %7 : i32 to vector<8x8xi32>
    %12 = arith.cmpi sge, %9, %11 : vector<8x8xi32>
    %13 = arith.ori %10, %12 : vector<8x8xi1>
    %cst = arith.constant -1.000000e+30 : f32
    %cst_9 = arith.constant 0.000000e+00 : f32
    %14 = vector.broadcast %cst : f32 to vector<8x8xf32>
    %15 = vector.broadcast %cst_9 : f32 to vector<8x8xf32>
    %16 = arith.select %13, %14, %15 : vector<8x8xi1>, vector<8x8xf32>
    %17 = vector.extract_strided_slice %4 {offsets = [0, 0], sizes = [1, 128], strides = [1, 1]} : vector<3x128xf32> to vector<1x128xf32>
    %18 = vector.extract_strided_slice %5 {offsets = [0, 0], sizes = [1, 128], strides = [1, 1]} : vector<3x128xf32> to vector<1x128xf32>
    %cst_10 = arith.constant dense<0.000000e+00> : vector<8xf32>
    %19 = vector.multi_reduction <add>, %1, %cst_10 [1] : vector<8x128xf32> to vector<8xf32>
    %20 = vector.shape_cast %19 : vector<8xf32> to vector<8x1xf32>
    %cst_11 = arith.constant 1.280000e+02 : f32
    %21 = vector.broadcast %cst_11 : f32 to vector<8x1xf32>
    %22 = arith.divf %20, %21 : vector<8x1xf32>
    %23 = vector.broadcast %22 : vector<8x1xf32> to vector<8x128xf32>
    %24 = arith.subf %1, %23 : vector<8x128xf32>
    %25 = arith.mulf %24, %24 : vector<8x128xf32>
    %cst_12 = arith.constant dense<0.000000e+00> : vector<8xf32>
    %26 = vector.multi_reduction <add>, %25, %cst_12 [1] : vector<8x128xf32> to vector<8xf32>
    %27 = vector.shape_cast %26 : vector<8xf32> to vector<8x1xf32>
    %cst_13 = arith.constant 1.280000e+02 : f32
    %28 = vector.broadcast %cst_13 : f32 to vector<8x1xf32>
    %29 = arith.divf %27, %28 : vector<8x1xf32>
    %cst_14 = arith.constant 9.99999974E-6 : f32
    %30 = vector.broadcast %cst_14 : f32 to vector<8x1xf32>
    %31 = arith.addf %29, %30 : vector<8x1xf32>
    %32 = math.rsqrt %31 : vector<8x1xf32>
    %33 = vector.broadcast %32 : vector<8x1xf32> to vector<8x128xf32>
    %34 = arith.mulf %24, %33 : vector<8x128xf32>
    %35 = vector.broadcast %17 : vector<1x128xf32> to vector<8x128xf32>
    %36 = arith.mulf %34, %35 : vector<8x128xf32>
    %37 = vector.broadcast %18 : vector<1x128xf32> to vector<8x128xf32>
    %38 = arith.addf %36, %37 : vector<8x128xf32>
    %39 = arith.truncf %38 : vector<8x128xf32> to vector<8x128xbf16>
    %c0_15 = arith.constant 0 : index
    %c0_16 = arith.constant 0 : index
    %40 = vector.load %arg6[%c0_15, %c0_16] : memref<128x384xbf16, #tpu.memory_space<vmem>>, vector<128x384xbf16>
    %cst_17 = arith.constant dense<0.000000e+00> : vector<8x384xf32>
    %41 = tpu.matmul %39, %40, %cst_17 {dimension_numbers = #tpu.dot_dimension_numbers<[1], [0], [0], [1], [0, 0, 1, 1], [], []>} : vector<8x128xbf16>, vector<128x384xbf16>, vector<8x384xf32> -> vector<8x384xf32>
    %c0_18 = arith.constant 0 : index
    %c0_19 = arith.constant 0 : index
    %42 = vector.load %arg7[%c0_18, %c0_19] : memref<1x384xf32, #tpu.memory_space<vmem>>, vector<1x384xf32>
    %43 = vector.broadcast %42 : vector<1x384xf32> to vector<8x384xf32>
    %44 = arith.addf %41, %43 : vector<8x384xf32>
    %45 = vector.extract_strided_slice %44 {offsets = [0, 0], sizes = [8, 128], strides = [1, 1]} : vector<8x384xf32> to vector<8x128xf32>
    %46 = vector.extract_strided_slice %44 {offsets = [0, 128], sizes = [8, 128], strides = [1, 1]} : vector<8x384xf32> to vector<8x128xf32>
    %47 = vector.extract_strided_slice %44 {offsets = [0, 256], sizes = [8, 128], strides = [1, 1]} : vector<8x384xf32> to vector<8x128xf32>
    %48 = vector.extract_strided_slice %45 {offsets = [0, 0], sizes = [8, 32], strides = [1, 1]} : vector<8x128xf32> to vector<8x32xf32>
    %49 = arith.truncf %48 : vector<8x32xf32> to vector<8x32xbf16>
    %50 = vector.extract_strided_slice %46 {offsets = [0, 0], sizes = [8, 32], strides = [1, 1]} : vector<8x128xf32> to vector<8x32xf32>
    %51 = arith.truncf %50 : vector<8x32xf32> to vector<8x32xbf16>
    %cst_20 = arith.constant dense<0.000000e+00> : vector<8x8xf32>
    %52 = tpu.matmul %49, %51, %cst_20 {dimension_numbers = #tpu.dot_dimension_numbers<[1], [1], [0], [0], [0, 0, 1, 0], [], []>} : vector<8x32xbf16>, vector<8x32xbf16>, vector<8x8xf32> -> vector<8x8xf32>
    %53 = arith.addf %52, %16 : vector<8x8xf32>
    %54 = vector.extract_strided_slice %45 {offsets = [0, 32], sizes = [8, 32], strides = [1, 1]} : vector<8x128xf32> to vector<8x32xf32>
    %55 = arith.truncf %54 : vector<8x32xf32> to vector<8x32xbf16>
    %56 = vector.extract_strided_slice %46 {offsets = [0, 32], sizes = [8, 32], strides = [1, 1]} : vector<8x128xf32> to vector<8x32xf32>
    %57 = arith.truncf %56 : vector<8x32xf32> to vector<8x32xbf16>
    %cst_21 = arith.constant dense<0.000000e+00> : vector<8x8xf32>
    %58 = tpu.matmul %55, %57, %cst_21 {dimension_numbers = #tpu.dot_dimension_numbers<[1], [1], [0], [0], [0, 0, 1, 0], [], []>} : vector<8x32xbf16>, vector<8x32xbf16>, vector<8x8xf32> -> vector<8x8xf32>
    %59 = arith.addf %58, %16 : vector<8x8xf32>
    %60 = vector.extract_strided_slice %45 {offsets = [0, 64], sizes = [8, 32], strides = [1, 1]} : vector<8x128xf32> to vector<8x32xf32>
    %61 = arith.truncf %60 : vector<8x32xf32> to vector<8x32xbf16>
    %62 = vector.extract_strided_slice %46 {offsets = [0, 64], sizes = [8, 32], strides = [1, 1]} : vector<8x128xf32> to vector<8x32xf32>
    %63 = arith.truncf %62 : vector<8x32xf32> to vector<8x32xbf16>
    %cst_22 = arith.constant dense<0.000000e+00> : vector<8x8xf32>
    %64 = tpu.matmul %61, %63, %cst_22 {dimension_numbers = #tpu.dot_dimension_numbers<[1], [1], [0], [0], [0, 0, 1, 0], [], []>} : vector<8x32xbf16>, vector<8x32xbf16>, vector<8x8xf32> -> vector<8x8xf32>
    %65 = arith.addf %64, %16 : vector<8x8xf32>
    %66 = vector.extract_strided_slice %45 {offsets = [0, 96], sizes = [8, 32], strides = [1, 1]} : vector<8x128xf32> to vector<8x32xf32>
    %67 = arith.truncf %66 : vector<8x32xf32> to vector<8x32xbf16>
    %68 = vector.extract_strided_slice %46 {offsets = [0, 96], sizes = [8, 32], strides = [1, 1]} : vector<8x128xf32> to vector<8x32xf32>
    %69 = arith.truncf %68 : vector<8x32xf32> to vector<8x32xbf16>
    %cst_23 = arith.constant dense<0.000000e+00> : vector<8x8xf32>
    %70 = tpu.matmul %67, %69, %cst_23 {dimension_numbers = #tpu.dot_dimension_numbers<[1], [1], [0], [0], [0, 0, 1, 0], [], []>} : vector<8x32xbf16>, vector<8x32xbf16>, vector<8x8xf32> -> vector<8x8xf32>
    %71 = arith.addf %70, %16 : vector<8x8xf32>
    %72 = tpu.concatenate %53, %59, %65, %71 in 0 : vector<8x8xf32>, vector<8x8xf32>, vector<8x8xf32>, vector<8x8xf32> -> vector<32x8xf32>
    %cst_24 = arith.constant dense<0xFF800000> : vector<32xf32>
    %73 = vector.multi_reduction <maximumf>, %72, %cst_24 [1] : vector<32x8xf32> to vector<32xf32>
    %74 = vector.shape_cast %73 : vector<32xf32> to vector<32x1xf32>
    %75 = vector.broadcast %74 : vector<32x1xf32> to vector<32x8xf32>
    %76 = arith.subf %72, %75 : vector<32x8xf32>
    %77 = math.exp %76 : vector<32x8xf32>
    %cst_25 = arith.constant dense<0.000000e+00> : vector<32xf32>
    %78 = vector.multi_reduction <add>, %77, %cst_25 [1] : vector<32x8xf32> to vector<32xf32>
    %79 = vector.shape_cast %78 : vector<32xf32> to vector<32x1xf32>
    %80 = tpu.reciprocal %79 {approx = true} : vector<32x1xf32> -> vector<32x1xf32>
    %81 = vector.broadcast %80 : vector<32x1xf32> to vector<32x8xf32>
    %82 = arith.mulf %77, %81 : vector<32x8xf32>
    %83 = vector.extract_strided_slice %82 {offsets = [0, 0], sizes = [8, 8], strides = [1, 1]} : vector<32x8xf32> to vector<8x8xf32>
    %84 = arith.truncf %83 : vector<8x8xf32> to vector<8x8xbf16>
    %85 = vector.extract_strided_slice %47 {offsets = [0, 0], sizes = [8, 32], strides = [1, 1]} : vector<8x128xf32> to vector<8x32xf32>
    %86 = arith.truncf %85 : vector<8x32xf32> to vector<8x32xbf16>
    %cst_26 = arith.constant dense<0.000000e+00> : vector<8x32xf32>
    %87 = tpu.matmul %84, %86, %cst_26 {dimension_numbers = #tpu.dot_dimension_numbers<[1], [0], [0], [1], [0, 0, 1, 1], [], []>} : vector<8x8xbf16>, vector<8x32xbf16>, vector<8x32xf32> -> vector<8x32xf32>
    %88 = vector.extract_strided_slice %82 {offsets = [8, 0], sizes = [8, 8], strides = [1, 1]} : vector<32x8xf32> to vector<8x8xf32>
    %89 = arith.truncf %88 : vector<8x8xf32> to vector<8x8xbf16>
    %90 = vector.extract_strided_slice %47 {offsets = [0, 32], sizes = [8, 32], strides = [1, 1]} : vector<8x128xf32> to vector<8x32xf32>
    %91 = arith.truncf %90 : vector<8x32xf32> to vector<8x32xbf16>
    %cst_27 = arith.constant dense<0.000000e+00> : vector<8x32xf32>
    %92 = tpu.matmul %89, %91, %cst_27 {dimension_numbers = #tpu.dot_dimension_numbers<[1], [0], [0], [1], [0, 0, 1, 1], [], []>} : vector<8x8xbf16>, vector<8x32xbf16>, vector<8x32xf32> -> vector<8x32xf32>
    %93 = vector.extract_strided_slice %82 {offsets = [16, 0], sizes = [8, 8], strides = [1, 1]} : vector<32x8xf32> to vector<8x8xf32>
    %94 = arith.truncf %93 : vector<8x8xf32> to vector<8x8xbf16>
    %95 = vector.extract_strided_slice %47 {offsets = [0, 64], sizes = [8, 32], strides = [1, 1]} : vector<8x128xf32> to vector<8x32xf32>
    %96 = arith.truncf %95 : vector<8x32xf32> to vector<8x32xbf16>
    %cst_28 = arith.constant dense<0.000000e+00> : vector<8x32xf32>
    %97 = tpu.matmul %94, %96, %cst_28 {dimension_numbers = #tpu.dot_dimension_numbers<[1], [0], [0], [1], [0, 0, 1, 1], [], []>} : vector<8x8xbf16>, vector<8x32xbf16>, vector<8x32xf32> -> vector<8x32xf32>
    %98 = vector.extract_strided_slice %82 {offsets = [24, 0], sizes = [8, 8], strides = [1, 1]} : vector<32x8xf32> to vector<8x8xf32>
    %99 = arith.truncf %98 : vector<8x8xf32> to vector<8x8xbf16>
    %100 = vector.extract_strided_slice %47 {offsets = [0, 96], sizes = [8, 32], strides = [1, 1]} : vector<8x128xf32> to vector<8x32xf32>
    %101 = arith.truncf %100 : vector<8x32xf32> to vector<8x32xbf16>
    %cst_29 = arith.constant dense<0.000000e+00> : vector<8x32xf32>
    %102 = tpu.matmul %99, %101, %cst_29 {dimension_numbers = #tpu.dot_dimension_numbers<[1], [0], [0], [1], [0, 0, 1, 1], [], []>} : vector<8x8xbf16>, vector<8x32xbf16>, vector<8x32xf32> -> vector<8x32xf32>
    %103 = tpu.concatenate %87, %92, %97, %102 in 1 : vector<8x32xf32>, vector<8x32xf32>, vector<8x32xf32>, vector<8x32xf32> -> vector<8x128xf32>
    %104 = arith.truncf %103 : vector<8x128xf32> to vector<8x128xbf16>
    %c0_30 = arith.constant 0 : index
    %c0_31 = arith.constant 0 : index
    %105 = vector.load %arg8[%c0_30, %c0_31] : memref<128x128xbf16, #tpu.memory_space<vmem>>, vector<128x128xbf16>
    %cst_32 = arith.constant dense<0.000000e+00> : vector<8x128xf32>
    %106 = tpu.matmul %104, %105, %cst_32 {dimension_numbers = #tpu.dot_dimension_numbers<[1], [0], [0], [1], [0, 0, 1, 1], [], []>} : vector<8x128xbf16>, vector<128x128xbf16>, vector<8x128xf32> -> vector<8x128xf32>
    %c0_33 = arith.constant 0 : index
    %c0_34 = arith.constant 0 : index
    %107 = vector.load %arg9[%c0_33, %c0_34] : memref<1x128xf32, #tpu.memory_space<vmem>>, vector<1x128xf32>
    %108 = vector.broadcast %107 : vector<1x128xf32> to vector<8x128xf32>
    %109 = arith.addf %106, %108 : vector<8x128xf32>
    %110 = arith.addf %1, %109 : vector<8x128xf32>
    %111 = vector.extract_strided_slice %4 {offsets = [1, 0], sizes = [1, 128], strides = [1, 1]} : vector<3x128xf32> to vector<1x128xf32>
    %112 = vector.extract_strided_slice %5 {offsets = [1, 0], sizes = [1, 128], strides = [1, 1]} : vector<3x128xf32> to vector<1x128xf32>
    %cst_35 = arith.constant dense<0.000000e+00> : vector<8xf32>
    %113 = vector.multi_reduction <add>, %110, %cst_35 [1] : vector<8x128xf32> to vector<8xf32>
    %114 = vector.shape_cast %113 : vector<8xf32> to vector<8x1xf32>
    %cst_36 = arith.constant 1.280000e+02 : f32
    %115 = vector.broadcast %cst_36 : f32 to vector<8x1xf32>
    %116 = arith.divf %114, %115 : vector<8x1xf32>
    %117 = vector.broadcast %116 : vector<8x1xf32> to vector<8x128xf32>
    %118 = arith.subf %110, %117 : vector<8x128xf32>
    %119 = arith.mulf %118, %118 : vector<8x128xf32>
    %cst_37 = arith.constant dense<0.000000e+00> : vector<8xf32>
    %120 = vector.multi_reduction <add>, %119, %cst_37 [1] : vector<8x128xf32> to vector<8xf32>
    %121 = vector.shape_cast %120 : vector<8xf32> to vector<8x1xf32>
    %cst_38 = arith.constant 1.280000e+02 : f32
    %122 = vector.broadcast %cst_38 : f32 to vector<8x1xf32>
    %123 = arith.divf %121, %122 : vector<8x1xf32>
    %cst_39 = arith.constant 9.99999974E-6 : f32
    %124 = vector.broadcast %cst_39 : f32 to vector<8x1xf32>
    %125 = arith.addf %123, %124 : vector<8x1xf32>
    %126 = math.rsqrt %125 : vector<8x1xf32>
    %127 = vector.broadcast %126 : vector<8x1xf32> to vector<8x128xf32>
    %128 = arith.mulf %118, %127 : vector<8x128xf32>
    %129 = vector.broadcast %111 : vector<1x128xf32> to vector<8x128xf32>
    %130 = arith.mulf %128, %129 : vector<8x128xf32>
    %131 = vector.broadcast %112 : vector<1x128xf32> to vector<8x128xf32>
    %132 = arith.addf %130, %131 : vector<8x128xf32>
    %133 = arith.truncf %132 : vector<8x128xf32> to vector<8x128xbf16>
    %c0_40 = arith.constant 0 : index
    %c0_41 = arith.constant 0 : index
    %134 = vector.load %arg10[%c0_40, %c0_41] : memref<128x128xbf16, #tpu.memory_space<vmem>>, vector<128x128xbf16>
    %cst_42 = arith.constant dense<0.000000e+00> : vector<8x128xf32>
    %135 = tpu.matmul %133, %134, %cst_42 {dimension_numbers = #tpu.dot_dimension_numbers<[1], [0], [0], [1], [0, 0, 1, 1], [], []>} : vector<8x128xbf16>, vector<128x128xbf16>, vector<8x128xf32> -> vector<8x128xf32>
    %c0_43 = arith.constant 0 : index
    %c0_44 = arith.constant 0 : index
    %136 = vector.load %arg11[%c0_43, %c0_44] : memref<1x128xf32, #tpu.memory_space<vmem>>, vector<1x128xf32>
    %137 = vector.broadcast %136 : vector<1x128xf32> to vector<8x128xf32>
    %138 = arith.addf %135, %137 : vector<8x128xf32>
    %c0_45 = arith.constant 0 : index
    %c0_46 = arith.constant 0 : index
    %139 = vector.load %arg12[%c0_45, %c0_46] : memref<128x256xbf16, #tpu.memory_space<vmem>>, vector<128x256xbf16>
    %cst_47 = arith.constant dense<0.000000e+00> : vector<16x256xf32>
    %140 = tpu.matmul %3, %139, %cst_47 {dimension_numbers = #tpu.dot_dimension_numbers<[1], [0], [0], [1], [0, 0, 1, 1], [], []>} : vector<16x128xbf16>, vector<128x256xbf16>, vector<16x256xf32> -> vector<16x256xf32>
    %c0_48 = arith.constant 0 : index
    %c0_49 = arith.constant 0 : index
    %141 = vector.load %arg13[%c0_48, %c0_49] : memref<1x256xf32, #tpu.memory_space<vmem>>, vector<1x256xf32>
    %142 = vector.broadcast %141 : vector<1x256xf32> to vector<16x256xf32>
    %143 = arith.addf %140, %142 : vector<16x256xf32>
    %144 = vector.extract_strided_slice %143 {offsets = [0, 0], sizes = [16, 128], strides = [1, 1]} : vector<16x256xf32> to vector<16x128xf32>
    %145 = vector.extract_strided_slice %143 {offsets = [0, 128], sizes = [16, 128], strides = [1, 1]} : vector<16x256xf32> to vector<16x128xf32>
    %146 = vector.extract_strided_slice %138 {offsets = [0, 0], sizes = [8, 32], strides = [1, 1]} : vector<8x128xf32> to vector<8x32xf32>
    %147 = arith.truncf %146 : vector<8x32xf32> to vector<8x32xbf16>
    %148 = vector.extract_strided_slice %144 {offsets = [0, 0], sizes = [16, 32], strides = [1, 1]} : vector<16x128xf32> to vector<16x32xf32>
    %149 = arith.truncf %148 : vector<16x32xf32> to vector<16x32xbf16>
    %cst_50 = arith.constant dense<0.000000e+00> : vector<8x16xf32>
    %150 = tpu.matmul %147, %149, %cst_50 {dimension_numbers = #tpu.dot_dimension_numbers<[1], [1], [0], [0], [0, 0, 1, 0], [], []>} : vector<8x32xbf16>, vector<16x32xbf16>, vector<8x16xf32> -> vector<8x16xf32>
    %151 = vector.extract_strided_slice %138 {offsets = [0, 32], sizes = [8, 32], strides = [1, 1]} : vector<8x128xf32> to vector<8x32xf32>
    %152 = arith.truncf %151 : vector<8x32xf32> to vector<8x32xbf16>
    %153 = vector.extract_strided_slice %144 {offsets = [0, 32], sizes = [16, 32], strides = [1, 1]} : vector<16x128xf32> to vector<16x32xf32>
    %154 = arith.truncf %153 : vector<16x32xf32> to vector<16x32xbf16>
    %cst_51 = arith.constant dense<0.000000e+00> : vector<8x16xf32>
    %155 = tpu.matmul %152, %154, %cst_51 {dimension_numbers = #tpu.dot_dimension_numbers<[1], [1], [0], [0], [0, 0, 1, 0], [], []>} : vector<8x32xbf16>, vector<16x32xbf16>, vector<8x16xf32> -> vector<8x16xf32>
    %156 = vector.extract_strided_slice %138 {offsets = [0, 64], sizes = [8, 32], strides = [1, 1]} : vector<8x128xf32> to vector<8x32xf32>
    %157 = arith.truncf %156 : vector<8x32xf32> to vector<8x32xbf16>
    %158 = vector.extract_strided_slice %144 {offsets = [0, 64], sizes = [16, 32], strides = [1, 1]} : vector<16x128xf32> to vector<16x32xf32>
    %159 = arith.truncf %158 : vector<16x32xf32> to vector<16x32xbf16>
    %cst_52 = arith.constant dense<0.000000e+00> : vector<8x16xf32>
    %160 = tpu.matmul %157, %159, %cst_52 {dimension_numbers = #tpu.dot_dimension_numbers<[1], [1], [0], [0], [0, 0, 1, 0], [], []>} : vector<8x32xbf16>, vector<16x32xbf16>, vector<8x16xf32> -> vector<8x16xf32>
    %161 = vector.extract_strided_slice %138 {offsets = [0, 96], sizes = [8, 32], strides = [1, 1]} : vector<8x128xf32> to vector<8x32xf32>
    %162 = arith.truncf %161 : vector<8x32xf32> to vector<8x32xbf16>
    %163 = vector.extract_strided_slice %144 {offsets = [0, 96], sizes = [16, 32], strides = [1, 1]} : vector<16x128xf32> to vector<16x32xf32>
    %164 = arith.truncf %163 : vector<16x32xf32> to vector<16x32xbf16>
    %cst_53 = arith.constant dense<0.000000e+00> : vector<8x16xf32>
    %165 = tpu.matmul %162, %164, %cst_53 {dimension_numbers = #tpu.dot_dimension_numbers<[1], [1], [0], [0], [0, 0, 1, 0], [], []>} : vector<8x32xbf16>, vector<16x32xbf16>, vector<8x16xf32> -> vector<8x16xf32>
    %166 = tpu.concatenate %150, %155, %160, %165 in 0 : vector<8x16xf32>, vector<8x16xf32>, vector<8x16xf32>, vector<8x16xf32> -> vector<32x16xf32>
    %cst_54 = arith.constant dense<0xFF800000> : vector<32xf32>
    %167 = vector.multi_reduction <maximumf>, %166, %cst_54 [1] : vector<32x16xf32> to vector<32xf32>
    %168 = vector.shape_cast %167 : vector<32xf32> to vector<32x1xf32>
    %169 = vector.broadcast %168 : vector<32x1xf32> to vector<32x16xf32>
    %170 = arith.subf %166, %169 : vector<32x16xf32>
    %171 = math.exp %170 : vector<32x16xf32>
    %cst_55 = arith.constant dense<0.000000e+00> : vector<32xf32>
    %172 = vector.multi_reduction <add>, %171, %cst_55 [1] : vector<32x16xf32> to vector<32xf32>
    %173 = vector.shape_cast %172 : vector<32xf32> to vector<32x1xf32>
    %174 = tpu.reciprocal %173 {approx = true} : vector<32x1xf32> -> vector<32x1xf32>
    %175 = vector.broadcast %174 : vector<32x1xf32> to vector<32x16xf32>
    %176 = arith.mulf %171, %175 : vector<32x16xf32>
    %177 = vector.extract_strided_slice %176 {offsets = [0, 0], sizes = [8, 16], strides = [1, 1]} : vector<32x16xf32> to vector<8x16xf32>
    %178 = arith.truncf %177 : vector<8x16xf32> to vector<8x16xbf16>
    %179 = vector.extract_strided_slice %145 {offsets = [0, 0], sizes = [16, 32], strides = [1, 1]} : vector<16x128xf32> to vector<16x32xf32>
    %180 = arith.truncf %179 : vector<16x32xf32> to vector<16x32xbf16>
    %cst_56 = arith.constant dense<0.000000e+00> : vector<8x32xf32>
    %181 = tpu.matmul %178, %180, %cst_56 {dimension_numbers = #tpu.dot_dimension_numbers<[1], [0], [0], [1], [0, 0, 1, 1], [], []>} : vector<8x16xbf16>, vector<16x32xbf16>, vector<8x32xf32> -> vector<8x32xf32>
    %182 = vector.extract_strided_slice %176 {offsets = [8, 0], sizes = [8, 16], strides = [1, 1]} : vector<32x16xf32> to vector<8x16xf32>
    %183 = arith.truncf %182 : vector<8x16xf32> to vector<8x16xbf16>
    %184 = vector.extract_strided_slice %145 {offsets = [0, 32], sizes = [16, 32], strides = [1, 1]} : vector<16x128xf32> to vector<16x32xf32>
    %185 = arith.truncf %184 : vector<16x32xf32> to vector<16x32xbf16>
    %cst_57 = arith.constant dense<0.000000e+00> : vector<8x32xf32>
    %186 = tpu.matmul %183, %185, %cst_57 {dimension_numbers = #tpu.dot_dimension_numbers<[1], [0], [0], [1], [0, 0, 1, 1], [], []>} : vector<8x16xbf16>, vector<16x32xbf16>, vector<8x32xf32> -> vector<8x32xf32>
    %187 = vector.extract_strided_slice %176 {offsets = [16, 0], sizes = [8, 16], strides = [1, 1]} : vector<32x16xf32> to vector<8x16xf32>
    %188 = arith.truncf %187 : vector<8x16xf32> to vector<8x16xbf16>
    %189 = vector.extract_strided_slice %145 {offsets = [0, 64], sizes = [16, 32], strides = [1, 1]} : vector<16x128xf32> to vector<16x32xf32>
    %190 = arith.truncf %189 : vector<16x32xf32> to vector<16x32xbf16>
    %cst_58 = arith.constant dense<0.000000e+00> : vector<8x32xf32>
    %191 = tpu.matmul %188, %190, %cst_58 {dimension_numbers = #tpu.dot_dimension_numbers<[1], [0], [0], [1], [0, 0, 1, 1], [], []>} : vector<8x16xbf16>, vector<16x32xbf16>, vector<8x32xf32> -> vector<8x32xf32>
    %192 = vector.extract_strided_slice %176 {offsets = [24, 0], sizes = [8, 16], strides = [1, 1]} : vector<32x16xf32> to vector<8x16xf32>
    %193 = arith.truncf %192 : vector<8x16xf32> to vector<8x16xbf16>
    %194 = vector.extract_strided_slice %145 {offsets = [0, 96], sizes = [16, 32], strides = [1, 1]} : vector<16x128xf32> to vector<16x32xf32>
    %195 = arith.truncf %194 : vector<16x32xf32> to vector<16x32xbf16>
    %cst_59 = arith.constant dense<0.000000e+00> : vector<8x32xf32>
    %196 = tpu.matmul %193, %195, %cst_59 {dimension_numbers = #tpu.dot_dimension_numbers<[1], [0], [0], [1], [0, 0, 1, 1], [], []>} : vector<8x16xbf16>, vector<16x32xbf16>, vector<8x32xf32> -> vector<8x32xf32>
    %197 = tpu.concatenate %181, %186, %191, %196 in 1 : vector<8x32xf32>, vector<8x32xf32>, vector<8x32xf32>, vector<8x32xf32> -> vector<8x128xf32>
    %198 = arith.truncf %197 : vector<8x128xf32> to vector<8x128xbf16>
    %c0_60 = arith.constant 0 : index
    %c0_61 = arith.constant 0 : index
    %199 = vector.load %arg14[%c0_60, %c0_61] : memref<128x128xbf16, #tpu.memory_space<vmem>>, vector<128x128xbf16>
    %cst_62 = arith.constant dense<0.000000e+00> : vector<8x128xf32>
    %200 = tpu.matmul %198, %199, %cst_62 {dimension_numbers = #tpu.dot_dimension_numbers<[1], [0], [0], [1], [0, 0, 1, 1], [], []>} : vector<8x128xbf16>, vector<128x128xbf16>, vector<8x128xf32> -> vector<8x128xf32>
    %c0_63 = arith.constant 0 : index
    %c0_64 = arith.constant 0 : index
    %201 = vector.load %arg15[%c0_63, %c0_64] : memref<1x128xf32, #tpu.memory_space<vmem>>, vector<1x128xf32>
    %202 = vector.broadcast %201 : vector<1x128xf32> to vector<8x128xf32>
    %203 = arith.addf %200, %202 : vector<8x128xf32>
    %204 = arith.addf %110, %203 : vector<8x128xf32>
    %205 = vector.extract_strided_slice %4 {offsets = [2, 0], sizes = [1, 128], strides = [1, 1]} : vector<3x128xf32> to vector<1x128xf32>
    %206 = vector.extract_strided_slice %5 {offsets = [2, 0], sizes = [1, 128], strides = [1, 1]} : vector<3x128xf32> to vector<1x128xf32>
    %cst_65 = arith.constant dense<0.000000e+00> : vector<8xf32>
    %207 = vector.multi_reduction <add>, %204, %cst_65 [1] : vector<8x128xf32> to vector<8xf32>
    %208 = vector.shape_cast %207 : vector<8xf32> to vector<8x1xf32>
    %cst_66 = arith.constant 1.280000e+02 : f32
    %209 = vector.broadcast %cst_66 : f32 to vector<8x1xf32>
    %210 = arith.divf %208, %209 : vector<8x1xf32>
    %211 = vector.broadcast %210 : vector<8x1xf32> to vector<8x128xf32>
    %212 = arith.subf %204, %211 : vector<8x128xf32>
    %213 = arith.mulf %212, %212 : vector<8x128xf32>
    %cst_67 = arith.constant dense<0.000000e+00> : vector<8xf32>
    %214 = vector.multi_reduction <add>, %213, %cst_67 [1] : vector<8x128xf32> to vector<8xf32>
    %215 = vector.shape_cast %214 : vector<8xf32> to vector<8x1xf32>
    %cst_68 = arith.constant 1.280000e+02 : f32
    %216 = vector.broadcast %cst_68 : f32 to vector<8x1xf32>
    %217 = arith.divf %215, %216 : vector<8x1xf32>
    %cst_69 = arith.constant 9.99999974E-6 : f32
    %218 = vector.broadcast %cst_69 : f32 to vector<8x1xf32>
    %219 = arith.addf %217, %218 : vector<8x1xf32>
    %220 = math.rsqrt %219 : vector<8x1xf32>
    %221 = vector.broadcast %220 : vector<8x1xf32> to vector<8x128xf32>
    %222 = arith.mulf %212, %221 : vector<8x128xf32>
    %223 = vector.broadcast %205 : vector<1x128xf32> to vector<8x128xf32>
    %224 = arith.mulf %222, %223 : vector<8x128xf32>
    %225 = vector.broadcast %206 : vector<1x128xf32> to vector<8x128xf32>
    %226 = arith.addf %224, %225 : vector<8x128xf32>
    %227 = arith.truncf %226 : vector<8x128xf32> to vector<8x128xbf16>
    %c0_70 = arith.constant 0 : index
    %c0_71 = arith.constant 0 : index
    %228 = vector.load %arg16[%c0_70, %c0_71] : memref<128x512xbf16, #tpu.memory_space<vmem>>, vector<128x512xbf16>
    %cst_72 = arith.constant dense<0.000000e+00> : vector<8x512xf32>
    %229 = tpu.matmul %227, %228, %cst_72 {dimension_numbers = #tpu.dot_dimension_numbers<[1], [0], [0], [1], [0, 0, 1, 1], [], []>} : vector<8x128xbf16>, vector<128x512xbf16>, vector<8x512xf32> -> vector<8x512xf32>
    %c0_73 = arith.constant 0 : index
    %c0_74 = arith.constant 0 : index
    %230 = vector.load %arg17[%c0_73, %c0_74] : memref<1x512xf32, #tpu.memory_space<vmem>>, vector<1x512xf32>
    %231 = vector.broadcast %230 : vector<1x512xf32> to vector<8x512xf32>
    %232 = arith.addf %229, %231 : vector<8x512xf32>
    %cst_75 = arith.constant 5.000000e-01 : f32
    %233 = vector.broadcast %cst_75 : f32 to vector<8x512xf32>
    %234 = arith.mulf %233, %232 : vector<8x512xf32>
    %235 = arith.mulf %232, %232 : vector<8x512xf32>
    %236 = arith.mulf %235, %232 : vector<8x512xf32>
    %cst_76 = arith.constant 4.471500e-02 : f32
    %237 = vector.broadcast %cst_76 : f32 to vector<8x512xf32>
    %238 = arith.mulf %237, %236 : vector<8x512xf32>
    %239 = arith.addf %232, %238 : vector<8x512xf32>
    %cst_77 = arith.constant 0.797884583 : f32
    %240 = vector.broadcast %cst_77 : f32 to vector<8x512xf32>
    %241 = arith.mulf %240, %239 : vector<8x512xf32>
    %242 = math.tanh %241 : vector<8x512xf32>
    %cst_78 = arith.constant 1.000000e+00 : f32
    %243 = vector.broadcast %cst_78 : f32 to vector<8x512xf32>
    %244 = arith.addf %243, %242 : vector<8x512xf32>
    %245 = arith.mulf %234, %244 : vector<8x512xf32>
    %246 = arith.truncf %245 : vector<8x512xf32> to vector<8x512xbf16>
    %c0_79 = arith.constant 0 : index
    %c0_80 = arith.constant 0 : index
    %247 = vector.load %arg18[%c0_79, %c0_80] : memref<512x128xbf16, #tpu.memory_space<vmem>>, vector<512x128xbf16>
    %cst_81 = arith.constant dense<0.000000e+00> : vector<8x128xf32>
    %248 = tpu.matmul %246, %247, %cst_81 {dimension_numbers = #tpu.dot_dimension_numbers<[1], [0], [0], [1], [0, 0, 1, 1], [], []>} : vector<8x512xbf16>, vector<512x128xbf16>, vector<8x128xf32> -> vector<8x128xf32>
    %c0_82 = arith.constant 0 : index
    %c0_83 = arith.constant 0 : index
    %249 = vector.load %arg19[%c0_82, %c0_83] : memref<1x128xf32, #tpu.memory_space<vmem>>, vector<1x128xf32>
    %250 = vector.broadcast %249 : vector<1x128xf32> to vector<8x128xf32>
    %251 = arith.addf %248, %250 : vector<8x128xf32>
    %252 = arith.addf %204, %251 : vector<8x128xf32>
    %c0_84 = arith.constant 0 : index
    %c0_85 = arith.constant 0 : index
    %c0_86 = arith.constant 0 : index
    %253 = vector.load %arg20[%c0_84, %c0_85, %c0_86] : memref<1x8x128xf32, #tpu.memory_space<vmem>>, vector<1x8x128xf32>
    %254 = vector.shape_cast %253 : vector<1x8x128xf32> to vector<8x128xf32>
    %255 = vector.shape_cast %252 : vector<8x128xf32> to vector<1x8x128xf32>
    tpu.vector_store %arg20[%c0_84, %c0_85, %c0_86], %255 {strides = array<i32>} : memref<1x8x128xf32, #tpu.memory_space<vmem>>, vector<1x8x128xf32>,
    return
  }
  func.func @transform_0(%arg0: i32, %arg1: memref<2xi32, #tpu.memory_space<smem>>) -> (i32, i32, i32) {
    %c0_i32 = arith.constant 0 : i32
    %c0_i32_0 = arith.constant 0 : i32
    %c0_i32_1 = arith.constant 0 : i32
    return %arg0, %c0_i32, %c0_i32_0 : i32, i32, i32
  }
  func.func @transform_1(%arg0: i32, %arg1: memref<2xi32, #tpu.memory_space<smem>>) -> (i32, i32, i32) {
    %c0_i32 = arith.constant 0 : i32
    %c0_i32_0 = arith.constant 0 : i32
    %c0_i32_1 = arith.constant 0 : i32
    return %arg0, %c0_i32, %c0_i32_0 : i32, i32, i32
  }
  func.func @transform_2(%arg0: i32, %arg1: memref<2xi32, #tpu.memory_space<smem>>) -> (i32, i32) {
    %c0_i32 = arith.constant 0 : i32
    %c0_i32_0 = arith.constant 0 : i32
    %c0_i32_1 = arith.constant 0 : i32
    return %c0_i32, %c0_i32_0 : i32, i32
  }
  func.func @transform_3(%arg0: i32, %arg1: memref<2xi32, #tpu.memory_space<smem>>) -> (i32, i32) {
    %c0_i32 = arith.constant 0 : i32
    %c0_i32_0 = arith.constant 0 : i32
    %c0_i32_1 = arith.constant 0 : i32
    return %c0_i32, %c0_i32_0 : i32, i32
  }
  func.func @transform_4(%arg0: i32, %arg1: memref<2xi32, #tpu.memory_space<smem>>) -> (i32, i32) {
    %c0_i32 = arith.constant 0 : i32
    %c0_i32_0 = arith.constant 0 : i32
    %c0_i32_1 = arith.constant 0 : i32
    return %c0_i32, %c0_i32_0 : i32, i32
  }
  func.func @transform_5(%arg0: i32, %arg1: memref<2xi32, #tpu.memory_space<smem>>) -> (i32, i32) {
    %c0_i32 = arith.constant 0 : i32
    %c0_i32_0 = arith.constant 0 : i32
    %c0_i32_1 = arith.constant 0 : i32
    return %c0_i32, %c0_i32_0 : i32, i32
  }
  func.func @transform_6(%arg0: i32, %arg1: memref<2xi32, #tpu.memory_space<smem>>) -> (i32, i32) {
    %c0_i32 = arith.constant 0 : i32
    %c0_i32_0 = arith.constant 0 : i32
    %c0_i32_1 = arith.constant 0 : i32
    return %c0_i32, %c0_i32_0 : i32, i32
  }
  func.func @transform_7(%arg0: i32, %arg1: memref<2xi32, #tpu.memory_space<smem>>) -> (i32, i32) {
    %c0_i32 = arith.constant 0 : i32
    %c0_i32_0 = arith.constant 0 : i32
    %c0_i32_1 = arith.constant 0 : i32
    return %c0_i32, %c0_i32_0 : i32, i32
  }
  func.func @transform_8(%arg0: i32, %arg1: memref<2xi32, #tpu.memory_space<smem>>) -> (i32, i32) {
    %c0_i32 = arith.constant 0 : i32
    %c0_i32_0 = arith.constant 0 : i32
    %c0_i32_1 = arith.constant 0 : i32
    return %c0_i32, %c0_i32_0 : i32, i32
  }
  func.func @transform_9(%arg0: i32, %arg1: memref<2xi32, #tpu.memory_space<smem>>) -> (i32, i32) {
    %c0_i32 = arith.constant 0 : i32
    %c0_i32_0 = arith.constant 0 : i32
    %c0_i32_1 = arith.constant 0 : i32
    return %c0_i32, %c0_i32_0 : i32, i32
  }
  func.func @transform_10(%arg0: i32, %arg1: memref<2xi32, #tpu.memory_space<smem>>) -> (i32, i32) {
    %c0_i32 = arith.constant 0 : i32
    %c0_i32_0 = arith.constant 0 : i32
    %c0_i32_1 = arith.constant 0 : i32
    return %c0_i32, %c0_i32_0 : i32, i32
  }
  func.func @transform_11(%arg0: i32, %arg1: memref<2xi32, #tpu.memory_space<smem>>) -> (i32, i32) {
    %c0_i32 = arith.constant 0 : i32
    %c0_i32_0 = arith.constant 0 : i32
    %c0_i32_1 = arith.constant 0 : i32
    return %c0_i32, %c0_i32_0 : i32, i32
  }
  func.func @transform_12(%arg0: i32, %arg1: memref<2xi32, #tpu.memory_space<smem>>) -> (i32, i32) {
    %c0_i32 = arith.constant 0 : i32
    %c0_i32_0 = arith.constant 0 : i32
    %c0_i32_1 = arith.constant 0 : i32
    return %c0_i32, %c0_i32_0 : i32, i32
  }
  func.func @transform_13(%arg0: i32, %arg1: memref<2xi32, #tpu.memory_space<smem>>) -> (i32, i32) {
    %c0_i32 = arith.constant 0 : i32
    %c0_i32_0 = arith.constant 0 : i32
    %c0_i32_1 = arith.constant 0 : i32
    return %c0_i32, %c0_i32_0 : i32, i32
  }
  func.func @transform_14(%arg0: i32, %arg1: memref<2xi32, #tpu.memory_space<smem>>) -> (i32, i32) {
    %c0_i32 = arith.constant 0 : i32
    %c0_i32_0 = arith.constant 0 : i32
    %c0_i32_1 = arith.constant 0 : i32
    return %c0_i32, %c0_i32_0 : i32, i32
  }
  func.func @transform_15(%arg0: i32, %arg1: memref<2xi32, #tpu.memory_space<smem>>) -> (i32, i32) {
    %c0_i32 = arith.constant 0 : i32
    %c0_i32_0 = arith.constant 0 : i32
    %c0_i32_1 = arith.constant 0 : i32
    return %c0_i32, %c0_i32_0 : i32, i32
  }
  func.func @transform_16(%arg0: i32, %arg1: memref<2xi32, #tpu.memory_space<smem>>) -> (i32, i32) {
    %c0_i32 = arith.constant 0 : i32
    %c0_i32_0 = arith.constant 0 : i32
    %c0_i32_1 = arith.constant 0 : i32
    return %c0_i32, %c0_i32_0 : i32, i32
  }
  func.func @transform_17(%arg0: i32, %arg1: memref<2xi32, #tpu.memory_space<smem>>) -> (i32, i32) {
    %c0_i32 = arith.constant 0 : i32
    %c0_i32_0 = arith.constant 0 : i32
    %c0_i32_1 = arith.constant 0 : i32
    return %c0_i32, %c0_i32_0 : i32, i32
  }
  func.func @transform_18(%arg0: i32, %arg1: memref<2xi32, #tpu.memory_space<smem>>) -> (i32, i32, i32) {
    %c0_i32 = arith.constant 0 : i32
    %c0_i32_0 = arith.constant 0 : i32
    %c0_i32_1 = arith.constant 0 : i32
    return %arg0, %c0_i32, %c0_i32_0 : i32, i32, i32
  }
}

module attributes {stable_mosaic.version = 11 : i64} {
  func.func @_decoder_layer_kernel(%arg0: i32, %arg1: memref<2xi32, #tpu.memory_space<smem>>, %arg2: memref<1x8x128xf32, #tpu.memory_space<vmem>>, %arg3: memref<1x16x128xbf16, #tpu.memory_space<vmem>>, %arg4: memref<3x128xf32, #tpu.memory_space<vmem>>, %arg5: memref<3x128xf32, #tpu.memory_space<vmem>>, %arg6: memref<128x384xbf16, #tpu.memory_space<vmem>>, %arg7: memref<1x384xf32, #tpu.memory_space<vmem>>, %arg8: memref<128x128xbf16, #tpu.memory_space<vmem>>, %arg9: memref<1x128xf32, #tpu.memory_space<vmem>>, %arg10: memref<128x128xbf16, #tpu.memory_space<vmem>>, %arg11: memref<1x128xf32, #tpu.memory_space<vmem>>, %arg12: memref<128x256xbf16, #tpu.memory_space<vmem>>, %arg13: memref<1x256xf32, #tpu.memory_space<vmem>>, %arg14: memref<128x128xbf16, #tpu.memory_space<vmem>>, %arg15: memref<1x128xf32, #tpu.memory_space<vmem>>, %arg16: memref<128x512xbf16, #tpu.memory_space<vmem>>, %arg17: memref<1x512xf32, #tpu.memory_space<vmem>>, %arg18: memref<512x128xbf16, #tpu.memory_space<vmem>>, %arg19: memref<1x128xf32, #tpu.memory_space<vmem>>, %arg20: memref<1x8x128xf32, #tpu.memory_space<vmem>>) attributes {dimension_semantics = [#tpu.dimension_semantics<parallel>], iteration_bounds = array<i64: 2>, scalar_prefetch = 1 : i64, scratch_operands = 0 : i64, tpu.core_type = #tpu.core_type<tc>, window_params = [{transform_indices = @transform_0, window_bounds = array<i64: 1, 8, 128>}, {transform_indices = @transform_1, window_bounds = array<i64: 1, 16, 128>}, {pipeline_mode = #tpu.pipeline_mode<synchronous>, transform_indices = @transform_2, window_bounds = array<i64: 3, 128>}, {pipeline_mode = #tpu.pipeline_mode<synchronous>, transform_indices = @transform_3, window_bounds = array<i64: 3, 128>}, {pipeline_mode = #tpu.pipeline_mode<synchronous>, transform_indices = @transform_4, window_bounds = array<i64: 128, 384>}, {pipeline_mode = #tpu.pipeline_mode<synchronous>, transform_indices = @transform_5, window_bounds = array<i64: 1, 384>}, {pipeline_mode = #tpu.pipeline_mode<synchronous>, transform_indices = @transform_6, window_bounds = array<i64: 128, 128>}, {pipeline_mode = #tpu.pipeline_mode<synchronous>, transform_indices = @transform_7, window_bounds = array<i64: 1, 128>}, {pipeline_mode = #tpu.pipeline_mode<synchronous>, transform_indices = @transform_8, window_bounds = array<i64: 128, 128>}, {pipeline_mode = #tpu.pipeline_mode<synchronous>, transform_indices = @transform_9, window_bounds = array<i64: 1, 128>}, {pipeline_mode = #tpu.pipeline_mode<synchronous>, transform_indices = @transform_10, window_bounds = array<i64: 128, 256>}, {pipeline_mode = #tpu.pipeline_mode<synchronous>, transform_indices = @transform_11, window_bounds = array<i64: 1, 256>}, {pipeline_mode = #tpu.pipeline_mode<synchronous>, transform_indices = @transform_12, window_bounds = array<i64: 128, 128>}, {pipeline_mode = #tpu.pipeline_mode<synchronous>, transform_indices = @transform_13, window_bounds = array<i64: 1, 128>}, {pipeline_mode = #tpu.pipeline_mode<synchronous>, transform_indices = @transform_14, window_bounds = array<i64: 128, 512>}, {pipeline_mode = #tpu.pipeline_mode<synchronous>, transform_indices = @transform_15, window_bounds = array<i64: 1, 512>}, {pipeline_mode = #tpu.pipeline_mode<synchronous>, transform_indices = @transform_16, window_bounds = array<i64: 512, 128>}, {pipeline_mode = #tpu.pipeline_mode<synchronous>, transform_indices = @transform_17, window_bounds = array<i64: 1, 128>}, {transform_indices = @transform_18, window_bounds = array<i64: 1, 8, 128>}]} {
    %c0 = arith.constant 0 : index
    %c0_0 = arith.constant 0 : index
    %c0_1 = arith.constant 0 : index
    %0 = vector.load %arg2[%c0, %c0_0, %c0_1] : memref<1x8x128xf32, #tpu.memory_space<vmem>>, vector<1x8x128xf32>
    %1 = vector.shape_cast %0 : vector<1x8x128xf32> to vector<8x128xf32>
    %c0_2 = arith.constant 0 : index
    %c0_3 = arith.constant 0 : index
    %c0_4 = arith.constant 0 : index
    %2 = vector.load %arg3[%c0_2, %c0_3, %c0_4] : memref<1x16x128xbf16, #tpu.memory_space<vmem>>, vector<1x16x128xbf16>
    %3 = vector.shape_cast %2 : vector<1x16x128xbf16> to vector<16x128xbf16>
    %c0_5 = arith.constant 0 : index
    %c0_6 = arith.constant 0 : index
    %4 = vector.load %arg4[%c0_5, %c0_6] : memref<3x128xf32, #tpu.memory_space<vmem>>, vector<3x128xf32>
    %c0_7 = arith.constant 0 : index
    %c0_8 = arith.constant 0 : index
    %5 = vector.load %arg5[%c0_7, %c0_8] : memref<3x128xf32, #tpu.memory_space<vmem>>, vector<3x128xf32>
    %6 = arith.index_cast %arg0 : i32 to index
    %7 = memref.load %arg1[%6] : memref<2xi32, #tpu.memory_space<smem>>
    %8 = tpu.iota {dimensions = array<i32: 0>} : vector<8x8xi32>
    %9 = tpu.iota {dimensions = array<i32: 1>} : vector<8x8xi32>
    %10 = arith.cmpi sgt, %9, %8 : vector<8x8xi32>
    %11 = vector.broadcast %7 : i32 to vector<8x8xi32>
    %12 = arith.cmpi sge, %9, %11 : vector<8x8xi32>
    %13 = arith.ori %10, %12 : vector<8x8xi1>
    %cst = arith.constant -1.000000e+30 : f32
    %cst_9 = arith.constant 0.000000e+00 : f32
    %14 = vector.broadcast %cst : f32 to vector<8x8xf32>
    %15 = vector.broadcast %cst_9 : f32 to vector<8x8xf32>
    %16 = arith.select %13, %14, %15 : vector<8x8xi1>, vector<8x8xf32>
    %17 = vector.extract_strided_slice %4 {offsets = [0, 0], sizes = [1, 128], strides = [1, 1]} : vector<3x128xf32> to vector<1x128xf32>
    %18 = vector.extract_strided_slice %5 {offsets = [0, 0], sizes = [1, 128], strides = [1, 1]} : vector<3x128xf32> to vector<1x128xf32>
    %cst_10 = arith.constant dense<0.000000e+00> : vector<8xf32>
    %19 = vector.multi_reduction <add>, %1, %cst_10 [1] : vector<8x128xf32> to vector<8xf32>
    %20 = vector.shape_cast %19 : vector<8xf32> to vector<8x1xf32>
    %cst_11 = arith.constant 1.280000e+02 : f32
    %21 = vector.broadcast %cst_11 : f32 to vector<8x1xf32>
    %22 = arith.divf %20, %21 : vector<8x1xf32>
    %23 = vector.broadcast %22 : vector<8x1xf32> to vector<8x128xf32>
    %24 = arith.subf %1, %23 : vector<8x128xf32>
    %25 = arith.mulf %24, %24 : vector<8x128xf32>
    %cst_12 = arith.constant dense<0.000000e+00> : vector<8xf32>
    %26 = vector.multi_reduction <add>, %25, %cst_12 [1] : vector<8x128xf32> to vector<8xf32>
    %27 = vector.shape_cast %26 : vector<8xf32> to vector<8x1xf32>
    %cst_13 = arith.constant 1.280000e+02 : f32
    %28 = vector.broadcast %cst_13 : f32 to vector<8x1xf32>
    %29 = arith.divf %27, %28 : vector<8x1xf32>
    %cst_14 = arith.constant 9.99999974E-6 : f32
    %30 = vector.broadcast %cst_14 : f32 to vector<8x1xf32>
    %31 = arith.addf %29, %30 : vector<8x1xf32>
    %32 = math.rsqrt %31 : vector<8x1xf32>
    %33 = vector.broadcast %32 : vector<8x1xf32> to vector<8x128xf32>
    %34 = arith.mulf %24, %33 : vector<8x128xf32>
    %35 = vector.broadcast %17 : vector<1x128xf32> to vector<8x128xf32>
    %36 = arith.mulf %34, %35 : vector<8x128xf32>
    %37 = vector.broadcast %18 : vector<1x128xf32> to vector<8x128xf32>
    %38 = arith.addf %36, %37 : vector<8x128xf32>
    %39 = arith.truncf %38 : vector<8x128xf32> to vector<8x128xbf16>
    %c0_15 = arith.constant 0 : index
    %c0_16 = arith.constant 0 : index
    %40 = vector.load %arg6[%c0_15, %c0_16] : memref<128x384xbf16, #tpu.memory_space<vmem>>, vector<128x384xbf16>
    %cst_17 = arith.constant dense<0.000000e+00> : vector<8x384xf32>
    %41 = tpu.matmul %39, %40, %cst_17 {dimension_numbers = #tpu.dot_dimension_numbers<[1], [0], [0], [1], [0, 0, 1, 1], [], []>} : vector<8x128xbf16>, vector<128x384xbf16>, vector<8x384xf32> -> vector<8x384xf32>
    %c0_18 = arith.constant 0 : index
    %c0_19 = arith.constant 0 : index
    %42 = vector.load %arg7[%c0_18, %c0_19] : memref<1x384xf32, #tpu.memory_space<vmem>>, vector<1x384xf32>
    %43 = vector.broadcast %42 : vector<1x384xf32> to vector<8x384xf32>
    %44 = arith.addf %41, %43 : vector<8x384xf32>
    %45 = vector.extract_strided_slice %44 {offsets = [0, 0], sizes = [8, 128], strides = [1, 1]} : vector<8x384xf32> to vector<8x128xf32>
    %46 = vector.extract_strided_slice %44 {offsets = [0, 128], sizes = [8, 128], strides = [1, 1]} : vector<8x384xf32> to vector<8x128xf32>
    %47 = vector.extract_strided_slice %44 {offsets = [0, 256], sizes = [8, 128], strides = [1, 1]} : vector<8x384xf32> to vector<8x128xf32>
    %48 = vector.extract_strided_slice %45 {offsets = [0, 0], sizes = [8, 32], strides = [1, 1]} : vector<8x128xf32> to vector<8x32xf32>
    %49 = arith.truncf %48 : vector<8x32xf32> to vector<8x32xbf16>
    %50 = vector.extract_strided_slice %46 {offsets = [0, 0], sizes = [8, 32], strides = [1, 1]} : vector<8x128xf32> to vector<8x32xf32>
    %51 = arith.truncf %50 : vector<8x32xf32> to vector<8x32xbf16>
    %cst_20 = arith.constant dense<0.000000e+00> : vector<8x8xf32>
    %52 = tpu.matmul %49, %51, %cst_20 {dimension_numbers = #tpu.dot_dimension_numbers<[1], [1], [0], [0], [0, 0, 1, 0], [], []>} : vector<8x32xbf16>, vector<8x32xbf16>, vector<8x8xf32> -> vector<8x8xf32>
    %53 = arith.addf %52, %16 : vector<8x8xf32>
    %54 = vector.extract_strided_slice %45 {offsets = [0, 32], sizes = [8, 32], strides = [1, 1]} : vector<8x128xf32> to vector<8x32xf32>
    %55 = arith.truncf %54 : vector<8x32xf32> to vector<8x32xbf16>
    %56 = vector.extract_strided_slice %46 {offsets = [0, 32], sizes = [8, 32], strides = [1, 1]} : vector<8x128xf32> to vector<8x32xf32>
    %57 = arith.truncf %56 : vector<8x32xf32> to vector<8x32xbf16>
    %cst_21 = arith.constant dense<0.000000e+00> : vector<8x8xf32>
    %58 = tpu.matmul %55, %57, %cst_21 {dimension_numbers = #tpu.dot_dimension_numbers<[1], [1], [0], [0], [0, 0, 1, 0], [], []>} : vector<8x32xbf16>, vector<8x32xbf16>, vector<8x8xf32> -> vector<8x8xf32>
    %59 = arith.addf %58, %16 : vector<8x8xf32>
    %60 = vector.extract_strided_slice %45 {offsets = [0, 64], sizes = [8, 32], strides = [1, 1]} : vector<8x128xf32> to vector<8x32xf32>
    %61 = arith.truncf %60 : vector<8x32xf32> to vector<8x32xbf16>
    %62 = vector.extract_strided_slice %46 {offsets = [0, 64], sizes = [8, 32], strides = [1, 1]} : vector<8x128xf32> to vector<8x32xf32>
    %63 = arith.truncf %62 : vector<8x32xf32> to vector<8x32xbf16>
    %cst_22 = arith.constant dense<0.000000e+00> : vector<8x8xf32>
    %64 = tpu.matmul %61, %63, %cst_22 {dimension_numbers = #tpu.dot_dimension_numbers<[1], [1], [0], [0], [0, 0, 1, 0], [], []>} : vector<8x32xbf16>, vector<8x32xbf16>, vector<8x8xf32> -> vector<8x8xf32>
    %65 = arith.addf %64, %16 : vector<8x8xf32>
    %66 = vector.extract_strided_slice %45 {offsets = [0, 96], sizes = [8, 32], strides = [1, 1]} : vector<8x128xf32> to vector<8x32xf32>
    %67 = arith.truncf %66 : vector<8x32xf32> to vector<8x32xbf16>
    %68 = vector.extract_strided_slice %46 {offsets = [0, 96], sizes = [8, 32], strides = [1, 1]} : vector<8x128xf32> to vector<8x32xf32>
    %69 = arith.truncf %68 : vector<8x32xf32> to vector<8x32xbf16>
    %cst_23 = arith.constant dense<0.000000e+00> : vector<8x8xf32>
    %70 = tpu.matmul %67, %69, %cst_23 {dimension_numbers = #tpu.dot_dimension_numbers<[1], [1], [0], [0], [0, 0, 1, 0], [], []>} : vector<8x32xbf16>, vector<8x32xbf16>, vector<8x8xf32> -> vector<8x8xf32>
    %71 = arith.addf %70, %16 : vector<8x8xf32>
    %72 = tpu.concatenate %53, %59, %65, %71 in 0 : vector<8x8xf32>, vector<8x8xf32>, vector<8x8xf32>, vector<8x8xf32> -> vector<32x8xf32>
    %cst_24 = arith.constant dense<0xFF800000> : vector<32xf32>
    %73 = vector.multi_reduction <maximumf>, %72, %cst_24 [1] : vector<32x8xf32> to vector<32xf32>
    %74 = vector.shape_cast %73 : vector<32xf32> to vector<32x1xf32>
    %75 = vector.broadcast %74 : vector<32x1xf32> to vector<32x8xf32>
    %76 = arith.subf %72, %75 : vector<32x8xf32>
    %77 = math.exp %76 : vector<32x8xf32>
    %cst_25 = arith.constant dense<0.000000e+00> : vector<32xf32>
    %78 = vector.multi_reduction <add>, %77, %cst_25 [1] : vector<32x8xf32> to vector<32xf32>
    %79 = vector.shape_cast %78 : vector<32xf32> to vector<32x1xf32>
    %80 = tpu.reciprocal %79 {approx = true} : vector<32x1xf32> -> vector<32x1xf32>
    %81 = vector.broadcast %80 : vector<32x1xf32> to vector<32x8xf32>
    %82 = arith.mulf %77, %81 : vector<32x8xf32>
    %83 = vector.extract_strided_slice %82 {offsets = [0, 0], sizes = [8, 8], strides = [1, 1]} : vector<32x8xf32> to vector<8x8xf32>
    %84 = arith.truncf %83 : vector<8x8xf32> to vector<8x8xbf16>
    %85 = vector.extract_strided_slice %47 {offsets = [0, 0], sizes = [8, 32], strides = [1, 1]} : vector<8x128xf32> to vector<8x32xf32>
    %86 = arith.truncf %85 : vector<8x32xf32> to vector<8x32xbf16>
    %cst_26 = arith.constant dense<0.000000e+00> : vector<8x32xf32>
    %87 = tpu.matmul %84, %86, %cst_26 {dimension_numbers = #tpu.dot_dimension_numbers<[1], [0], [0], [1], [0, 0, 1, 1], [], []>} : vector<8x8xbf16>, vector<8x32xbf16>, vector<8x32xf32> -> vector<8x32xf32>
    %88 = vector.extract_strided_slice %82 {offsets = [8, 0], sizes = [8, 8], strides = [1, 1]} : vector<32x8xf32> to vector<8x8xf32>
    %89 = arith.truncf %88 : vector<8x8xf32> to vector<8x8xbf16>
    %90 = vector.extract_strided_slice %47 {offsets = [0, 32], sizes = [8, 32], strides = [1, 1]} : vector<8x128xf32> to vector<8x32xf32>
    %91 = arith.truncf %90 : vector<8x32xf32> to vector<8x32xbf16>
    %cst_27 = arith.constant dense<0.000000e+00> : vector<8x32xf32>
    %92 = tpu.matmul %89, %91, %cst_27 {dimension_numbers = #tpu.dot_dimension_numbers<[1], [0], [0], [1], [0, 0, 1, 1], [], []>} : vector<8x8xbf16>, vector<8x32xbf16>, vector<8x32xf32> -> vector<8x32xf32>
    %93 = vector.extract_strided_slice %82 {offsets = [16, 0], sizes = [8, 8], strides = [1, 1]} : vector<32x8xf32> to vector<8x8xf32>
    %94 = arith.truncf %93 : vector<8x8xf32> to vector<8x8xbf16>
    %95 = vector.extract_strided_slice %47 {offsets = [0, 64], sizes = [8, 32], strides = [1, 1]} : vector<8x128xf32> to vector<8x32xf32>
    %96 = arith.truncf %95 : vector<8x32xf32> to vector<8x32xbf16>
    %cst_28 = arith.constant dense<0.000000e+00> : vector<8x32xf32>
    %97 = tpu.matmul %94, %96, %cst_28 {dimension_numbers = #tpu.dot_dimension_numbers<[1], [0], [0], [1], [0, 0, 1, 1], [], []>} : vector<8x8xbf16>, vector<8x32xbf16>, vector<8x32xf32> -> vector<8x32xf32>
    %98 = vector.extract_strided_slice %82 {offsets = [24, 0], sizes = [8, 8], strides = [1, 1]} : vector<32x8xf32> to vector<8x8xf32>
    %99 = arith.truncf %98 : vector<8x8xf32> to vector<8x8xbf16>
    %100 = vector.extract_strided_slice %47 {offsets = [0, 96], sizes = [8, 32], strides = [1, 1]} : vector<8x128xf32> to vector<8x32xf32>
    %101 = arith.truncf %100 : vector<8x32xf32> to vector<8x32xbf16>
    %cst_29 = arith.constant dense<0.000000e+00> : vector<8x32xf32>
    %102 = tpu.matmul %99, %101, %cst_29 {dimension_numbers = #tpu.dot_dimension_numbers<[1], [0], [0], [1], [0, 0, 1, 1], [], []>} : vector<8x8xbf16>, vector<8x32xbf16>, vector<8x32xf32> -> vector<8x32xf32>
    %103 = tpu.concatenate %87, %92, %97, %102 in 1 : vector<8x32xf32>, vector<8x32xf32>, vector<8x32xf32>, vector<8x32xf32> -> vector<8x128xf32>
    %104 = arith.truncf %103 : vector<8x128xf32> to vector<8x128xbf16>
    %c0_30 = arith.constant 0 : index
    %c0_31 = arith.constant 0 : index
    %105 = vector.load %arg8[%c0_30, %c0_31] : memref<128x128xbf16, #tpu.memory_space<vmem>>, vector<128x128xbf16>
    %cst_32 = arith.constant dense<0.000000e+00> : vector<8x128xf32>
    %106 = tpu.matmul %104, %105, %cst_32 {dimension_numbers = #tpu.dot_dimension_numbers<[1], [0], [0], [1], [0, 0, 1, 1], [], []>} : vector<8x128xbf16>, vector<128x128xbf16>, vector<8x128xf32> -> vector<8x128xf32>
    %c0_33 = arith.constant 0 : index
    %c0_34 = arith.constant 0 : index
    %107 = vector.load %arg9[%c0_33, %c0_34] : memref<1x128xf32, #tpu.memory_space<vmem>>, vector<1x128xf32>
    %108 = vector.broadcast %107 : vector<1x128xf32> to vector<8x128xf32>
    %109 = arith.addf %106, %108 : vector<8x128xf32>
    %110 = arith.addf %1, %109 : vector<8x128xf32>
    %111 = vector.extract_strided_slice %4 {offsets = [1, 0], sizes = [1, 128], strides = [1, 1]} : vector<3x128xf32> to vector<1x128xf32>
    %112 = vector.extract_strided_slice %5 {offsets = [1, 0], sizes = [1, 128], strides = [1, 1]} : vector<3x128xf32> to vector<1x128xf32>
    %cst_35 = arith.constant dense<0.000000e+00> : vector<8xf32>
    %113 = vector.multi_reduction <add>, %110, %cst_35 [1] : vector<8x128xf32> to vector<8xf32>
    %114 = vector.shape_cast %113 : vector<8xf32> to vector<8x1xf32>
    %cst_36 = arith.constant 1.280000e+02 : f32
    %115 = vector.broadcast %cst_36 : f32 to vector<8x1xf32>
    %116 = arith.divf %114, %115 : vector<8x1xf32>
    %117 = vector.broadcast %116 : vector<8x1xf32> to vector<8x128xf32>
    %118 = arith.subf %110, %117 : vector<8x128xf32>
    %119 = arith.mulf %118, %118 : vector<8x128xf32>
    %cst_37 = arith.constant dense<0.000000e+00> : vector<8xf32>
    %120 = vector.multi_reduction <add>, %119, %cst_37 [1] : vector<8x128xf32> to vector<8xf32>
    %121 = vector.shape_cast %120 : vector<8xf32> to vector<8x1xf32>
    %cst_38 = arith.constant 1.280000e+02 : f32
    %122 = vector.broadcast %cst_38 : f32 to vector<8x1xf32>
    %123 = arith.divf %121, %122 : vector<8x1xf32>
    %cst_39 = arith.constant 9.99999974E-6 : f32
    %124 = vector.broadcast %cst_39 : f32 to vector<8x1xf32>
    %125 = arith.addf %123, %124 : vector<8x1xf32>
    %126 = math.rsqrt %125 : vector<8x1xf32>
    %127 = vector.broadcast %126 : vector<8x1xf32> to vector<8x128xf32>
    %128 = arith.mulf %118, %127 : vector<8x128xf32>
    %129 = vector.broadcast %111 : vector<1x128xf32> to vector<8x128xf32>
    %130 = arith.mulf %128, %129 : vector<8x128xf32>
    %131 = vector.broadcast %112 : vector<1x128xf32> to vector<8x128xf32>
    %132 = arith.addf %130, %131 : vector<8x128xf32>
    %133 = arith.truncf %132 : vector<8x128xf32> to vector<8x128xbf16>
    %c0_40 = arith.constant 0 : index
    %c0_41 = arith.constant 0 : index
    %134 = vector.load %arg10[%c0_40, %c0_41] : memref<128x128xbf16, #tpu.memory_space<vmem>>, vector<128x128xbf16>
    %cst_42 = arith.constant dense<0.000000e+00> : vector<8x128xf32>
    %135 = tpu.matmul %133, %134, %cst_42 {dimension_numbers = #tpu.dot_dimension_numbers<[1], [0], [0], [1], [0, 0, 1, 1], [], []>} : vector<8x128xbf16>, vector<128x128xbf16>, vector<8x128xf32> -> vector<8x128xf32>
    %c0_43 = arith.constant 0 : index
    %c0_44 = arith.constant 0 : index
    %136 = vector.load %arg11[%c0_43, %c0_44] : memref<1x128xf32, #tpu.memory_space<vmem>>, vector<1x128xf32>
    %137 = vector.broadcast %136 : vector<1x128xf32> to vector<8x128xf32>
    %138 = arith.addf %135, %137 : vector<8x128xf32>
    %c0_45 = arith.constant 0 : index
    %c0_46 = arith.constant 0 : index
    %139 = vector.load %arg12[%c0_45, %c0_46] : memref<128x256xbf16, #tpu.memory_space<vmem>>, vector<128x256xbf16>
    %cst_47 = arith.constant dense<0.000000e+00> : vector<16x256xf32>
    %140 = tpu.matmul %3, %139, %cst_47 {dimension_numbers = #tpu.dot_dimension_numbers<[1], [0], [0], [1], [0, 0, 1, 1], [], []>} : vector<16x128xbf16>, vector<128x256xbf16>, vector<16x256xf32> -> vector<16x256xf32>
    %c0_48 = arith.constant 0 : index
    %c0_49 = arith.constant 0 : index
    %141 = vector.load %arg13[%c0_48, %c0_49] : memref<1x256xf32, #tpu.memory_space<vmem>>, vector<1x256xf32>
    %142 = vector.broadcast %141 : vector<1x256xf32> to vector<16x256xf32>
    %143 = arith.addf %140, %142 : vector<16x256xf32>
    %144 = vector.extract_strided_slice %143 {offsets = [0, 0], sizes = [16, 128], strides = [1, 1]} : vector<16x256xf32> to vector<16x128xf32>
    %145 = vector.extract_strided_slice %143 {offsets = [0, 128], sizes = [16, 128], strides = [1, 1]} : vector<16x256xf32> to vector<16x128xf32>
    %146 = vector.extract_strided_slice %138 {offsets = [0, 0], sizes = [8, 32], strides = [1, 1]} : vector<8x128xf32> to vector<8x32xf32>
    %147 = arith.truncf %146 : vector<8x32xf32> to vector<8x32xbf16>
    %148 = vector.extract_strided_slice %144 {offsets = [0, 0], sizes = [16, 32], strides = [1, 1]} : vector<16x128xf32> to vector<16x32xf32>
    %149 = arith.truncf %148 : vector<16x32xf32> to vector<16x32xbf16>
    %cst_50 = arith.constant dense<0.000000e+00> : vector<8x16xf32>
    %150 = tpu.matmul %147, %149, %cst_50 {dimension_numbers = #tpu.dot_dimension_numbers<[1], [1], [0], [0], [0, 0, 1, 0], [], []>} : vector<8x32xbf16>, vector<16x32xbf16>, vector<8x16xf32> -> vector<8x16xf32>
    %151 = vector.extract_strided_slice %138 {offsets = [0, 32], sizes = [8, 32], strides = [1, 1]} : vector<8x128xf32> to vector<8x32xf32>
    %152 = arith.truncf %151 : vector<8x32xf32> to vector<8x32xbf16>
    %153 = vector.extract_strided_slice %144 {offsets = [0, 32], sizes = [16, 32], strides = [1, 1]} : vector<16x128xf32> to vector<16x32xf32>
    %154 = arith.truncf %153 : vector<16x32xf32> to vector<16x32xbf16>
    %cst_51 = arith.constant dense<0.000000e+00> : vector<8x16xf32>
    %155 = tpu.matmul %152, %154, %cst_51 {dimension_numbers = #tpu.dot_dimension_numbers<[1], [1], [0], [0], [0, 0, 1, 0], [], []>} : vector<8x32xbf16>, vector<16x32xbf16>, vector<8x16xf32> -> vector<8x16xf32>
    %156 = vector.extract_strided_slice %138 {offsets = [0, 64], sizes = [8, 32], strides = [1, 1]} : vector<8x128xf32> to vector<8x32xf32>
    %157 = arith.truncf %156 : vector<8x32xf32> to vector<8x32xbf16>
    %158 = vector.extract_strided_slice %144 {offsets = [0, 64], sizes = [16, 32], strides = [1, 1]} : vector<16x128xf32> to vector<16x32xf32>
    %159 = arith.truncf %158 : vector<16x32xf32> to vector<16x32xbf16>
    %cst_52 = arith.constant dense<0.000000e+00> : vector<8x16xf32>
    %160 = tpu.matmul %157, %159, %cst_52 {dimension_numbers = #tpu.dot_dimension_numbers<[1], [1], [0], [0], [0, 0, 1, 0], [], []>} : vector<8x32xbf16>, vector<16x32xbf16>, vector<8x16xf32> -> vector<8x16xf32>
    %161 = vector.extract_strided_slice %138 {offsets = [0, 96], sizes = [8, 32], strides = [1, 1]} : vector<8x128xf32> to vector<8x32xf32>
    %162 = arith.truncf %161 : vector<8x32xf32> to vector<8x32xbf16>
    %163 = vector.extract_strided_slice %144 {offsets = [0, 96], sizes = [16, 32], strides = [1, 1]} : vector<16x128xf32> to vector<16x32xf32>
    %164 = arith.truncf %163 : vector<16x32xf32> to vector<16x32xbf16>
    %cst_53 = arith.constant dense<0.000000e+00> : vector<8x16xf32>
    %165 = tpu.matmul %162, %164, %cst_53 {dimension_numbers = #tpu.dot_dimension_numbers<[1], [1], [0], [0], [0, 0, 1, 0], [], []>} : vector<8x32xbf16>, vector<16x32xbf16>, vector<8x16xf32> -> vector<8x16xf32>
    %166 = tpu.concatenate %150, %155, %160, %165 in 0 : vector<8x16xf32>, vector<8x16xf32>, vector<8x16xf32>, vector<8x16xf32> -> vector<32x16xf32>
    %cst_54 = arith.constant dense<0xFF800000> : vector<32xf32>
    %167 = vector.multi_reduction <maximumf>, %166, %cst_54 [1] : vector<32x16xf32> to vector<32xf32>
    %168 = vector.shape_cast %167 : vector<32xf32> to vector<32x1xf32>
    %169 = vector.broadcast %168 : vector<32x1xf32> to vector<32x16xf32>
    %170 = arith.subf %166, %169 : vector<32x16xf32>
    %171 = math.exp %170 : vector<32x16xf32>
    %cst_55 = arith.constant dense<0.000000e+00> : vector<32xf32>
    %172 = vector.multi_reduction <add>, %171, %cst_55 [1] : vector<32x16xf32> to vector<32xf32>
    %173 = vector.shape_cast %172 : vector<32xf32> to vector<32x1xf32>
    %174 = tpu.reciprocal %173 {approx = true} : vector<32x1xf32> -> vector<32x1xf32>
    %175 = vector.broadcast %174 : vector<32x1xf32> to vector<32x16xf32>
    %176 = arith.mulf %171, %175 : vector<32x16xf32>
    %177 = vector.extract_strided_slice %176 {offsets = [0, 0], sizes = [8, 16], strides = [1, 1]} : vector<32x16xf32> to vector<8x16xf32>
    %178 = arith.truncf %177 : vector<8x16xf32> to vector<8x16xbf16>
    %179 = vector.extract_strided_slice %145 {offsets = [0, 0], sizes = [16, 32], strides = [1, 1]} : vector<16x128xf32> to vector<16x32xf32>
    %180 = arith.truncf %179 : vector<16x32xf32> to vector<16x32xbf16>
    %cst_56 = arith.constant dense<0.000000e+00> : vector<8x32xf32>
    %181 = tpu.matmul %178, %180, %cst_56 {dimension_numbers = #tpu.dot_dimension_numbers<[1], [0], [0], [1], [0, 0, 1, 1], [], []>} : vector<8x16xbf16>, vector<16x32xbf16>, vector<8x32xf32> -> vector<8x32xf32>
    %182 = vector.extract_strided_slice %176 {offsets = [8, 0], sizes = [8, 16], strides = [1, 1]} : vector<32x16xf32> to vector<8x16xf32>
    %183 = arith.truncf %182 : vector<8x16xf32> to vector<8x16xbf16>
    %184 = vector.extract_strided_slice %145 {offsets = [0, 32], sizes = [16, 32], strides = [1, 1]} : vector<16x128xf32> to vector<16x32xf32>
    %185 = arith.truncf %184 : vector<16x32xf32> to vector<16x32xbf16>
    %cst_57 = arith.constant dense<0.000000e+00> : vector<8x32xf32>
    %186 = tpu.matmul %183, %185, %cst_57 {dimension_numbers = #tpu.dot_dimension_numbers<[1], [0], [0], [1], [0, 0, 1, 1], [], []>} : vector<8x16xbf16>, vector<16x32xbf16>, vector<8x32xf32> -> vector<8x32xf32>
    %187 = vector.extract_strided_slice %176 {offsets = [16, 0], sizes = [8, 16], strides = [1, 1]} : vector<32x16xf32> to vector<8x16xf32>
    %188 = arith.truncf %187 : vector<8x16xf32> to vector<8x16xbf16>
    %189 = vector.extract_strided_slice %145 {offsets = [0, 64], sizes = [16, 32], strides = [1, 1]} : vector<16x128xf32> to vector<16x32xf32>
    %190 = arith.truncf %189 : vector<16x32xf32> to vector<16x32xbf16>
    %cst_58 = arith.constant dense<0.000000e+00> : vector<8x32xf32>
    %191 = tpu.matmul %188, %190, %cst_58 {dimension_numbers = #tpu.dot_dimension_numbers<[1], [0], [0], [1], [0, 0, 1, 1], [], []>} : vector<8x16xbf16>, vector<16x32xbf16>, vector<8x32xf32> -> vector<8x32xf32>
    %192 = vector.extract_strided_slice %176 {offsets = [24, 0], sizes = [8, 16], strides = [1, 1]} : vector<32x16xf32> to vector<8x16xf32>
    %193 = arith.truncf %192 : vector<8x16xf32> to vector<8x16xbf16>
    %194 = vector.extract_strided_slice %145 {offsets = [0, 96], sizes = [16, 32], strides = [1, 1]} : vector<16x128xf32> to vector<16x32xf32>
    %195 = arith.truncf %194 : vector<16x32xf32> to vector<16x32xbf16>
    %cst_59 = arith.constant dense<0.000000e+00> : vector<8x32xf32>
    %196 = tpu.matmul %193, %195, %cst_59 {dimension_numbers = #tpu.dot_dimension_numbers<[1], [0], [0], [1], [0, 0, 1, 1], [], []>} : vector<8x16xbf16>, vector<16x32xbf16>, vector<8x32xf32> -> vector<8x32xf32>
    %197 = tpu.concatenate %181, %186, %191, %196 in 1 : vector<8x32xf32>, vector<8x32xf32>, vector<8x32xf32>, vector<8x32xf32> -> vector<8x128xf32>
    %198 = arith.truncf %197 : vector<8x128xf32> to vector<8x128xbf16>
    %c0_60 = arith.constant 0 : index
    %c0_61 = arith.constant 0 : index
    %199 = vector.load %arg14[%c0_60, %c0_61] : memref<128x128xbf16, #tpu.memory_space<vmem>>, vector<128x128xbf16>
    %cst_62 = arith.constant dense<0.000000e+00> : vector<8x128xf32>
    %200 = tpu.matmul %198, %199, %cst_62 {dimension_numbers = #tpu.dot_dimension_numbers<[1], [0], [0], [1], [0, 0, 1, 1], [], []>} : vector<8x128xbf16>, vector<128x128xbf16>, vector<8x128xf32> -> vector<8x128xf32>
    %c0_63 = arith.constant 0 : index
    %c0_64 = arith.constant 0 : index
    %201 = vector.load %arg15[%c0_63, %c0_64] : memref<1x128xf32, #tpu.memory_space<vmem>>, vector<1x128xf32>
    %202 = vector.broadcast %201 : vector<1x128xf32> to vector<8x128xf32>
    %203 = arith.addf %200, %202 : vector<8x128xf32>
    %204 = arith.addf %110, %203 : vector<8x128xf32>
    %205 = vector.extract_strided_slice %4 {offsets = [2, 0], sizes = [1, 128], strides = [1, 1]} : vector<3x128xf32> to vector<1x128xf32>
    %206 = vector.extract_strided_slice %5 {offsets = [2, 0], sizes = [1, 128], strides = [1, 1]} : vector<3x128xf32> to vector<1x128xf32>
    %cst_65 = arith.constant dense<0.000000e+00> : vector<8xf32>
    %207 = vector.multi_reduction <add>, %204, %cst_65 [1] : vector<8x128xf32> to vector<8xf32>
    %208 = vector.shape_cast %207 : vector<8xf32> to vector<8x1xf32>
    %cst_66 = arith.constant 1.280000e+02 : f32
    %209 = vector.broadcast %cst_66 : f32 to vector<8x1xf32>
    %210 = arith.divf %208, %209 : vector<8x1xf32>
    %211 = vector.broadcast %210 : vector<8x1xf32> to vector<8x128xf32>
    %212 = arith.subf %204, %211 : vector<8x128xf32>
    %213 = arith.mulf %212, %212 : vector<8x128xf32>
    %cst_67 = arith.constant dense<0.000000e+00> : vector<8xf32>
    %214 = vector.multi_reduction <add>, %213, %cst_67 [1] : vector<8x128xf32> to vector<8xf32>
    %215 = vector.shape_cast %214 : vector<8xf32> to vector<8x1xf32>
    %cst_68 = arith.constant 1.280000e+02 : f32
    %216 = vector.broadcast %cst_68 : f32 to vector<8x1xf32>
    %217 = arith.divf %215, %216 : vector<8x1xf32>
    %cst_69 = arith.constant 9.99999974E-6 : f32
    %218 = vector.broadcast %cst_69 : f32 to vector<8x1xf32>
    %219 = arith.addf %217, %218 : vector<8x1xf32>
    %220 = math.rsqrt %219 : vector<8x1xf32>
    %221 = vector.broadcast %220 : vector<8x1xf32> to vector<8x128xf32>
    %222 = arith.mulf %212, %221 : vector<8x128xf32>
    %223 = vector.broadcast %205 : vector<1x128xf32> to vector<8x128xf32>
    %224 = arith.mulf %222, %223 : vector<8x128xf32>
    %225 = vector.broadcast %206 : vector<1x128xf32> to vector<8x128xf32>
    %226 = arith.addf %224, %225 : vector<8x128xf32>
    %227 = arith.truncf %226 : vector<8x128xf32> to vector<8x128xbf16>
    %c0_70 = arith.constant 0 : index
    %c0_71 = arith.constant 0 : index
    %228 = vector.load %arg16[%c0_70, %c0_71] : memref<128x512xbf16, #tpu.memory_space<vmem>>, vector<128x512xbf16>
    %cst_72 = arith.constant dense<0.000000e+00> : vector<8x512xf32>
    %229 = tpu.matmul %227, %228, %cst_72 {dimension_numbers = #tpu.dot_dimension_numbers<[1], [0], [0], [1], [0, 0, 1, 1], [], []>} : vector<8x128xbf16>, vector<128x512xbf16>, vector<8x512xf32> -> vector<8x512xf32>
    %c0_73 = arith.constant 0 : index
    %c0_74 = arith.constant 0 : index
    %230 = vector.load %arg17[%c0_73, %c0_74] : memref<1x512xf32, #tpu.memory_space<vmem>>, vector<1x512xf32>
    %231 = vector.broadcast %230 : vector<1x512xf32> to vector<8x512xf32>
    %232 = arith.addf %229, %231 : vector<8x512xf32>
    %cst_75 = arith.constant 5.000000e-01 : f32
    %233 = vector.broadcast %cst_75 : f32 to vector<8x512xf32>
    %234 = arith.mulf %233, %232 : vector<8x512xf32>
    %235 = arith.mulf %232, %232 : vector<8x512xf32>
    %236 = arith.mulf %235, %232 : vector<8x512xf32>
    %cst_76 = arith.constant 4.471500e-02 : f32
    %237 = vector.broadcast %cst_76 : f32 to vector<8x512xf32>
    %238 = arith.mulf %237, %236 : vector<8x512xf32>
    %239 = arith.addf %232, %238 : vector<8x512xf32>
    %cst_77 = arith.constant 0.797884583 : f32
    %240 = vector.broadcast %cst_77 : f32 to vector<8x512xf32>
    %241 = arith.mulf %240, %239 : vector<8x512xf32>
    %242 = math.tanh %241 : vector<8x512xf32>
    %cst_78 = arith.constant 1.000000e+00 : f32
    %243 = vector.broadcast %cst_78 : f32 to vector<8x512xf32>
    %244 = arith.addf %243, %242 : vector<8x512xf32>
    %245 = arith.mulf %234, %244 : vector<8x512xf32>
    %246 = arith.truncf %245 : vector<8x512xf32> to vector<8x512xbf16>
    %c0_79 = arith.constant 0 : index
    %c0_80 = arith.constant 0 : index
    %247 = vector.load %arg18[%c0_79, %c0_80] : memref<512x128xbf16, #tpu.memory_space<vmem>>, vector<512x128xbf16>
    %cst_81 = arith.constant dense<0.000000e+00> : vector<8x128xf32>
    %248 = tpu.matmul %246, %247, %cst_81 {dimension_numbers = #tpu.dot_dimension_numbers<[1], [0], [0], [1], [0, 0, 1, 1], [], []>} : vector<8x512xbf16>, vector<512x128xbf16>, vector<8x128xf32> -> vector<8x128xf32>
    %c0_82 = arith.constant 0 : index
    %c0_83 = arith.constant 0 : index
    %249 = vector.load %arg19[%c0_82, %c0_83] : memref<1x128xf32, #tpu.memory_space<vmem>>, vector<1x128xf32>
    %250 = vector.broadcast %249 : vector<1x128xf32> to vector<8x128xf32>
    %251 = arith.addf %248, %250 : vector<8x128xf32>
    %252 = arith.addf %204, %251 : vector<8x128xf32>
    %c0_84 = arith.constant 0 : index
    %c0_85 = arith.constant 0 : index
    %c0_86 = arith.constant 0 : index
    %253 = vector.load %arg20[%c0_84, %c0_85, %c0_86] : memref<1x8x128xf32, #tpu.memory_space<vmem>>, vector<1x8x128xf32>
    %254 = vector.shape_cast %253 : vector<1x8x128xf32> to vector<8x128xf32>
    %255 = vector.shape_cast %252 : vector<8x128xf32> to vector<1x8x128xf32>
    tpu.vector_store %arg20[%c0_84, %c0_85, %c0_86], %255 {strides = array<i32>} : memref<1x8x128xf32, #tpu.memory_space<vmem>>, vector<1x8x128xf32>,
    return
  }
  func.func @transform_0(%arg0: i32, %arg1: memref<2xi32, #tpu.memory_space<smem>>) -> (i32, i32, i32) {
    %c0_i32 = arith.constant 0 : i32
    %c0_i32_0 = arith.constant 0 : i32
    %c0_i32_1 = arith.constant 0 : i32
    return %arg0, %c0_i32, %c0_i32_0 : i32, i32, i32
  }
  func.func @transform_1(%arg0: i32, %arg1: memref<2xi32, #tpu.memory_space<smem>>) -> (i32, i32, i32) {
    %c0_i32 = arith.constant 0 : i32
    %c0_i32_0 = arith.constant 0 : i32
    %c0_i32_1 = arith.constant 0 : i32
    return %arg0, %c0_i32, %c0_i32_0 : i32, i32, i32
  }
  func.func @transform_2(%arg0: i32, %arg1: memref<2xi32, #tpu.memory_space<smem>>) -> (i32, i32) {
    %c0_i32 = arith.constant 0 : i32
    %c0_i32_0 = arith.constant 0 : i32
    %c0_i32_1 = arith.constant 0 : i32
    return %c0_i32, %c0_i32_0 : i32, i32
  }
  func.func @transform_3(%arg0: i32, %arg1: memref<2xi32, #tpu.memory_space<smem>>) -> (i32, i32) {
    %c0_i32 = arith.constant 0 : i32
    %c0_i32_0 = arith.constant 0 : i32
    %c0_i32_1 = arith.constant 0 : i32
    return %c0_i32, %c0_i32_0 : i32, i32
  }
  func.func @transform_4(%arg0: i32, %arg1: memref<2xi32, #tpu.memory_space<smem>>) -> (i32, i32) {
    %c0_i32 = arith.constant 0 : i32
    %c0_i32_0 = arith.constant 0 : i32
    %c0_i32_1 = arith.constant 0 : i32
    return %c0_i32, %c0_i32_0 : i32, i32
  }
  func.func @transform_5(%arg0: i32, %arg1: memref<2xi32, #tpu.memory_space<smem>>) -> (i32, i32) {
    %c0_i32 = arith.constant 0 : i32
    %c0_i32_0 = arith.constant 0 : i32
    %c0_i32_1 = arith.constant 0 : i32
    return %c0_i32, %c0_i32_0 : i32, i32
  }
  func.func @transform_6(%arg0: i32, %arg1: memref<2xi32, #tpu.memory_space<smem>>) -> (i32, i32) {
    %c0_i32 = arith.constant 0 : i32
    %c0_i32_0 = arith.constant 0 : i32
    %c0_i32_1 = arith.constant 0 : i32
    return %c0_i32, %c0_i32_0 : i32, i32
  }
  func.func @transform_7(%arg0: i32, %arg1: memref<2xi32, #tpu.memory_space<smem>>) -> (i32, i32) {
    %c0_i32 = arith.constant 0 : i32
    %c0_i32_0 = arith.constant 0 : i32
    %c0_i32_1 = arith.constant 0 : i32
    return %c0_i32, %c0_i32_0 : i32, i32
  }
  func.func @transform_8(%arg0: i32, %arg1: memref<2xi32, #tpu.memory_space<smem>>) -> (i32, i32) {
    %c0_i32 = arith.constant 0 : i32
    %c0_i32_0 = arith.constant 0 : i32
    %c0_i32_1 = arith.constant 0 : i32
    return %c0_i32, %c0_i32_0 : i32, i32
  }
  func.func @transform_9(%arg0: i32, %arg1: memref<2xi32, #tpu.memory_space<smem>>) -> (i32, i32) {
    %c0_i32 = arith.constant 0 : i32
    %c0_i32_0 = arith.constant 0 : i32
    %c0_i32_1 = arith.constant 0 : i32
    return %c0_i32, %c0_i32_0 : i32, i32
  }
  func.func @transform_10(%arg0: i32, %arg1: memref<2xi32, #tpu.memory_space<smem>>) -> (i32, i32) {
    %c0_i32 = arith.constant 0 : i32
    %c0_i32_0 = arith.constant 0 : i32
    %c0_i32_1 = arith.constant 0 : i32
    return %c0_i32, %c0_i32_0 : i32, i32
  }
  func.func @transform_11(%arg0: i32, %arg1: memref<2xi32, #tpu.memory_space<smem>>) -> (i32, i32) {
    %c0_i32 = arith.constant 0 : i32
    %c0_i32_0 = arith.constant 0 : i32
    %c0_i32_1 = arith.constant 0 : i32
    return %c0_i32, %c0_i32_0 : i32, i32
  }
  func.func @transform_12(%arg0: i32, %arg1: memref<2xi32, #tpu.memory_space<smem>>) -> (i32, i32) {
    %c0_i32 = arith.constant 0 : i32
    %c0_i32_0 = arith.constant 0 : i32
    %c0_i32_1 = arith.constant 0 : i32
    return %c0_i32, %c0_i32_0 : i32, i32
  }
  func.func @transform_13(%arg0: i32, %arg1: memref<2xi32, #tpu.memory_space<smem>>) -> (i32, i32) {
    %c0_i32 = arith.constant 0 : i32
    %c0_i32_0 = arith.constant 0 : i32
    %c0_i32_1 = arith.constant 0 : i32
    return %c0_i32, %c0_i32_0 : i32, i32
  }
  func.func @transform_14(%arg0: i32, %arg1: memref<2xi32, #tpu.memory_space<smem>>) -> (i32, i32) {
    %c0_i32 = arith.constant 0 : i32
    %c0_i32_0 = arith.constant 0 : i32
    %c0_i32_1 = arith.constant 0 : i32
    return %c0_i32, %c0_i32_0 : i32, i32
  }
  func.func @transform_15(%arg0: i32, %arg1: memref<2xi32, #tpu.memory_space<smem>>) -> (i32, i32) {
    %c0_i32 = arith.constant 0 : i32
    %c0_i32_0 = arith.constant 0 : i32
    %c0_i32_1 = arith.constant 0 : i32
    return %c0_i32, %c0_i32_0 : i32, i32
  }
  func.func @transform_16(%arg0: i32, %arg1: memref<2xi32, #tpu.memory_space<smem>>) -> (i32, i32) {
    %c0_i32 = arith.constant 0 : i32
    %c0_i32_0 = arith.constant 0 : i32
    %c0_i32_1 = arith.constant 0 : i32
    return %c0_i32, %c0_i32_0 : i32, i32
  }
  func.func @transform_17(%arg0: i32, %arg1: memref<2xi32, #tpu.memory_space<smem>>) -> (i32, i32) {
    %c0_i32 = arith.constant 0 : i32
    %c0_i32_0 = arith.constant 0 : i32
    %c0_i32_1 = arith.constant 0 : i32
    return %c0_i32, %c0_i32_0 : i32, i32
  }
  func.func @transform_18(%arg0: i32, %arg1: memref<2xi32, #tpu.memory_space<smem>>) -> (i32, i32, i32) {
    %c0_i32 = arith.constant 0 : i32
    %c0_i32_0 = arith.constant 0 : i32
    %c0_i32_1 = arith.constant 0 : i32
    return %arg0, %c0_i32, %c0_i32_0 : i32, i32, i32
  }
}

</mosaic_0001>

<bundles_post_ra>
// kernel: _forward_core.4
= control target key start
LH: loop header
LB: loop body
LE: loop exit
PB: predicated region body
PF: predicated region fallthrough
CT: control target
= control target key end

     0   :  { %vm33_vm0 = vcmask 1041408   ;;  %vm26_vm1 = vcmask 31744   ;;  %s118_s1 = inlined_call_operand.vmem [shape: bf16[4,128], index: 1, kind: input, shape index: {}]   ;;  %s119_s0 = inlined_call_operand.vmem [shape: f32[32,4], index: 0, kind: input, shape index: {}]   ;;  %s120_s2 = inlined_call_operand.vmem [shape: f32[1,128], index: 2, kind: input, shape index: {}]   ;;  %s121_s3 = inlined_call_operand.vmem [shape: f32[32,128], index: 3, kind: output, shape index: {}]  }
   0x1   :  { %v21_v0 = vld [vmem:[%s118_s1] sm:$0x3]  ;;  %v16_v2 = vld [vmem:[%s119_s0 + $0x8] sm:$0xff]  ;;  %v17_v5 = vld [vmem:[%s119_s0 + $0x10] sm:$0xff] }
   0x2   :  { %v15_v1 = vld [vmem:[%s119_s0] sm:$0xff]  ;;  %v35_v3 = vsel %vm33_vm0, %v21_v0, 0  ;;  %v18_v6 = vld [vmem:[%s119_s0 + $0x18] sm:$0xff] }
   0x3   :  { %v19_v4 = vpack.c.bf16 %v16_v2, %v15_v1  ;;  %44 = vmatpush.bf16.msra.mxu0 %v35_v3  ;;  %66 = vmatpush.bf16.msra.mxu1 %v35_v3  ;;  %v20_v7 = vpack.c.bf16 %v18_v6, %v17_v5  ;;  %v67_v8 = vld [vmem:[%s120_s2] ss:$0 sm:$0xff] }
   0x6   :  { %64 = vmatmul.msk.bf16.vlgmr.msra.gmra.mxu0 %vm26_vm1, %v19_v4  ;;  %65 = vmatmul.msk.bf16.vlgmr.msra.gmra.mxu1 %vm26_vm1, %v20_v7 }
  0x83   :  { %v46_v9 = vpop.f32.mrf.mxu0  ;;  %v51_v10 = vpop.f32.mrf.mxu1 }
  0x84   :  { %v47_v11 = vadd.f32 %v67_v8, %v46_v9  ;;  %v52_v12 = vadd.f32 %v67_v8, %v51_v10 }
  0x86   :  { %56 = vst [vmem:[%s121_s3] sm:$0xff] %v47_v11 }
  0x87   :  { %58 = vst [vmem:[%s121_s3 + $0x10] sm:$0xff] %v52_v12 }
  0x8b   :  { %v48_v13 = vpop.f32.mrf.mxu0  ;;  %v53_v14 = vpop.f32.mrf.mxu1 }
  0x8c   :  { %v49_v15 = vadd.f32 %v67_v8, %v48_v13  ;;  %v54_v16 = vadd.f32 %v67_v8, %v53_v14 }
  0x8e   :  { %57 = vst [vmem:[%s121_s3 + $0x8] sm:$0xff] %v49_v15 }
  0x8f   :  { %59 = vst [vmem:[%s121_s3 + $0x18] sm:$0xff] %v54_v16 }

// kernel: _forward_core.7
= control target key start
LH: loop header
LB: loop body
LE: loop exit
PB: predicated region body
PF: predicated region fallthrough
CT: control target
= control target key end

     0   :  { %10 = vsyncpa [#allocation3], 0  ;;  %s368_s0 = inlined_call_operand.vmem [shape: f32[16,128], index: 0, kind: input, shape index: {}]   ;;  %s369_s1 = inlined_call_operand.vmem [shape: f32[1,128], index: 1, kind: input, shape index: {}]   ;;  %s370_s2 = inlined_call_operand.vmem [shape: f32[1,128], index: 2, kind: input, shape index: {}]   ;;  %s371_s3 = inlined_call_operand.hbm [shape: bf16[128,128], index: 3, kind: input, shape index: {}]   ;;  %s372_s4 = inlined_call_operand.vmem [shape: f32[1,128], index: 4, kind: input, shape index: {}]   ;;  %s373_s5 = inlined_call_operand.hbm [shape: f32[16,128], index: 5, kind: output, shape index: {}]  }
   0x1   :  { %11 = vsyncpa [#allocation4], 0  ;;  %s22_s20 = sshll.u32 %s371_s3, 4  ;;  %s310_s21 = smov [#allocation2]   ;;  %s23_s20 = int_to_ptr.hbm [resolvable:$true] %s22_s20 }
   0x2   :  { %s24_s22 = sshll.u32 %s310_s21, 4  ;;  %s311_s23 = smov 64   ;;  %s25_s22 = int_to_ptr.vmem [resolvable:$true] %s24_s22 }
   0x3   :  { %s312_s24 = smov 4  }
   0x4   :  { %30 = dma.hbm_to_vmem [thread:$0]  %s23_s20, 1024, %s25_s22, [#allocation3], %s311_s23, %s311_s23, %s312_s24  }
   0x5   :  { %306 = dma.done.wait [#allocation3], 1024  }
   0x6   :  { %307 = vsyncadd [#allocation3], 4294966272  ;;  %v37_v0 = vld [vmem:[%s368_s0] sm:$0xff]  ;;  %v38_v1 = vld [vmem:[%s368_s0 + $0x8] sm:$0xff]  ;;  %v313_v2 = vmov 128.0   ;;  %s189_s11 = sshll.u32 %s373_s5, 4  ;;  %s190_s11 = int_to_ptr.hbm [resolvable:$true] %s189_s11 }
   0x7   :  { %39 = vadd.xlane.f32.xlu0 %v37_v0  ;;  %252 = vrcp.f32 %v313_v2  ;;  %v241_v17 = vld [vmem:[#allocation2 + $0x38] sm:$0xff]  ;;  %v240_v18 = vld [vmem:[#allocation2 + $0x30] sm:$0xff]  ;;  %v239_v19 = vld [vmem:[#allocation2 + $0x28] sm:$0xff]  ;;  %s316_s12 = smov 8  }
   0x8   :  { %167 = vmatpush.bf16.msra.mxu0 %v241_v17  ;;  %v238_v20 = vld [vmem:[#allocation2 + $0x20] sm:$0xff]  ;;  %v237_v21 = vld [vmem:[#allocation2 + $0x18] sm:$0xff]  ;;  %v236_v22 = vld [vmem:[#allocation2 + $0x10] sm:$0xff] }
   0x9   :  { %v235_v23 = vld [vmem:[#allocation2 + $0x8] sm:$0xff]  ;;  %v234_v25 = vld [vmem:[#allocation2] sm:$0xff] }
   0xa   :  { %v249_v44 = vld [vmem:[%s369_s1] ss:$0 sm:$0xff]  ;;  %s314_s1 = smov [#allocation5]  }
   0xb   :  { %v250_v49 = vld [vmem:[%s370_s2] ss:$0 sm:$0xff]  ;;  %s187_s8 = sshll.u32 %s314_s1, 4  ;;  %s315_s2 = smov 128   ;;  %s188_s8 = int_to_ptr.vmem [resolvable:$true] %s187_s8 }
   0xc   :  { %168 = vmatpush.bf16.msra.mxu0 %v240_v18  ;;  %v251_v54 = vld [vmem:[%s372_s4] ss:$0 sm:$0xff] }
   0xd   :  { %v253_v3 = vpop.eup %252 }
   0xe   :  { %v44_v4 = vmul.f32 128.0, %v253_v3  ;;  %vm48_vm0 = vweird.f32 %v253_v3 }
   0xf   :  { %41 = vadd.xlane.f32.xlu0 %v38_v1 }
  0x10   :  { %v45_v5 = vsub.f32 1.0, %v44_v4  ;;  %169 = vmatpush.bf16.msra.mxu0 %v239_v19 }
  0x12   :  { %v46_v6 = vmul.f32 %v253_v3, %v45_v5 }
  0x14   :  { %v47_v7 = vadd.f32 %v253_v3, %v46_v6  ;;  %170 = vmatpush.bf16.msra.mxu0 %v238_v20 }
  0x16   :  { %v49_v8 = vsel %vm48_vm0, %v253_v3, %v47_v7 }
  0x18   :  { %171 = vmatpush.bf16.msra.mxu0 %v237_v21 }
  0x1c   :  { %172 = vmatpush.bf16.msra.mxu0 %v236_v22 }
  0x20   :  { %173 = vmatpush.bf16.msra.mxu0 %v235_v23 }
  0x24   :  { %174 = vmatpush.bf16.msra.mxu0 %v234_v25 }
  0x7a   :  { %v40_v9 = vpop.xlane.xlu0 %39 }
  0x7b   :  { %v50_v10 = vmul.f32 %v49_v8, %v40_v9 }
  0x7d   :  { %v52_v11 = vsub.f32 %v37_v0, %v50_v10 }
  0x7f   :  { %v54_v12 = vmul.f32 %v52_v11, %v52_v11 }
  0x81   :  { %56 = vadd.xlane.f32.xlu1 %v54_v12 }
  0x82   :  { %v42_v13 = vpop.xlane.xlu0 %41 }
  0x83   :  { %v51_v14 = vmul.f32 %v49_v8, %v42_v13 }
  0x85   :  { %v53_v15 = vsub.f32 %v38_v1, %v51_v14 }
  0x87   :  { %v55_v16 = vmul.f32 %v53_v15, %v53_v15 }
  0x89   :  { %58 = vadd.xlane.f32.xlu1 %v55_v16 }
  0xf4   :  { %v57_v24 = vpop.xlane.xlu1 %56 }
  0xf5   :  { %v60_v26 = vmul.f32 %v57_v24, %v49_v8 }
  0xf7   :  { %v62_v27 = vadd.f32 1e-05, %v60_v26 }
  0xf9   :  { %254 = vrsqrt.f32 %v62_v27  ;;  %vm70_vm2 = vweird.f32 %v62_v27 }
  0xfc   :  { %v59_v28 = vpop.xlane.xlu1 %58 }
  0xfd   :  { %v61_v29 = vmul.f32 %v59_v28, %v49_v8 }
  0xff   :  { %v255_v30 = vpop.eup %254  ;;  %v63_v31 = vadd.f32 1e-05, %v61_v29 }
 0x100   :  { %v65_v32 = vmul.f32 %v255_v30, %v62_v27  ;;  %vm71_vm1 = vweird.f32 %v255_v30 }
 0x101   :  { %256 = vrsqrt.f32 %v63_v31  ;;  %vm72_vm3 = vmor %vm70_vm2, %vm71_vm1  ;;  %vm80_vm5 = vweird.f32 %v63_v31 }
 0x102   :  { %v66_v33 = vmul.f32 %v255_v30, %v65_v32 }
 0x104   :  { %v67_v34 = vmul.f32 0.5, %v66_v33 }
 0x106   :  { %v68_v35 = vsub.f32 1.5, %v67_v34 }
 0x107   :  { %v257_v36 = vpop.eup %256 }
 0x108   :  { %v69_v37 = vmul.f32 %v255_v30, %v68_v35  ;;  %v75_v38 = vmul.f32 %v257_v36, %v63_v31  ;;  %vm81_vm4 = vweird.f32 %v257_v36 }
 0x109   :  { %vm82_vm6 = vmor %vm80_vm5, %vm81_vm4 }
 0x10a   :  { %v76_v39 = vmul.f32 %v257_v36, %v75_v38  ;;  %v73_v41 = vsel %vm72_vm3, %v255_v30, %v69_v37 }
 0x10b   :  { %v84_v43 = vmul.f32 %v73_v41, %v52_v11 }
 0x10c   :  { %v77_v40 = vmul.f32 0.5, %v76_v39 }
 0x10d   :  { %v90_v48 = vmul.f32 %v249_v44, %v84_v43 }
 0x10e   :  { %v78_v42 = vsub.f32 1.5, %v77_v40 }
 0x10f   :  { %v96_v51 = vadd.f32 %v250_v49, %v90_v48 }
 0x110   :  { %v79_v45 = vmul.f32 %v257_v36, %v78_v42 }
 0x112   :  { %v83_v46 = vsel %vm82_vm6, %v257_v36, %v79_v45 }
 0x113   :  { %v85_v47 = vmul.f32 %v83_v46, %v53_v15 }
 0x115   :  { %v91_v50 = vmul.f32 %v249_v44, %v85_v47 }
 0x117   :  { %v97_v52 = vadd.f32 %v250_v49, %v91_v50 }
 0x119   :  { %v98_v53 = vpack.c.bf16 %v97_v52, %v96_v51 }
 0x11b   :  { %175 = vmatmul.bf16.vlgmr.msra.gmra.mxu0 %v98_v53 }
 0x198   :  { %v176_v55 = vpop.f32.mrf.mxu0 }
 0x199   :  { %v177_v56 = vadd.f32 %v251_v54, %v176_v55 }
 0x19b   :  { %181 = vst [vmem:[#allocation5] sm:$0xff] %v177_v56 }
 0x1a0   :  { %v178_v57 = vpop.f32.mrf.mxu0 }
 0x1a1   :  { %v179_v58 = vadd.f32 %v251_v54, %v178_v57 }
 0x1a3   :  { %182 = vst [vmem:[#allocation5 + $0x8] sm:$0xff] %v179_v58 }
 0x1a4   :  { %195 = dma.vmem_to_hbm [thread:$0]  %s188_s8, 256, %s190_s11, [#allocation4], %s315_s2, %s315_s2, %s316_s12  }
 0x1a5   :  { %308 = dma.done.wait [#allocation4], 256  }
 0x1a6   :  { %309 = vsyncadd [#allocation4], 4294967040 }
 0x1a7   :  { %200 = vsyncpa [#allocation3], 1 }
 0x1a8   :  { %201 = vsyncpa [#allocation4], 1 }

// kernel: _forward_core.5
= control target key start
LH: loop header
LB: loop body
LE: loop exit
PB: predicated region body
PF: predicated region fallthrough
CT: control target
= control target key end

     0   :  { %s3417_s21 = smov [#allocation3]   ;;  %s4279_s0 = inlined_call_operand.vmem [shape: s32[2], index: 0, kind: input, shape index: {}]   ;;  %s4280_s1 = inlined_call_operand.vmem [shape: f32[2,8,128], index: 1, kind: input, shape index: {}]   ;;  %s4281_s2 = inlined_call_operand.vmem [shape: bf16[2,16,128], index: 2, kind: input, shape index: {}]   ;;  %s4282_s3 = inlined_call_operand.vmem [shape: f32[3,128], index: 3, kind: input, shape index: {}]   ;;  %s4283_s4 = inlined_call_operand.vmem [shape: f32[3,128], index: 4, kind: input, shape index: {}]   ;;  %s4284_s5 = inlined_call_operand.vmem [shape: bf16[128,384], index: 5, kind: input, shape index: {}]   ;;  %s4285_s6 = inlined_call_operand.vmem [shape: f32[1,384], index: 6, kind: input, shape index: {}]   ;;  %s4286_s7 = inlined_call_operand.hbm [shape: bf16[128,128], index: 7, kind: input, shape index: {}]   ;;  %s4287_s8 = inlined_call_operand.vmem [shape: f32[1,128], index: 8, kind: input, shape index: {}]   ;;  %s4288_s9 = inlined_call_operand.hbm [shape: bf16[128,128], index: 9, kind: input, shape index: {}]   ;;  %s4289_s10 = inlined_call_operand.vmem [shape: f32[1,128], index: 10, kind: input, shape index: {}]   ;;  %s4290_s11 = inlined_call_operand.vmem [shape: bf16[128,256], index: 11, kind: input, shape index: {}]   ;;  %s4291_s12 = inlined_call_operand.vmem [shape: f32[1,256], index: 12, kind: input, shape index: {}]   ;;  %s4292_s13 = inlined_call_operand.hbm [shape: bf16[128,128], index: 13, kind: input, shape index: {}]   ;;  %s4293_s14 = inlined_call_operand.vmem [shape: f32[1,128], index: 14, kind: input, shape index: {}]   ;;  %s4294_s15 = inlined_call_operand.vmem [shape: bf16[128,512], index: 15, kind: input, shape index: {}]   ;;  %s4295_s16 = inlined_call_operand.vmem [shape: f32[1,512], index: 16, kind: input, shape index: {}]   ;;  %s4296_s17 = inlined_call_operand.vmem [shape: bf16[512,128], index: 17, kind: input, shape index: {}]   ;;  %s4297_s18 = inlined_call_operand.vmem [shape: f32[1,128], index: 18, kind: input, shape index: {}]   ;;  %s4298_s19 = inlined_call_operand.vmem [shape: f32[2,8,128], index: 19, kind: output, shape index: {}]  }
   0x1   :  { %4302 = sst [smem:[#allocation12_spill]] %s4279_s0 }
   0x2   :  { %4303 = sst [smem:[#allocation13_spill]] %s4280_s1 }
   0x3   :  { %4304 = sst [smem:[#allocation14_spill]] %s4281_s2 }
   0x4   :  { %4305 = sst [smem:[#allocation15_spill]] %s4282_s3 }
   0x5   :  { %4306 = sst [smem:[#allocation16_spill]] %s4289_s10 }
   0x6   :  { %s4307_s20 = sld [smem:[#allocation12_spill]] }
   0xc   :  { %s25_s10 = sshll.u32 %s4307_s20, 4  ;;  %s26_s10 = int_to_ptr.vmem [resolvable:$true] %s25_s10 }
   0xd   :  { %28 = dma.vmem_to_smem %s26_s10, 16, %s3417_s21, [#allocation2] }
   0xe   :  { %3403 = dma.done.wait [#allocation2], 16 }
   0xf   :  { %3404 = vsyncadd [#allocation2], 4294967280 }
  0x10   :  { %31 = sfence }
  0x11   :  { %32 = vsyncpa [#allocation5], 0 }
  0x12   :  { %33 = vsyncpa [#allocation7], 0  ;;  %s3531_s1 = smov 0  }
  0x13 LB: > { %s3537_s22 = sadd.s32 4294967295, %s3415_s1   ;;  %p2519_p0 = scmp.ge.s32.totalorder %s3415_s1, 1  ;;  %s3415_s1 = sphi %s3531_s1, %s39_s1  }
  0x14   : > { %p458_p1 = scmp.lt.s32.totalorder %s3415_s1, 3  ;;  %p3218_p2 = scmp.eq.s32.totalorder %s3537_s22, 0 }
  0x15   : > { %s498_s23 = sshll.u32 %s4288_s9, 4  ;;  %s481_s26 = sshll.u32 %s4286_s7, 4  ;;  %s499_s23 = int_to_ptr.hbm [resolvable:$true] %s498_s23  ;;  %s482_s26 = int_to_ptr.hbm [resolvable:$true] %s481_s26 }
  0x16   : > { %p3545_p3 = pnand %p2519_p0, %p458_p1  ;;  %s3418_s27 = smov [#allocation6]  }
  0x17   : > { %s500_s28 = sshll.u32 %s3418_s27, 4  ;;  %s3419_s29 = smov [#allocation4]   ;;  %s501_s28 = int_to_ptr.vmem [resolvable:$true] %s500_s28 }
  0x18   : > { %p3208_p4 = pneg %p3545_p3  ;;  %s483_s0 = sshll.u32 %s3419_s29, 4  ;;  %s484_s0 = int_to_ptr.vmem [resolvable:$true] %s483_s0 }
  0x19   : > { %s521_s21 = sshll.u32 %s4292_s13, 4  ;;  %s3420_s10 = smov 64   ;;  %s522_s21 = int_to_ptr.hbm [resolvable:$true] %s521_s21 }
  0x1a   : > { %p3209_p5 = pnand %p3218_p2, %p3208_p4  ;;  %s3421_s2 = smov 4  }
  0x1b   : > { %s3422_s25 = smov [#allocation8]   ;;  %569 = sbr.rel (%p3545_p3) target bundleno = 3238 (0xca6), region = 92 }
  0x1c   : > { %3214 = dma.hbm_to_vmem [thread:$0]  (!%p3209_p5), %s499_s23, 1024, %s501_s28, [#allocation7], %s3420_s10, %s3420_s10, %s3421_s2  }
  0x1d   : > { %3211 = dma.hbm_to_vmem [thread:$0]  (!%p3209_p5), %s482_s26, 1024, %s484_s0, [#allocation5], %s3420_s10, %s3420_s10, %s3421_s2  }
  0x1e   : > { %s523_s3 = sshll.u32 %s3422_s25, 4  ;;  %s524_s3 = int_to_ptr.vmem [resolvable:$true] %s523_s3 }
  0x1f   : > { %3217 = dma.hbm_to_vmem [thread:$0]  (!%p3209_p5), %s522_s21, 1024, %s524_s3, [#allocation7], %s3420_s10, %s3420_s10, %s3421_s2  }
  0x20   : > { %3406 = dma.done.wait (%p3218_p2), [#allocation5], 1024  }
  0x21   : > { %3408 = vsyncadd (%p3218_p2), [#allocation5], 4294966272 }
  0x22   : > { %3410 = dma.done.wait (%p3218_p2), [#allocation7], 2048  }
  0x23   : > { %3412 = vsyncadd (%p3218_p2), [#allocation7], 4294965248  ;;  %p637_p6 = scmp.lt.s32.totalorder %s3537_s22, 1  ;;  %s4309_s28 = sld [smem:[#allocation13_spill]]  ;;  %v3423_v1 = vmov 128.0   ;;  %vm907_vm4 = vcmask 261120  }
  0x24   : > { %3247 = vrcp.f32 %v3423_v1  ;;  %v2618_v2 = vld [vmem:[%s4284_s5 + $0xa8] sm:$0xf]  ;;  %v3090_v3 = vld [vmem:[%s4284_s5 + $0xb0] sm:$0xf0]  ;;  %v3089_v4 = vld [vmem:[%s4284_s5 + $0xac] sm:$0xf] }
  0x25   : > { %s638_s23 = scalar_select %p637_p6, %s3537_s22, 1  ;;  %v2619_v5 = vor.u32 %v3090_v3, %v2618_v2  ;;  %v2620_v6 = vld [vmem:[%s4284_s5 + $0xb4] sm:$0xf0]  ;;  %v2626_v7 = vld [vmem:[%s4284_s5 + $0xb0] sm:$0xf]  ;;  %vm1048_vm5 = vcmask 1043456  }
  0x26   : > { %v3091_v8 = vld [vmem:[%s4284_s5 + $0xb8] sm:$0xf0]  ;;  %v2623_v9 = vor.u32 %v3089_v4, %v2620_v6  ;;  %v2606_v21 = vld [vmem:[%s4284_s5 + $0x90] sm:$0xf]  ;;  %v3086_v23 = vld [vmem:[%s4284_s5 + $0x94] sm:$0xf] }
  0x27   : > { %s3571_s26 = sshll.u32 %s638_s23, 3  ;;  %v2627_v10 = vor.u32 %v3091_v8, %v2626_v7  ;;  %866 = vmatpush.bf16.msra.mxu0 %v2619_v5  ;;  %v3087_v22 = vld [vmem:[%s4284_s5 + $0x98] sm:$0xf0]  ;;  %v2608_v25 = vld [vmem:[%s4284_s5 + $0x9c] sm:$0xf0]  ;;  %s4310_s3 = sld [smem:[#allocation15_spill]] }
  0x28   : > { %879 = vmatpush.bf16.msra.mxu1 %v2623_v9  ;;  %v2607_v24 = vor.u32 %v3087_v22, %v2606_v21  ;;  %v2614_v26 = vld [vmem:[%s4284_s5 + $0x98] sm:$0xf]  ;;  %v3088_v27 = vld [vmem:[%s4284_s5 + $0xa0] sm:$0xf0]  ;;  %v2611_v28 = vor.u32 %v3086_v23, %v2608_v25  ;;  %v3083_v32 = vld [vmem:[%s4284_s5 + $0x7c] sm:$0xf] }
  0x29   : > { %s640_s29 = scalar_lea.vmem %s4309_s28, %s3571_s26  ;;  %892 = vmatpush.bf16.msra.mxu2 %v2627_v10  ;;  %v2615_v29 = vor.u32 %v3088_v27, %v2614_v26  ;;  %v2594_v30 = vld [vmem:[%s4284_s5 + $0x78] sm:$0xf]  ;;  %v3084_v31 = vld [vmem:[%s4284_s5 + $0x80] sm:$0xf0]  ;;  %v2596_v34 = vld [vmem:[%s4284_s5 + $0x84] sm:$0xf0] }
  0x2a   : > { %v3577_v0 = vld [vmem:[%s640_s29] sm:$0xff]  ;;  %v3248_v11 = vpop.eup %3247  ;;  %v2595_v33 = vor.u32 %v3084_v31, %v2594_v30  ;;  %v3085_v36 = vld [vmem:[%s4284_s5 + $0x88] sm:$0xf0]  ;;  %v2599_v37 = vor.u32 %v3083_v32, %v2596_v34  ;;  %v2584_v43 = vld [vmem:[%s4284_s5 + $0x6c] sm:$0xf0]  ;;  %s3424_s29 = smov 32  }
  0x2b   : > { %666 = vadd.xlane.f32.xlu0 %v3577_v0  ;;  %v669_v12 = vmul.f32 128.0, %v3248_v11  ;;  %vm673_vm0 = vweird.f32 %v3248_v11  ;;  %867 = vmatpush.bf16.msra.mxu0 %v2607_v24  ;;  %v2602_v35 = vld [vmem:[%s4284_s5 + $0x80] sm:$0xf]  ;;  %v3081_v40 = vld [vmem:[%s4284_s5 + $0x68] sm:$0xf0]  ;;  %s4300_s0 = smov 64  }
  0x2c   : > { %880 = vmatpush.bf16.msra.mxu1 %v2611_v28  ;;  %v2603_v38 = vor.u32 %v3085_v36, %v2602_v35  ;;  %v2582_v39 = vld [vmem:[%s4284_s5 + $0x60] sm:$0xf]  ;;  %v3080_v41 = vld [vmem:[%s4284_s5 + $0x64] sm:$0xf]  ;;  %v2590_v44 = vld [vmem:[%s4284_s5 + $0x68] sm:$0xf] }
  0x2d   : > { %v670_v13 = vsub.f32 1.0, %v669_v12  ;;  %893 = vmatpush.bf16.msra.mxu2 %v2615_v29  ;;  %v2583_v42 = vor.u32 %v3081_v40, %v2582_v39  ;;  %v3082_v45 = vld [vmem:[%s4284_s5 + $0x70] sm:$0xf0]  ;;  %v2587_v46 = vor.u32 %v3080_v41, %v2584_v43  ;;  %v2570_v48 = vld [vmem:[%s4284_s5 + $0x48] sm:$0xf]  ;;  %s3426_s30 = smov 96  }
  0x2e   : > { %v2591_v47 = vor.u32 %v3082_v45, %v2590_v44  ;;  %v3078_v49 = vld [vmem:[%s4284_s5 + $0x50] sm:$0xf0]  ;;  %v3077_v50 = vld [vmem:[%s4284_s5 + $0x4c] sm:$0xf]  ;;  %v2572_v52 = vld [vmem:[%s4284_s5 + $0x54] sm:$0xf0] }
  0x2f   : > { %v671_v14 = vmul.f32 %v3248_v11, %v670_v13  ;;  %868 = vmatpush.bf16.msra.mxu0 %v2595_v33  ;;  %v2571_v51 = vor.u32 %v3078_v49, %v2570_v48  ;;  %v2578_v53 = vld [vmem:[%s4284_s5 + $0x50] sm:$0xf]  ;;  %v3079_v54 = vld [vmem:[%s4284_s5 + $0x58] sm:$0xf0]  ;;  %v2575_v55 = vor.u32 %v3077_v50, %v2572_v52  ;;  %v3074_v59 = vld [vmem:[%s4284_s5 + $0x34] sm:$0xf] }
  0x30   : > { %881 = vmatpush.bf16.msra.mxu1 %v2599_v37  ;;  %v2579_v56 = vor.u32 %v3079_v54, %v2578_v53  ;;  %v2558_v57 = vld [vmem:[%s4284_s5 + $0x30] sm:$0xf]  ;;  %v3075_v58 = vld [vmem:[%s4284_s5 + $0x38] sm:$0xf0]  ;;  %v2560_v61 = vld [vmem:[%s4284_s5 + $0x3c] sm:$0xf0] }
  0x31   : > { %v672_v15 = vadd.f32 %v3248_v11, %v671_v14  ;;  %894 = vmatpush.bf16.msra.mxu2 %v2603_v38  ;;  %v2559_v60 = vor.u32 %v3075_v58, %v2558_v57  ;;  %v2566_v62 = vld [vmem:[%s4284_s5 + $0x38] sm:$0xf]  ;;  %v3076_v63 = vld [vmem:[%s4284_s5 + $0x40] sm:$0xf0]  ;;  %v2563_v1 = vor.u32 %v3074_v59, %v2560_v61  ;;  %v3071_v5 = vld [vmem:[%s4284_s5 + $0x1c] sm:$0xf] }
  0x32   : > { %v2567_v2 = vor.u32 %v3076_v63, %v2566_v62  ;;  %v2546_v3 = vld [vmem:[%s4284_s5 + $0x18] sm:$0xf]  ;;  %v3072_v4 = vld [vmem:[%s4284_s5 + $0x20] sm:$0xf0]  ;;  %v2548_v7 = vld [vmem:[%s4284_s5 + $0x24] sm:$0xf0] }
  0x33   : > { %v3598_v16 = vsel %vm673_vm0, %v3248_v11, %v672_v15  ;;  %869 = vmatpush.bf16.msra.mxu0 %v2583_v42  ;;  %v2547_v6 = vor.u32 %v3072_v4, %v2546_v3  ;;  %v2554_v8 = vld [vmem:[%s4284_s5 + $0x20] sm:$0xf]  ;;  %v3073_v9 = vld [vmem:[%s4284_s5 + $0x28] sm:$0xf0]  ;;  %v2551_v10 = vor.u32 %v3071_v5, %v2548_v7  ;;  %v3068_v14 = vld [vmem:[%s4284_s5 + $0x4] sm:$0xf] }
  0x34   : > { %882 = vmatpush.bf16.msra.mxu1 %v2587_v46  ;;  %v2555_v11 = vor.u32 %v3073_v9, %v2554_v8  ;;  %v2534_v12 = vld [vmem:[%s4284_s5] sm:$0xf]  ;;  %v3069_v13 = vld [vmem:[%s4284_s5 + $0x8] sm:$0xf0]  ;;  %s656_s20 = sld [smem:[#allocation3 + %s3537_s22]]  ;;  %v3427_v7 = vmov 0.0   ;;  %s649_s22 = scalar_lea.vmem %s4298_s19, %s3571_s26 }
  0x35   : > { %895 = vmatpush.bf16.msra.mxu2 %v2591_v47  ;;  %v2535_v15 = vor.u32 %v3069_v13, %v2534_v12  ;;  %v3736_v31 = vld [vmem:[%s4310_s3] sm:$0x7]  ;;  %vm998_vm9 = vcmask 64512   ;;  %vm1145_vm10 = vcmask 523264   ;;  %vm1147_vm11 = vcmask 785408   ;;  %s4311_s24 = sld [smem:[#allocation14_spill]] }
  0x36   : > { %v3741_v33 = vld [vmem:[%s4283_s4] sm:$0x7]  ;;  %v693_v34 = vperm.slane %v3736_v31, 0  ;;  %s4312_s25 = sld [smem:[#allocation16_spill]]  ;;  %s4313_s23 = smov 64   ;;  %vm1566_vm15 = vcmask 130048  }
  0x37   : > { %870 = vmatpush.bf16.msra.mxu0 %v2571_v51  ;;  %v695_v37 = vperm.slane %v3741_v33, 0  ;;  %v730_v41 = vld [vmem:[%s4285_s6] sm:$0x7] }
  0x38   : > { %883 = vmatpush.bf16.msra.mxu1 %v2575_v55  ;;  %v733_v42 = vperm.slane %v730_v41, 1  ;;  %v732_v46 = vperm.slane %v730_v41, 0 }
  0x39   : > { %896 = vmatpush.bf16.msra.mxu2 %v2579_v56 }
  0x3a   : > { %v662_v5 = vstv %s656_s20 }
  0x3b   : > { %871 = vmatpush.bf16.msra.mxu0 %v2559_v60  ;;  %s645_s27 = scalar_lea.vmem %s4311_s24, %s3571_s26 }
  0x3c   : > { %884 = vmatpush.bf16.msra.mxu1 %v2563_v1 }
  0x3d   : > { %897 = vmatpush.bf16.msra.mxu2 %v2567_v2  ;;  %v657_v2 = vlaneseq }
  0x3f   : > { %872 = vmatpush.bf16.msra.mxu0 %v2547_v6  ;;  %v658_v3 = vshrl.u32 %v657_v2, 7  ;;  %v660_v4 = vand.u32 127, %v657_v2 }
  0x40   : > { %885 = vmatpush.bf16.msra.mxu1 %v2551_v10 }
  0x41   : > { %898 = vmatpush.bf16.msra.mxu2 %v2555_v11  ;;  %vm661_vm6 = vcmp.gt.s32.totalorder %v660_v4, %v658_v3  ;;  %vm663_vm7 = vcmp.ge.s32.totalorder %v660_v4, %v662_v5 }
  0x42   : > { %vm664_vm8 = vmor %vm661_vm6, %vm663_vm7 }
  0x43   : > { %873 = vmatpush.bf16.msra.mxu0 %v2535_v15  ;;  %v665_v8 = vsel %vm664_vm8, -1e+30, %v3427_v7 }
  0x9e   : > { %v667_v17 = vpop.xlane.xlu0 %666 }
  0x9f   : > { %v675_v18 = vmul.f32 %v3598_v16, %v667_v17  ;;  %v2536_v17 = vld [vmem:[%s4284_s5 + $0xc] sm:$0xf0] }
  0xa0   : > { %v2539_v21 = vor.u32 %v3068_v14, %v2536_v17 }
  0xa1   : > { %v3602_v19 = vsub.f32 %v3577_v0, %v675_v18  ;;  %v2542_v18 = vld [vmem:[%s4284_s5 + $0x8] sm:$0xf] }
  0xa2   : > { %886 = vmatpush.bf16.msra.mxu1 %v2539_v21 }
  0xa3   : > { %v677_v20 = vmul.f32 %v3602_v19, %v3602_v19 }
  0xa5   : > { %678 = vadd.xlane.f32.xlu0 %v677_v20  ;;  %v3070_v20 = vld [vmem:[%s4284_s5 + $0x10] sm:$0xf0] }
  0xa6   : > { %v2543_v22 = vor.u32 %v3070_v20, %v2542_v18 }
  0xa8   : > { %899 = vmatpush.bf16.msra.mxu2 %v2543_v22 }
 0x118   : > { %v679_v23 = vpop.xlane.xlu0 %678 }
 0x119   : > { %v680_v24 = vmul.f32 %v679_v23, %v3598_v16 }
 0x11b   : > { %v681_v25 = vadd.f32 1e-05, %v680_v24 }
 0x11d   : > { %3249 = vrsqrt.f32 %v681_v25  ;;  %vm688_vm2 = vweird.f32 %v681_v25 }
 0x123   : > { %v3250_v26 = vpop.eup %3249 }
 0x124   : > { %v683_v27 = vmul.f32 %v3250_v26, %v681_v25  ;;  %vm689_vm1 = vweird.f32 %v3250_v26 }
 0x125   : > { %vm690_vm3 = vmor %vm688_vm2, %vm689_vm1 }
 0x126   : > { %v684_v28 = vmul.f32 %v3250_v26, %v683_v27 }
 0x128   : > { %v685_v29 = vmul.f32 0.5, %v684_v28 }
 0x12a   : > { %v686_v30 = vsub.f32 1.5, %v685_v29 }
 0x12c   : > { %v687_v32 = vmul.f32 %v3250_v26, %v686_v30 }
 0x12e   : > { %v691_v35 = vsel %vm690_vm3, %v3250_v26, %v687_v32 }
 0x12f   : > { %v692_v36 = vmul.f32 %v691_v35, %v3602_v19  ;;  %v734_v19 = vperm.slane %v730_v41, 2 }
 0x131   : > { %v694_v38 = vmul.f32 %v693_v34, %v692_v36 }
 0x133   : > { %v696_v39 = vadd.f32 %v695_v37, %v694_v38 }
 0x135   : > { %v697_v40 = vpack.c.bf16 %v696_v39, %v696_v39 }
 0x137   : > { %874 = vmatmul.bf16.vlgmr.msra.gmra.mxu0 %v697_v40  ;;  %887 = vmatmul.bf16.vlgmr.msra.gmra.mxu1 %v697_v40 }
 0x138   : > { %900 = vmatmul.bf16.vlgmr.msra.gmra.mxu2 %v697_v40 }
 0x1b4   : > { %v875_v43 = vpop.f32.mrf.mxu0  ;;  %v888_v44 = vpop.f32.mrf.mxu1 }
 0x1b5   : > { %v889_v45 = vadd.f32 %v888_v44, %v733_v42  ;;  %v876_v49 = vadd.f32 %v875_v43, %v732_v46 }
 0x1b7   : > { %v906_v47 = vpack.c.bf16 %v889_v45, %v889_v45  ;;  %v905_v55 = vpack.c.bf16 %v876_v49, %v876_v49 }
 0x1b9   : > { %977 = vrot.lane.b32.xlu0 %v906_v47, %s3424_s29  ;;  %954 = vrot.lane.b32.xlu2 %v906_v47, %s4300_s0  ;;  %v912_v48 = vsel %vm907_vm4, %v906_v47, 0 }
 0x1ba   : > { %931 = vrot.lane.b32.xlu1 %v906_v47, %s3426_s30  ;;  %921 = vmatpush.bf16.xpose.msra.mxu3 %v912_v48 }
 0x1bb   : > { %v901_v50 = vpop.f32.mrf.mxu2 }
 0x1bc   : > { %v902_v51 = vadd.f32 %v901_v50, %v734_v19  ;;  %v877_v52 = vpop.f32.mrf.mxu0  ;;  %v890_v53 = vpop.f32.mrf.mxu1 }
 0x1be   : > { %v3753_v54 = vpack.c.bf16 %v902_v51, %v902_v51 }
 0x1c0   : > { %v1050_v56 = vsel %vm1048_vm5, %v3753_v54, 0 }
 0x1c1   : > { %1059 = vmatpush.bf16.msrb.mxu2 %v1050_v56  ;;  %952 = vrot.lane.b32.xlu2 %v905_v55, %s4300_s0 }
 0x1c2   : > { %928 = vrot.lane.b32.xlu1 %v905_v55, %s3426_s30  ;;  %2628 = vmatmul.msk.bf16.vlgmr.msra.gmra.mxu3 %vm907_vm4, %v905_v55 }
 0x1c3   : > { %v903_v57 = vpop.f32.mrf.mxu2 }
 0x1ca   : > { %975 = vrot.lane.b32.xlu1 %v905_v55, %s3424_s29 }
 0x213   : > { %v955_v58 = vpop.permute.xlu2 %954 }
 0x214   : > { %v960_v63 = vsel %vm907_vm4, %v955_v58, 0 }
 0x21b   : > { %v953_v9 = vpop.permute.xlu2 %952 }
 0x22b   : > { %v978_v59 = vpop.permute.xlu0 %977 }
 0x22c   : > { %v932_v60 = vpop.permute.xlu1 %931  ;;  %v983_v61 = vsel %vm907_vm4, %v978_v59, 0 }
 0x22d   : > { %v937_v62 = vsel %vm907_vm4, %v932_v60, 0  ;;  %992 = vmatpush.bf16.xpose.msrb.mxu0 %v983_v61 }
 0x22e   : > { %946 = vmatpush.bf16.xpose.msrb.mxu3 %v937_v62 }
 0x234   : > { %v929_v1 = vpop.permute.xlu1 %928 }
 0x235   : > { %2629 = vmatmul.msk.bf16.vlgmr.msrb.gmra.mxu3 %vm907_vm4, %v929_v1 }
 0x236   : > { %969 = vmatpush.bf16.xpose.msra.mxu3 %v960_v63 }
 0x23c   : > { %v976_v6 = vpop.permute.xlu1 %975 }
 0x23d   : > { %2631 = vmatmul.msk.bf16.vlgmr.msrb.gmra.mxu0 %vm907_vm4, %v976_v6 }
 0x245   : > { %v923_v10 = vpop.f32.mrf.mxu3  ;;  %2630 = vmatmul.msk.bf16.vlgmr.msra.gmra.mxu3 %vm907_vm4, %v953_v9 }
 0x246   : > { %v924_v11 = vadd.f32 %v923_v10, %v665_v8 }
 0x248   : > { %v999_v12 = vsel %vm998_vm9, %v924_v11, -inf }
 0x249   : > { %1000 = vmax.xlane.f32.xlu2 %v999_v12 }
 0x24d   : > { %v925_v13 = vpop.f32.mrf.mxu3 }
 0x2b8   : > { %v948_v14 = vpop.f32.mrf.mxu3 }
 0x2b9   : > { %v949_v15 = vadd.f32 %v948_v14, %v665_v8 }
 0x2ba   : > { %v994_v17 = vpop.f32.mrf.mxu0 }
 0x2bb   : > { %v995_v18 = vadd.f32 %v994_v17, %v665_v8  ;;  %v1002_v20 = vsel %vm998_vm9, %v949_v15, -inf  ;;  %v3099_v17 = vld [vmem:[#allocation4 + $0x38] sm:$0xff] }
 0x2bc   : > { %1003 = vmax.xlane.f32.xlu1 %v1002_v20  ;;  %v1001_v21 = vpop.xlane.xlu2 %1000  ;;  %1218 = vmatpush.bf16.msrb.mxu1 %v3099_v17  ;;  %v3097_v20 = vld [vmem:[#allocation4 + $0x28] sm:$0xff] }
 0x2bd   : > { %v1011_v22 = vsub.f32 %v924_v11, %v1001_v21  ;;  %v1008_v23 = vsel %vm998_vm9, %v995_v18, -inf  ;;  %v3096_v21 = vld [vmem:[#allocation4 + $0x20] sm:$0xff] }
 0x2be   : > { %1009 = vmax.xlane.f32.xlu2 %v1008_v23  ;;  %v3094_v23 = vld [vmem:[#allocation4 + $0x10] sm:$0xff] }
 0x2bf   : > { %v1015_v24 = vmul.f32 1.442695, %v1011_v22  ;;  %v3095_v22 = vld [vmem:[#allocation4 + $0x18] sm:$0xff] }
 0x2c0   : > { %v950_v25 = vpop.f32.mrf.mxu3 }
 0x2c1   : > { %3251 = vpow2.f32 %v1015_v24  ;;  %v3093_v24 = vld [vmem:[#allocation4 + $0x8] sm:$0xff]  ;;  %v3092_v25 = vld [vmem:[#allocation4] sm:$0xff] }
 0x2c2   : > { %v996_v26 = vpop.f32.mrf.mxu0 }
 0x2c7   : > { %v3252_v27 = vpop.eup %3251 }
 0x2c8   : > { %v971_v28 = vpop.f32.mrf.mxu3  ;;  %v1023_v29 = vsel %vm998_vm9, %v3252_v27, 0.0 }
 0x2c9   : > { %v972_v30 = vadd.f32 %v971_v28, %v665_v8  ;;  %1024 = vadd.xlane.f32.xlu2 %v1023_v29 }
 0x2cb   : > { %v1005_v32 = vsel %vm998_vm9, %v972_v30, -inf }
 0x2cc   : > { %1006 = vmax.xlane.f32.xlu0 %v1005_v32 }
 0x2d0   : > { %v973_v34 = vpop.f32.mrf.mxu3 }
 0x2e0   : > { %1067 = vrot.lane.b32.xlu0 %v3753_v54, %s3426_s30 }
 0x32f   : > { %v1004_v35 = vpop.xlane.xlu1 %1003 }
 0x330   : > { %v1012_v38 = vsub.f32 %v949_v15, %v1004_v35  ;;  %v3243_v35 = vld [vmem:[%s4287_s8] ss:$0 sm:$0xff] }
 0x331   : > { %v1010_v36 = vpop.xlane.xlu2 %1009 }
 0x332   : > { %v1014_v37 = vsub.f32 %v995_v18, %v1010_v36  ;;  %v1017_v40 = vmul.f32 1.442695, %v1012_v38  ;;  %v3098_v18 = vld [vmem:[#allocation4 + $0x30] sm:$0xff] }
 0x333   : > { %1219 = vmatpush.bf16.msrb.mxu1 %v3098_v18 }
 0x334   : > { %v1021_v39 = vmul.f32 1.442695, %v1014_v37 }
 0x336   : > { %3253 = vpow2.f32 %v1021_v39 }
 0x337   : > { %3255 = vpow2.f32 %v1017_v40  ;;  %1220 = vmatpush.bf16.msrb.mxu1 %v3097_v20  ;;  %v2762_v40 = vld [vmem:[%s4290_s11 + $0x70] sm:$0xf] }
 0x33b   : > { %1221 = vmatpush.bf16.msrb.mxu1 %v3096_v21 }
 0x33c   : > { %v3254_v41 = vpop.eup %3253  ;;  %v1025_v42 = vpop.xlane.xlu2 %1024 }
 0x33d   : > { %3257 = vrcp.f32 %v1025_v42  ;;  %v1032_v43 = vsel %vm998_vm9, %v3254_v41, 0.0  ;;  %v3256_v46 = vpop.eup %3255  ;;  %v2754_v42 = vld [vmem:[%s4290_s11 + $0x60] sm:$0xf] }
 0x33e   : > { %1033 = vadd.xlane.f32.xlu1 %v1032_v43  ;;  %v1026_v49 = vsel %vm998_vm9, %v3256_v46, 0.0 }
 0x33f   : > { %v1007_v44 = vpop.xlane.xlu0 %1006  ;;  %1222 = vmatpush.bf16.msrb.mxu1 %v3095_v22  ;;  %v3863_v22 = vld [vmem:[%s4291_s12] sm:$0x3] }
 0x340   : > { %v1013_v45 = vsub.f32 %v972_v30, %v1007_v44 }
 0x342   : > { %v1019_v47 = vmul.f32 1.442695, %v1013_v45  ;;  %v2746_v45 = vld [vmem:[%s4290_s11 + $0x50] sm:$0xf] }
 0x343   : > { %v3258_v19 = vpop.eup %3257  ;;  %1223 = vmatpush.bf16.msrb.mxu1 %v3094_v23 }
 0x344   : > { %v1039_v48 = vmul.f32 %v3258_v19, %v3252_v27  ;;  %3259 = vpow2.f32 %v1019_v47  ;;  %v3107_v47 = vld [vmem:[#allocation6 + $0x38] sm:$0xff] }
 0x346   : > { %1027 = vadd.xlane.f32.xlu1 %v1026_v49  ;;  %v1043_v50 = vpack.c.bf16 %v1039_v48, %v1039_v48  ;;  %v2738_v48 = vld [vmem:[%s4290_s11 + $0x40] sm:$0xf]  ;;  %v3117_v49 = vld [vmem:[%s4290_s11 + $0x44] sm:$0xf0] }
 0x347   : > { %1224 = vmatpush.bf16.msrb.mxu1 %v3093_v24 }
 0x348   : > { %2632 = vmatmul.msk.bf16.vlgmr.msrb.gmra.mxu2 %vm998_vm9, %v1043_v50  ;;  %v2739_v50 = vor.u32 %v3117_v49, %v2738_v48  ;;  %v3244_v48 = vld [vmem:[%s4312_s25] ss:$0 sm:$0xff] }
 0x34a   : > { %v3260_v51 = vpop.eup %3259 }
 0x34b   : > { %v1029_v52 = vsel %vm998_vm9, %v3260_v51, 0.0  ;;  %1225 = vmatpush.bf16.msrb.mxu1 %v3092_v25  ;;  %v1252_v25 = vperm.slane %v3736_v31, 1 }
 0x34c   : > { %1030 = vadd.xlane.f32.xlu2 %v1029_v52  ;;  %v3115_v52 = vld [vmem:[%s4290_s11 + $0x34] sm:$0xf0] }
 0x352   : > { %v1068_v53 = vpop.permute.xlu0 %1067 }
 0x353   : > { %v1073_v55 = vsel %vm1048_vm5, %v1068_v53, 0 }
 0x354   : > { %1082 = vmatpush.bf16.msra.mxu2 %v1073_v55  ;;  %v2722_v55 = vld [vmem:[%s4290_s11 + $0x20] sm:$0xf] }
 0x358   : > { %1325 = vmatpush.bf16.msrb.mxu2 %v3107_v47  ;;  %v2748_v47 = vld [vmem:[%s4290_s11 + $0x58] sm:$0xf0] }
 0x35f   : > { %1111 = vrot.lane.b32.xlu1 %v3753_v54, %s3424_s29 }
 0x364   : > { %1089 = vrot.lane.b32.xlu2 %v3753_v54, %s4300_s0 }
 0x3b1   : > { %v1034_v56 = vpop.xlane.xlu1 %1033 }
 0x3b9   : > { %v1028_v57 = vpop.xlane.xlu1 %1027 }
 0x3ba   : > { %3261 = vrcp.f32 %v1028_v57 }
 0x3bf   : > { %v1031_v58 = vpop.xlane.xlu2 %1030 }
 0x3c0   : > { %v3262_v59 = vpop.eup %3261  ;;  %3263 = vrcp.f32 %v1031_v58  ;;  %v2714_v58 = vld [vmem:[%s4290_s11 + $0x10] sm:$0xf] }
 0x3c1   : > { %v1040_v60 = vmul.f32 %v3262_v59, %v3256_v46  ;;  %3265 = vrcp.f32 %v1034_v56  ;;  %v3119_v46 = vld [vmem:[%s4290_s11 + $0x54] sm:$0xf0]  ;;  %v3113_v56 = vld [vmem:[%s4290_s11 + $0x24] sm:$0xf0] }
 0x3c2   : > { %v2747_v19 = vor.u32 %v3119_v46, %v2746_v45  ;;  %v2723_v57 = vor.u32 %v3113_v56, %v2722_v55  ;;  %v3111_v59 = vld [vmem:[%s4290_s11 + $0x14] sm:$0xf0]  ;;  %v3118_v46 = vld [vmem:[%s4290_s11 + $0x54] sm:$0xf] }
 0x3c3   : > { %v1065_v61 = vpack.c.bf16 %v1040_v60, %v1040_v60  ;;  %v2715_v60 = vor.u32 %v3111_v59, %v2714_v58  ;;  %v2732_v58 = vld [vmem:[%s4290_s11 + $0x38] sm:$0xf0] }
 0x3c5   : > { %2633 = vmatmul.msk.bf16.vlgmr.msra.gmra.mxu2 %vm998_vm9, %v1065_v61  ;;  %v2706_v61 = vld [vmem:[%s4290_s11] sm:$0xf] }
 0x3c6   : > { %v3264_v62 = vpop.eup %3263 }
 0x3c7   : > { %v1041_v63 = vmul.f32 %v3264_v62, %v3260_v51  ;;  %v1090_v1 = vpop.permute.xlu2 %1089  ;;  %v3266_v54 = vpop.eup %3265  ;;  %v2730_v51 = vld [vmem:[%s4290_s11 + $0x30] sm:$0xf]  ;;  %v3109_v62 = vld [vmem:[%s4290_s11 + $0x4] sm:$0xf0] }
 0x3c8   : > { %v1095_v2 = vsel %vm1048_vm5, %v1090_v1, 0  ;;  %v1042_v5 = vmul.f32 %v3266_v54, %v3254_v41  ;;  %v3123_v41 = vld [vmem:[%s4290_s11 + $0x74] sm:$0xf0]  ;;  %v2731_v53 = vor.u32 %v3115_v52, %v2730_v51  ;;  %v2740_v51 = vld [vmem:[%s4290_s11 + $0x48] sm:$0xf0] }
 0x3c9   : > { %v1088_v3 = vpack.c.bf16 %v1041_v63, %v1041_v63  ;;  %1104 = vmatpush.bf16.msrb.mxu3 %v1095_v2  ;;  %v2763_v43 = vor.u32 %v3123_v41, %v2762_v40  ;;  %v2707_v2 = vor.u32 %v3109_v62, %v2706_v61  ;;  %v2764_v41 = vld [vmem:[%s4290_s11 + $0x78] sm:$0xf0]  ;;  %v3112_v61 = vld [vmem:[%s4290_s11 + $0x24] sm:$0xf]  ;;  %v2724_v62 = vld [vmem:[%s4290_s11 + $0x28] sm:$0xf0] }
 0x3ca   : > { %v1110_v9 = vpack.c.bf16 %v1042_v5, %v1042_v5  ;;  %v3106_v5 = vld [vmem:[#allocation6 + $0x30] sm:$0xff] }
 0x3cb   : > { %v1061_v4 = vpop.f32.mrf.mxu2  ;;  %1326 = vmatpush.bf16.msrb.mxu2 %v3106_v5  ;;  %v3108_v5 = vld [vmem:[%s4290_s11 + $0x4] sm:$0xf] }
 0x3cc   : > { %2634 = vmatmul.msk.bf16.vlgmr.msrb.gmra.mxu3 %vm998_vm9, %v1088_v3 }
 0x3cd   : > { %1446 = vmatpush.bf16.msra.mxu3 %v2763_v43 }
 0x3d1   : > { %v1112_v6 = vpop.permute.xlu1 %1111 }
 0x3d2   : > { %v1117_v7 = vsel %vm1048_vm5, %v1112_v6, 0  ;;  %v3105_v6 = vld [vmem:[#allocation6 + $0x28] sm:$0xff] }
 0x3d3   : > { %v1063_v8 = vpop.f32.mrf.mxu2  ;;  %1126 = vmatpush.bf16.msra.mxu0 %v1117_v7  ;;  %1327 = vmatpush.bf16.msrb.mxu2 %v3105_v6  ;;  %v3104_v7 = vld [vmem:[#allocation6 + $0x20] sm:$0xff]  ;;  %v2708_v6 = vld [vmem:[%s4290_s11 + $0x8] sm:$0xf0] }
 0x3d4   : > { %v3103_v8 = vld [vmem:[#allocation6 + $0x18] sm:$0xff] }
 0x3d6   : > { %2635 = vmatmul.msk.bf16.vlgmr.msra.gmra.mxu0 %vm998_vm9, %v1110_v9  ;;  %v3102_v9 = vld [vmem:[#allocation6 + $0x10] sm:$0xff] }
 0x3d7   : > { %1328 = vmatpush.bf16.msrb.mxu2 %v3104_v7  ;;  %v2711_v7 = vor.u32 %v3108_v5, %v2708_v6 }
 0x3db   : > { %1329 = vmatpush.bf16.msrb.mxu2 %v3103_v8 }
 0x3df   : > { %1330 = vmatpush.bf16.msrb.mxu2 %v3102_v9 }
 0x448   : > { %v1084_v10 = vpop.f32.mrf.mxu2 }
 0x449   : > { %1133 = vrot.lane.b32.xlu0 %v1084_v10, %s3424_s29  ;;  %v3101_v10 = vld [vmem:[#allocation6 + $0x8] sm:$0xff] }
 0x44a   : > { %1331 = vmatpush.bf16.msrb.mxu2 %v3101_v10 }
 0x44f   : > { %v1106_v11 = vpop.f32.mrf.mxu3 }
 0x450   : > { %v1086_v12 = vpop.f32.mrf.mxu2  ;;  %1137 = vrot.lane.b32.xlu2 %v1106_v11, %s4300_s0  ;;  %v3100_v11 = vld [vmem:[#allocation6] sm:$0xff] }
 0x451   : > { %1332 = vmatpush.bf16.msrb.mxu2 %v3100_v11 }
 0x453   : > { %v1128_v13 = vpop.f32.mrf.mxu0 }
 0x454   : > { %1141 = vrot.lane.b32.xlu0 %v1128_v13, %s3426_s30 }
 0x457   : > { %v1108_v14 = vpop.f32.mrf.mxu3 }
 0x45b   : > { %v1130_v15 = vpop.f32.mrf.mxu0 }
 0x4aa   : > { %v1138_v28 = vpop.permute.xlu2 %1137 }
 0x4bb   : > { %v1134_v26 = vpop.permute.xlu0 %1133 }
 0x4bc   : > { %v1144_v27 = vsel %vm907_vm4, %v1061_v4, %v1134_v26  ;;  %v3856_v4 = vld [vmem:[%s645_s27] sm:$0xff]  ;;  %v1356_v26 = vperm.slane %v3863_v22, 0 }
 0x4bd   : > { %v1146_v30 = vsel %vm1145_vm10, %v1144_v27, %v1138_v28 }
 0x4c6   : > { %v1142_v29 = vpop.permute.xlu0 %1141 }
 0x4c7   : > { %v1148_v32 = vsel %vm1147_vm11, %v1146_v30, %v1142_v29  ;;  %v1254_v29 = vperm.slane %v3741_v33, 1  ;;  %v3122_v33 = vld [vmem:[%s4290_s11 + $0x74] sm:$0xf] }
 0x4c8   : > { %v1149_v34 = vpack.c.bf16 %v1148_v32, %v1148_v32 }
 0x4ca   : > { %1226 = vmatmul.bf16.vlgmr.msrb.gmra.mxu1 %v1149_v34 }
 0x547   : > { %v1227_v36 = vpop.f32.mrf.mxu1 }
 0x548   : > { %v1228_v37 = vadd.f32 %v3243_v35, %v1227_v36 }
 0x54a   : > { %v3799_v38 = vadd.f32 %v1228_v37, %v3577_v0  ;;  %v3121_v0 = vld [vmem:[%s4290_s11 + $0x64] sm:$0xf0] }
 0x54b   : > { %v2755_v44 = vor.u32 %v3121_v0, %v2754_v42  ;;  %v3120_v42 = vld [vmem:[%s4290_s11 + $0x64] sm:$0xf]  ;;  %v2767_v0 = vor.u32 %v3122_v33, %v2764_v41 }
 0x54c   : > { %1232 = vadd.xlane.f32.xlu1 %v3799_v38 }
 0x54d   : > { %1447 = vmatpush.bf16.msra.mxu3 %v2755_v44  ;;  %v2756_v44 = vld [vmem:[%s4290_s11 + $0x68] sm:$0xf0]  ;;  %1460 = vmatpush.bf16.msrb.mxu0 %v2767_v0 }
 0x54e   : > { %v2759_v45 = vor.u32 %v3120_v42, %v2756_v44 }
 0x54f   : > { %v1229_v39 = vpop.f32.mrf.mxu1 }
 0x551   : > { %1448 = vmatpush.bf16.msra.mxu3 %v2747_v19  ;;  %1461 = vmatpush.bf16.msrb.mxu0 %v2759_v45  ;;  %v2751_v19 = vor.u32 %v3118_v46, %v2748_v47 }
 0x555   : > { %1449 = vmatpush.bf16.msra.mxu3 %v2739_v50  ;;  %v3116_v50 = vld [vmem:[%s4290_s11 + $0x44] sm:$0xf]  ;;  %1462 = vmatpush.bf16.msrb.mxu0 %v2751_v19 }
 0x556   : > { %v2743_v55 = vor.u32 %v3116_v50, %v2740_v51 }
 0x559   : > { %1450 = vmatpush.bf16.msra.mxu3 %v2731_v53  ;;  %1463 = vmatpush.bf16.msrb.mxu0 %v2743_v55 }
 0x55d   : > { %1451 = vmatpush.bf16.msra.mxu3 %v2723_v57  ;;  %v3114_v57 = vld [vmem:[%s4290_s11 + $0x34] sm:$0xf] }
 0x561   : > { %1452 = vmatpush.bf16.msra.mxu3 %v2715_v60  ;;  %v2735_v60 = vor.u32 %v3114_v57, %v2732_v58 }
 0x563   : > { %1464 = vmatpush.bf16.msrb.mxu0 %v2735_v60 }
 0x565   : > { %1453 = vmatpush.bf16.msra.mxu3 %v2707_v2  ;;  %v3110_v2 = vld [vmem:[%s4290_s11 + $0x14] sm:$0xf] }
 0x568   : > { %1454 = vmatmul.bf16.vlgmr.msra.gmra.mxu3 %v3856_v4 }
 0x5bf   : > { %v1233_v63 = vpop.xlane.xlu1 %1232 }
 0x5c0   : > { %v1234_v1 = vmul.f32 %v1233_v63, %v3598_v16 }
 0x5c2   : > { %v1235_v3 = vsub.f32 %v3799_v38, %v1234_v1  ;;  %v2727_v1 = vor.u32 %v3112_v61, %v2724_v62 }
 0x5c4   : > { %v1236_v54 = vmul.f32 %v1235_v3, %v1235_v3  ;;  %1465 = vmatpush.bf16.msrb.mxu0 %v2727_v1 }
 0x5c6   : > { %1237 = vadd.xlane.f32.xlu2 %v1236_v54 }
 0x5eb   : > { %v1455_v23 = vpop.f32.mrf.mxu3 }
 0x5ec   : > { %v1456_v32 = vadd.f32 %v1455_v23, %v1356_v26 }
 0x5f3   : > { %v1457_v34 = vpop.f32.mrf.mxu3 }
 0x5f4   : > { %v1458_v36 = vadd.f32 %v1457_v34, %v1356_v26 }
 0x5f6   : > { %v1475_v39 = vpack.c.bf16 %v1458_v36, %v1456_v32 }
 0x5f8   : > { %1499 = vrot.lane.b32.xlu0 %v1475_v39, %s3426_s30  ;;  %v1480_v40 = vsel %vm907_vm4, %v1475_v39, 0 }
 0x5f9   : > { %1489 = vmatpush.bf16.xpose.msra.mxu1 %v1480_v40 }
 0x600   : > { %1522 = vrot.lane.b32.xlu0 %v1475_v39, %s4300_s0 }
 0x639   : > { %v1238_v12 = vpop.xlane.xlu2 %1237 }
 0x63a   : > { %v1239_v13 = vmul.f32 %v1238_v12, %v3598_v16 }
 0x63c   : > { %v1240_v14 = vadd.f32 1e-05, %v1239_v13 }
 0x63e   : > { %3267 = vrsqrt.f32 %v1240_v14  ;;  %vm1247_vm13 = vweird.f32 %v1240_v14 }
 0x644   : > { %v3268_v15 = vpop.eup %3267 }
 0x645   : > { %v1242_v17 = vmul.f32 %v3268_v15, %v1240_v14  ;;  %vm1248_vm12 = vweird.f32 %v3268_v15 }
 0x646   : > { %vm1249_vm14 = vmor %vm1247_vm13, %vm1248_vm12 }
 0x647   : > { %v1243_v18 = vmul.f32 %v3268_v15, %v1242_v17  ;;  %v1357_v17 = vperm.slane %v3863_v22, 1 }
 0x649   : > { %v1244_v20 = vmul.f32 0.5, %v1243_v18 }
 0x64b   : > { %v1245_v21 = vsub.f32 1.5, %v1244_v20 }
 0x64d   : > { %v1246_v24 = vmul.f32 %v3268_v15, %v1245_v21 }
 0x64f   : > { %v1250_v27 = vsel %vm1249_vm14, %v3268_v15, %v1246_v24 }
 0x650   : > { %v1251_v28 = vmul.f32 %v1250_v27, %v1235_v3  ;;  %v2716_v3 = vld [vmem:[%s4290_s11 + $0x18] sm:$0xf0] }
 0x651   : > { %v2719_v54 = vor.u32 %v3110_v2, %v2716_v3 }
 0x652   : > { %v1253_v30 = vmul.f32 %v1252_v25, %v1251_v28 }
 0x653   : > { %1466 = vmatpush.bf16.msrb.mxu0 %v2719_v54 }
 0x654   : > { %v1255_v35 = vadd.f32 %v1254_v29, %v1253_v30 }
 0x656   : > { %v1256_v37 = vpack.c.bf16 %v1255_v35, %v1255_v35 }
 0x657   : > { %1467 = vmatpush.bf16.msrb.mxu0 %v2711_v7 }
 0x658   : > { %1333 = vmatmul.bf16.vlgmr.msrb.gmra.mxu2 %v1256_v37 }
 0x65a   : > { %1468 = vmatmul.bf16.vlgmr.msrb.gmra.mxu0 %v3856_v4 }
 0x66a   : > { %v1500_v31 = vpop.permute.xlu0 %1499 }
 0x66b   : > { %v1505_v43 = vsel %vm907_vm4, %v1500_v31, 0 }
 0x66c   : > { %1514 = vmatpush.bf16.xpose.msra.mxu2 %v1505_v43 }
 0x672   : > { %v1523_v49 = vpop.permute.xlu0 %1522 }
 0x673   : > { %v1528_v52 = vsel %vm907_vm4, %v1523_v49, 0 }
 0x674   : > { %1537 = vmatpush.bf16.xpose.msrb.mxu3 %v1528_v52 }
 0x6d7   : > { %v1469_v15 = vpop.f32.mrf.mxu0 }
 0x6d8   : > { %v1470_v18 = vadd.f32 %v1469_v15, %v1357_v17 }
 0x6db   : > { %v1334_v53 = vpop.f32.mrf.mxu2 }
 0x6dc   : > { %v1335_v56 = vadd.f32 %v3244_v48, %v1334_v53 }
 0x6de   : > { %v1474_v59 = vpack.c.bf16 %v1335_v56, %v1335_v56 }
 0x6df   : > { %v1471_v4 = vpop.f32.mrf.mxu0 }
 0x6e0   : > { %1543 = vrot.lane.b32.xlu1 %v1474_v59, %s3424_s29  ;;  %1496 = vrot.lane.b32.xlu0 %v1474_v59, %s3426_s30  ;;  %v1472_v20 = vadd.f32 %v1471_v4, %v1357_v17  ;;  %v3129_v4 = vld [vmem:[#allocation8 + $0x28] sm:$0xff] }
 0x6e1   : > { %2768 = vmatmul.msk.bf16.vlgmr.msra.gmra.mxu1 %vm907_vm4, %v1474_v59 }
 0x6e2   : > { %v1612_v21 = vpack.c.bf16 %v1472_v20, %v1470_v18  ;;  %v3130_v18 = vld [vmem:[#allocation8 + $0x30] sm:$0xff]  ;;  %v3128_v20 = vld [vmem:[#allocation8 + $0x20] sm:$0xff] }
 0x6e3   : > { %v1336_v63 = vpop.f32.mrf.mxu2 }
 0x6e4   : > { %1623 = vmatpush.bf16.msrb.mxu1 %v1612_v21 }
 0x6e8   : > { %1520 = vrot.lane.b32.xlu0 %v1474_v59, %s4313_s23 }
 0x6f0   : > { %1545 = vrot.lane.b32.xlu0 %v1475_v39, %s3424_s29 }
 0x752   : > { %v1497_v8 = vpop.permute.xlu0 %1496  ;;  %v1544_v14 = vpop.permute.xlu1 %1543 }
 0x753   : > { %2769 = vmatmul.msk.bf16.vlgmr.msra.gmra.mxu2 %vm907_vm4, %v1497_v8  ;;  %v3131_v8 = vld [vmem:[#allocation8 + $0x38] sm:$0xff] }
 0x754   : > { %1774 = vmatpush.bf16.msra.mxu1 %v3131_v8 }
 0x758   : > { %1775 = vmatpush.bf16.msra.mxu1 %v3130_v18  ;;  %v2876_v18 = vld [vmem:[%s4294_s15 + $0x90] sm:$0xf0] }
 0x75a   : > { %v1521_v9 = vpop.permute.xlu0 %1520 }
 0x75b   : > { %2770 = vmatmul.msk.bf16.vlgmr.msrb.gmra.mxu3 %vm907_vm4, %v1521_v9 }
 0x75c   : > { %1776 = vmatpush.bf16.msra.mxu1 %v3129_v4  ;;  %v2882_v4 = vld [vmem:[%s4294_s15 + $0x88] sm:$0xf] }
 0x75e   : > { %v1491_v10 = vpop.f32.mrf.mxu1 }
 0x75f   : > { %v1567_v32 = vsel %vm1566_vm15, %v1491_v10, -inf }
 0x760   : > { %1777 = vmatpush.bf16.msra.mxu1 %v3128_v20  ;;  %v3151_v20 = vld [vmem:[%s4294_s15 + $0x94] sm:$0xf0] }
 0x762   : > { %v1546_v11 = vpop.permute.xlu0 %1545 }
 0x763   : > { %v1551_v12 = vsel %vm907_vm4, %v1546_v11, 0 }
 0x764   : > { %1560 = vmatpush.bf16.xpose.msra.mxu0 %v1551_v12 }
 0x766   : > { %v1493_v13 = vpop.f32.mrf.mxu1 }
 0x76b   : > { %2771 = vmatmul.msk.bf16.vlgmr.msra.gmra.mxu0 %vm907_vm4, %v1544_v14 }
 0x7d6   : > { %v1516_v23 = vpop.f32.mrf.mxu2 }
 0x7d7   : > { %v1570_v24 = vsel %vm1566_vm15, %v1516_v23, -inf }
 0x7d8   : > { %1571 = vmax.xlane.f32.xlu0 %v1570_v24  ;;  %v3125_v24 = vld [vmem:[#allocation8 + $0x8] sm:$0xff] }
 0x7de   : > { %v1518_v25 = vpop.f32.mrf.mxu2  ;;  %v1539_v26 = vpop.f32.mrf.mxu3 }
 0x7df   : > { %v1573_v30 = vsel %vm1566_vm15, %v1539_v26, -inf  ;;  %v3124_v25 = vld [vmem:[#allocation8] sm:$0xff] }
 0x7e6   : > { %v1541_v27 = vpop.f32.mrf.mxu3 }
 0x7e8   : > { %v1562_v28 = vpop.f32.mrf.mxu0 }
 0x7e9   : > { %v1576_v29 = vsel %vm1566_vm15, %v1562_v28, -inf }
 0x7ea   : > { %1577 = vmax.xlane.f32.xlu2 %v1576_v29 }
 0x7ec   : > { %1651 = vrot.lane.b32.xlu0 %v1612_v21, %s4313_s23 }
 0x7f0   : > { %v1564_v22 = vpop.f32.mrf.mxu0 }
 0x7f2   : > { %1574 = vmax.xlane.f32.xlu2 %v1573_v30 }
 0x7f4   : > { %1671 = vrot.lane.b32.xlu0 %v1612_v21, %s3424_s29 }
 0x7fa   : > { %1568 = vmax.xlane.f32.xlu2 %v1567_v32 }
 0x84b   : > { %v1572_v34 = vpop.xlane.xlu0 %1571 }
 0x84c   : > { %v1580_v35 = vsub.f32 %v1516_v23, %v1572_v34  ;;  %v3126_v23 = vld [vmem:[#allocation8 + $0x10] sm:$0xff]  ;;  %v3245_v34 = vld [vmem:[%s4293_s14] ss:$0 sm:$0xff] }
 0x84e   : > { %v1585_v36 = vmul.f32 1.442695, %v1580_v35 }
 0x850   : > { %3269 = vpow2.f32 %v1585_v36 }
 0x856   : > { %v3270_v37 = vpop.eup %3269 }
 0x857   : > { %v1594_v39 = vsel %vm1566_vm15, %v3270_v37, 0.0 }
 0x858   : > { %1595 = vadd.xlane.f32.xlu1 %v1594_v39 }
 0x85d   : > { %v1578_v40 = vpop.xlane.xlu2 %1577 }
 0x85e   : > { %v1582_v31 = vsub.f32 %v1562_v28, %v1578_v40  ;;  %v1652_v33 = vpop.permute.xlu0 %1651  ;;  %v2922_v40 = vld [vmem:[%s4294_s15 + $0xe0] sm:$0xf] }
 0x85f   : > { %1664 = vmatpush.bf16.msra.mxu3 %v1652_v33  ;;  %v3160_v33 = vld [vmem:[%s4294_s15 + $0xe4] sm:$0xf] }
 0x860   : > { %v1589_v41 = vmul.f32 1.442695, %v1582_v31  ;;  %v3162_v31 = vld [vmem:[%s4294_s15 + $0xec] sm:$0xf0] }
 0x862   : > { %3271 = vpow2.f32 %v1589_v41  ;;  %v2923_v41 = vor.u32 %v3162_v31, %v2922_v40  ;;  %v2868_v40 = vld [vmem:[%s4294_s15 + $0x78] sm:$0xf0] }
 0x865   : > { %v1575_v42 = vpop.xlane.xlu2 %1574 }
 0x866   : > { %v1581_v43 = vsub.f32 %v1539_v26, %v1575_v42  ;;  %v1672_v0 = vpop.permute.xlu0 %1671  ;;  %v2930_v42 = vld [vmem:[%s4294_s15 + $0xe8] sm:$0xf] }
 0x867   : > { %1684 = vmatpush.bf16.msrb.mxu0 %v1672_v0 }
 0x868   : > { %v3272_v44 = vpop.eup %3271  ;;  %v1587_v45 = vmul.f32 1.442695, %v1581_v43  ;;  %v3163_v43 = vld [vmem:[%s4294_s15 + $0xf4] sm:$0xf0] }
 0x869   : > { %v1600_v46 = vsel %vm1566_vm15, %v3272_v44, 0.0 }
 0x86a   : > { %3273 = vpow2.f32 %v1587_v45  ;;  %1601 = vadd.xlane.f32.xlu2 %v1600_v46  ;;  %v3161_v45 = vld [vmem:[%s4294_s15 + $0xec] sm:$0xf]  ;;  %v2932_v46 = vld [vmem:[%s4294_s15 + $0xf8] sm:$0xf0] }
 0x86d   : > { %v1569_v47 = vpop.xlane.xlu2 %1568 }
 0x86e   : > { %v1579_v19 = vsub.f32 %v1491_v10, %v1569_v47  ;;  %v2935_v47 = vor.u32 %v3161_v45, %v2932_v46 }
 0x870   : > { %v3274_v48 = vpop.eup %3273  ;;  %v1583_v49 = vmul.f32 1.442695, %v1579_v19 }
 0x871   : > { %v1597_v50 = vsel %vm1566_vm15, %v3274_v48, 0.0 }
 0x872   : > { %3275 = vpow2.f32 %v1583_v49  ;;  %1598 = vadd.xlane.f32.xlu2 %v1597_v50 }
 0x878   : > { %v3276_v51 = vpop.eup %3275 }
 0x879   : > { %v1591_v52 = vsel %vm1566_vm15, %v3276_v51, 0.0 }
 0x87a   : > { %1592 = vadd.xlane.f32.xlu1 %v1591_v52  ;;  %v3158_v52 = vld [vmem:[%s4294_s15 + $0xcc] sm:$0xf0] }
 0x88a   : > { %1631 = vrot.lane.b32.xlu2 %v1612_v21, %s3426_s30  ;;  %v3127_v21 = vld [vmem:[#allocation8 + $0x18] sm:$0xff] }
 0x88b   : > { %1778 = vmatpush.bf16.msra.mxu1 %v3127_v21 }
 0x88f   : > { %1779 = vmatpush.bf16.msra.mxu1 %v3126_v23  ;;  %v2883_v23 = vor.u32 %v3151_v20, %v2882_v4 }
 0x893   : > { %1780 = vmatpush.bf16.msra.mxu1 %v3125_v24  ;;  %v3149_v24 = vld [vmem:[%s4294_s15 + $0x8c] sm:$0xf] }
 0x897   : > { %1781 = vmatpush.bf16.msra.mxu1 %v3124_v25  ;;  %v2884_v25 = vld [vmem:[%s4294_s15 + $0x98] sm:$0xf0] }
 0x8cb   : > { %v1596_v55 = vpop.xlane.xlu1 %1595 }
 0x8dd   : > { %v1602_v53 = vpop.xlane.xlu2 %1601 }
 0x8de   : > { %3277 = vrcp.f32 %v1602_v53  ;;  %v3156_v53 = vld [vmem:[%s4294_s15 + $0xc4] sm:$0xf] }
 0x8df   : > { %3279 = vrcp.f32 %v1596_v55 }
 0x8e4   : > { %v3278_v56 = vpop.eup %3277 }
 0x8e5   : > { %v1610_v57 = vmul.f32 %v3278_v56, %v3272_v44  ;;  %v1599_v58 = vpop.xlane.xlu2 %1598  ;;  %v3280_v60 = vpop.eup %3279  ;;  %v2931_v44 = vor.u32 %v3163_v43, %v2930_v42  ;;  %v2908_v56 = vld [vmem:[%s4294_s15 + $0xd0] sm:$0xf0] }
 0x8e6   : > { %3281 = vrcp.f32 %v1599_v58  ;;  %v1608_v61 = vmul.f32 %v3280_v60, %v3270_v37  ;;  %v3159_v58 = vld [vmem:[%s4294_s15 + $0xd4] sm:$0xf0]  ;;  %v2844_v43 = vld [vmem:[%s4294_s15 + $0x50] sm:$0xf0] }
 0x8e7   : > { %v1670_v59 = vpack.c.bf16 %v1610_v57, %v1610_v57  ;;  %2041 = vmatpush.bf16.msra.mxu0 %v2931_v44  ;;  %v2914_v57 = vld [vmem:[%s4294_s15 + $0xc8] sm:$0xf]  ;;  %v3143_v44 = vld [vmem:[%s4294_s15 + $0x54] sm:$0xf0] }
 0x8e8   : > { %v1629_v3 = vpack.c.bf16 %v1608_v61, %v1608_v61  ;;  %v2915_v60 = vor.u32 %v3159_v58, %v2914_v57  ;;  %v3157_v61 = vld [vmem:[%s4294_s15 + $0xcc] sm:$0xf]  ;;  %v3139_v57 = vld [vmem:[%s4294_s15 + $0x34] sm:$0xf0] }
 0x8e9   : > { %2775 = vmatmul.msk.bf16.vlgmr.msrb.gmra.mxu0 %vm1566_vm15, %v1670_v59  ;;  %v2911_v59 = vor.u32 %v3156_v53, %v2908_v56  ;;  %v2834_v56 = vld [vmem:[%s4294_s15 + $0x28] sm:$0xf] }
 0x8eb   : > { %2042 = vmatpush.bf16.msra.mxu0 %v2915_v60  ;;  %v3137_v60 = vld [vmem:[%s4294_s15 + $0x2c] sm:$0xf] }
 0x8ec   : > { %v3282_v62 = vpop.eup %3281 }
 0x8ed   : > { %v1609_v63 = vmul.f32 %v3282_v62, %v3274_v48  ;;  %v1593_v1 = vpop.xlane.xlu1 %1592  ;;  %v1632_v2 = vpop.permute.xlu2 %1631  ;;  %v2916_v62 = vld [vmem:[%s4294_s15 + $0xd8] sm:$0xf0] }
 0x8ee   : > { %3283 = vrcp.f32 %v1593_v1  ;;  %1644 = vmatpush.bf16.msrb.mxu2 %v1632_v2  ;;  %v2890_v1 = vld [vmem:[%s4294_s15 + $0xa0] sm:$0xf]  ;;  %v3154_v2 = vld [vmem:[%s4294_s15 + $0xac] sm:$0xf0] }
 0x8ef   : > { %v1650_v54 = vpack.c.bf16 %v1609_v63, %v1609_v63  ;;  %v2919_v63 = vor.u32 %v3157_v61, %v2916_v62  ;;  %v2836_v61 = vld [vmem:[%s4294_s15 + $0x38] sm:$0xf0]  ;;  %v2810_v62 = vld [vmem:[%s4294_s15] sm:$0xf] }
 0x8f1   : > { %2773 = vmatmul.msk.bf16.vlgmr.msrb.gmra.mxu2 %vm1566_vm15, %v1629_v3  ;;  %2774 = vmatmul.msk.bf16.vlgmr.msra.gmra.mxu3 %vm1566_vm15, %v1650_v54  ;;  %v3152_v3 = vld [vmem:[%s4294_s15 + $0xa4] sm:$0xf]  ;;  %v2891_v54 = vor.u32 %v3154_v2, %v2890_v1  ;;  %v3134_v1 = vld [vmem:[%s4294_s15 + $0xc] sm:$0xf0] }
 0x8f2   : > { %2015 = vmatpush.bf16.msra.mxu2 %v2923_v41  ;;  %v3142_v41 = vld [vmem:[%s4294_s15 + $0x4c] sm:$0xf0]  ;;  %v3132_v2 = vld [vmem:[%s4294_s15 + $0x4] sm:$0xf] }
 0x8f4   : > { %v3284_v5 = vpop.eup %3283 }
 0x8f5   : > { %v1607_v6 = vmul.f32 %v3284_v5, %v3276_v51  ;;  %v2906_v51 = vld [vmem:[%s4294_s15 + $0xc0] sm:$0xf]  ;;  %v2892_v5 = vld [vmem:[%s4294_s15 + $0xb0] sm:$0xf0] }
 0x8f6   : > { %v2907_v55 = vor.u32 %v3158_v52, %v2906_v51  ;;  %v2895_v8 = vor.u32 %v3152_v3, %v2892_v5  ;;  %v3138_v51 = vld [vmem:[%s4294_s15 + $0x2c] sm:$0xf0]  ;;  %v3136_v52 = vld [vmem:[%s4294_s15 + $0x24] sm:$0xf]  ;;  %v2812_v3 = vld [vmem:[%s4294_s15 + $0x10] sm:$0xf0] }
 0x8f7   : > { %v1611_v7 = vpack.c.bf16 %v1607_v6, %v1607_v6  ;;  %v2898_v6 = vld [vmem:[%s4294_s15 + $0xa8] sm:$0xf]  ;;  %v2815_v5 = vor.u32 %v3132_v2, %v2812_v3 }
 0x8f8   : > { %2016 = vmatpush.bf16.msra.mxu2 %v2907_v55  ;;  %v2828_v55 = vld [vmem:[%s4294_s15 + $0x30] sm:$0xf0] }
 0x8f9   : > { %2772 = vmatmul.msk.bf16.vlgmr.msrb.gmra.mxu1 %vm1566_vm15, %v1611_v7  ;;  %v3155_v7 = vld [vmem:[%s4294_s15 + $0xb4] sm:$0xf0]  ;;  %v2831_v58 = vor.u32 %v3136_v52, %v2828_v55  ;;  %v3189_v52 = vld [vmem:[%s4296_s17 + $0xc8] sm:$0xff]  ;;  %v3174_v55 = vld [vmem:[%s4296_s17 + $0x50] sm:$0xff] }
 0x8fa   : > { %2054 = vmatpush.bf16.msrb.mxu1 %v2935_v47  ;;  %v3141_v47 = vld [vmem:[%s4294_s15 + $0x4c] sm:$0xf] }
 0x8fc   : > { %2017 = vmatpush.bf16.msra.mxu2 %v2891_v54  ;;  %v2811_v54 = vor.u32 %v3134_v1, %v2810_v62  ;;  %v3172_v62 = vld [vmem:[%s4296_s17 + $0x40] sm:$0xff] }
 0x8fe   : > { %2055 = vmatpush.bf16.msrb.mxu1 %v2919_v63  ;;  %v2839_v63 = vor.u32 %v3137_v60, %v2836_v61  ;;  %v1845_v60 = vld [vmem:[%s4295_s16] sm:$0xf] }
 0x8ff   : > { %v3164_v61 = vld [vmem:[%s4296_s17] sm:$0xff]  ;;  %v1850_v1 = vperm.slane %v1845_v60, 3 }
 0x966   : > { %v1686_v9 = vpop.f32.mrf.mxu0 }
 0x967   : > { %1699 = vrot.lane.b32.xlu1 %v1686_v9, %s3426_s30  ;;  %v2899_v9 = vor.u32 %v3155_v7, %v2898_v6  ;;  %v2818_v6 = vld [vmem:[%s4294_s15 + $0x8] sm:$0xf]  ;;  %v3135_v7 = vld [vmem:[%s4294_s15 + $0x14] sm:$0xf0] }
 0x969   : > { %2043 = vmatpush.bf16.msra.mxu0 %v2899_v9  ;;  %v2819_v9 = vor.u32 %v3135_v7, %v2818_v6  ;;  %v1847_v6 = vperm.slane %v1845_v60, 0  ;;  %v1848_v7 = vperm.slane %v1845_v60, 1 }
 0x96d   : > { %2044 = vmatpush.bf16.msra.mxu0 %v2883_v23 }
 0x96e   : > { %v1688_v10 = vpop.f32.mrf.mxu0 }
 0x96f   : > { %v3153_v10 = vld [vmem:[%s4294_s15 + $0xac] sm:$0xf] }
 0x974   : > { %v1646_v11 = vpop.f32.mrf.mxu2  ;;  %v1666_v12 = vpop.f32.mrf.mxu3 }
 0x975   : > { %1695 = vrot.lane.b32.xlu0 %v1666_v12, %s4313_s23  ;;  %1691 = vrot.lane.b32.xlu2 %v1646_v11, %s3424_s29  ;;  %v2900_v11 = vld [vmem:[%s4294_s15 + $0xb8] sm:$0xf0] }
 0x976   : > { %v1625_v13 = vpop.f32.mrf.mxu1  ;;  %v2903_v12 = vor.u32 %v3153_v10, %v2900_v11  ;;  %v2820_v10 = vld [vmem:[%s4294_s15 + $0x18] sm:$0xf0] }
 0x978   : > { %2056 = vmatpush.bf16.msrb.mxu1 %v2903_v12 }
 0x97c   : > { %v1648_v14 = vpop.f32.mrf.mxu2  ;;  %v1668_v15 = vpop.f32.mrf.mxu3 }
 0x97d   : > { %v3150_v14 = vld [vmem:[%s4294_s15 + $0x8c] sm:$0xf0]  ;;  %v3148_v15 = vld [vmem:[%s4294_s15 + $0x84] sm:$0xf] }
 0x97e   : > { %v1627_v17 = vpop.f32.mrf.mxu1  ;;  %v2879_v21 = vor.u32 %v3148_v15, %v2876_v18  ;;  %v3194_v18 = vld [vmem:[%s4296_s17 + $0xf0] sm:$0xff] }
 0x9cf   : > { %v1692_v26 = vpop.permute.xlu2 %1691 }
 0x9d0   : > { %v1702_v27 = vsel %vm907_vm4, %v1625_v13, %v1692_v26  ;;  %v2874_v13 = vld [vmem:[%s4294_s15 + $0x80] sm:$0xf]  ;;  %v2887_v26 = vor.u32 %v3149_v24, %v2884_v25 }
 0x9d1   : > { %v2875_v17 = vor.u32 %v3150_v14, %v2874_v13  ;;  %v3187_v13 = vld [vmem:[%s4296_s17 + $0xb8] sm:$0xff] }
 0x9d2   : > { %2057 = vmatpush.bf16.msrb.mxu1 %v2887_v26  ;;  %v3195_v14 = vld [vmem:[%s4296_s17 + $0xf8] sm:$0xff]  ;;  %v3295_v26 = vld [vmem:[%s4310_s3] sm:$0x7] }
 0x9d3   : > { %2018 = vmatpush.bf16.msra.mxu2 %v2875_v17  ;;  %v3186_v17 = vld [vmem:[%s4296_s17 + $0xb0] sm:$0xff] }
 0x9d9   : > { %v1700_v29 = vpop.permute.xlu1 %1699 }
 0x9e7   : > { %v1696_v28 = vpop.permute.xlu0 %1695 }
 0x9e8   : > { %v1703_v22 = vsel %vm1145_vm10, %v1702_v27, %v1696_v28  ;;  %v2858_v27 = vld [vmem:[%s4294_s15 + $0x60] sm:$0xf]  ;;  %v3146_v28 = vld [vmem:[%s4294_s15 + $0x6c] sm:$0xf0] }
 0x9e9   : > { %v1704_v30 = vsel %vm1147_vm11, %v1703_v22, %v1700_v29  ;;  %v3144_v29 = vld [vmem:[%s4294_s15 + $0x64] sm:$0xf]  ;;  %v2859_v22 = vor.u32 %v3146_v28, %v2858_v27  ;;  %v1808_v27 = vperm.slane %v3295_v26, 2 }
 0x9ea   : > { %v1705_v32 = vpack.c.bf16 %v1704_v30, %v1704_v30  ;;  %v2860_v30 = vld [vmem:[%s4294_s15 + $0x70] sm:$0xf0] }
 0x9eb   : > { %2019 = vmatpush.bf16.msra.mxu2 %v2859_v22  ;;  %v3296_v22 = vld [vmem:[%s4283_s4] sm:$0x7] }
 0x9ec   : > { %1782 = vmatmul.bf16.vlgmr.msra.gmra.mxu1 %v1705_v32  ;;  %v2866_v32 = vld [vmem:[%s4294_s15 + $0x68] sm:$0xf] }
 0xa69   : > { %v1783_v35 = vpop.f32.mrf.mxu1 }
 0xa6a   : > { %v1784_v36 = vadd.f32 %v3245_v34, %v1783_v35  ;;  %v3147_v34 = vld [vmem:[%s4294_s15 + $0x74] sm:$0xf0]  ;;  %v2863_v35 = vor.u32 %v3144_v29, %v2860_v30  ;;  %v1810_v30 = vperm.slane %v3296_v22, 2 }
 0xa6c   : > { %v3960_v37 = vadd.f32 %v1784_v36, %v3799_v38  ;;  %v2924_v38 = vld [vmem:[%s4294_s15 + $0xf0] sm:$0xf0]  ;;  %v2867_v36 = vor.u32 %v3147_v34, %v2866_v32 }
 0xa6d   : > { %v2927_v0 = vor.u32 %v3160_v33, %v2924_v38  ;;  %v2842_v33 = vld [vmem:[%s4294_s15 + $0x40] sm:$0xf]  ;;  %v3140_v38 = vld [vmem:[%s4294_s15 + $0x44] sm:$0xf] }
 0xa6e   : > { %1788 = vadd.xlane.f32.xlu2 %v3960_v37  ;;  %2045 = vmatpush.bf16.msra.mxu0 %v2867_v36  ;;  %v2843_v42 = vor.u32 %v3142_v41, %v2842_v33  ;;  %v2847_v45 = vor.u32 %v3140_v38, %v2844_v43  ;;  %v3171_v36 = vld [vmem:[%s4296_s17 + $0x38] sm:$0xff]  ;;  %v3178_v33 = vld [vmem:[%s4296_s17 + $0x70] sm:$0xff]  ;;  %v3184_v41 = vld [vmem:[%s4296_s17 + $0xa0] sm:$0xff] }
 0xa6f   : > { %2028 = vmatpush.bf16.msrb.mxu3 %v2927_v0  ;;  %v2850_v0 = vld [vmem:[%s4294_s15 + $0x48] sm:$0xf]  ;;  %v3192_v38 = vld [vmem:[%s4296_s17 + $0xe0] sm:$0xff] }
 0xa70   : > { %v2851_v46 = vor.u32 %v3143_v44, %v2850_v0  ;;  %2020 = vmatpush.bf16.msra.mxu2 %v2843_v42  ;;  %v3169_v42 = vld [vmem:[%s4296_s17 + $0x28] sm:$0xff]  ;;  %v3183_v0 = vld [vmem:[%s4296_s17 + $0x98] sm:$0xff] }
 0xa71   : > { %v1785_v39 = vpop.f32.mrf.mxu1  ;;  %v3177_v43 = vld [vmem:[%s4296_s17 + $0x68] sm:$0xff]  ;;  %v3191_v44 = vld [vmem:[%s4296_s17 + $0xd8] sm:$0xff] }
 0xa72   : > { %v3145_v39 = vld [vmem:[%s4294_s15 + $0x6c] sm:$0xf]  ;;  %2046 = vmatpush.bf16.msra.mxu0 %v2851_v46  ;;  %v3176_v46 = vld [vmem:[%s4296_s17 + $0x60] sm:$0xff] }
 0xa73   : > { %2029 = vmatpush.bf16.msrb.mxu3 %v2911_v59  ;;  %v2871_v31 = vor.u32 %v3145_v39, %v2868_v40  ;;  %v2835_v59 = vor.u32 %v3139_v57, %v2834_v56  ;;  %v3185_v39 = vld [vmem:[%s4296_s17 + $0xa8] sm:$0xff]  ;;  %v3180_v56 = vld [vmem:[%s4296_s17 + $0x80] sm:$0xff] }
 0xa74   : > { %v3193_v40 = vld [vmem:[%s4296_s17 + $0xe8] sm:$0xff]  ;;  %v3188_v57 = vld [vmem:[%s4296_s17 + $0xc0] sm:$0xff] }
 0xa75   : > { %2058 = vmatpush.bf16.msrb.mxu1 %v2871_v31  ;;  %v3170_v31 = vld [vmem:[%s4296_s17 + $0x30] sm:$0xff] }
 0xa76   : > { %2047 = vmatpush.bf16.msra.mxu0 %v2835_v59  ;;  %v3173_v59 = vld [vmem:[%s4296_s17 + $0x48] sm:$0xff] }
 0xa77   : > { %2030 = vmatpush.bf16.msrb.mxu3 %v2895_v8  ;;  %v3133_v8 = vld [vmem:[%s4294_s15 + $0xc] sm:$0xf] }
 0xa78   : > { %v2823_v11 = vor.u32 %v3133_v8, %v2820_v10 }
 0xa7a   : > { %2048 = vmatpush.bf16.msra.mxu0 %v2819_v9 }
 0xa7b   : > { %2031 = vmatpush.bf16.msrb.mxu3 %v2879_v21 }
 0xa7e   : > { %2393 = vmatpush.bf16.msrb.mxu0 %v3187_v13 }
 0xa7f   : > { %2032 = vmatpush.bf16.msrb.mxu3 %v2863_v35 }
 0xa82   : > { %2394 = vmatpush.bf16.msrb.mxu0 %v3186_v17 }
 0xa83   : > { %2033 = vmatpush.bf16.msrb.mxu3 %v2847_v45  ;;  %v3168_v45 = vld [vmem:[%s4296_s17 + $0x20] sm:$0xff] }
 0xa86   : > { %2395 = vmatpush.bf16.msrb.mxu0 %v3185_v39 }
 0xa87   : > { %2034 = vmatpush.bf16.msrb.mxu3 %v2831_v58  ;;  %v3165_v58 = vld [vmem:[%s4296_s17 + $0x8] sm:$0xff] }
 0xa8a   : > { %2396 = vmatpush.bf16.msrb.mxu0 %v3184_v41 }
 0xa8b   : > { %2035 = vmatpush.bf16.msrb.mxu3 %v2815_v5 }
 0xa8e   : > { %2397 = vmatpush.bf16.msrb.mxu0 %v3183_v0 }
 0xae1   : > { %v1789_v19 = vpop.xlane.xlu2 %1788 }
 0xae2   : > { %v1790_v48 = vmul.f32 %v1789_v19, %v3598_v16  ;;  %v2852_v19 = vld [vmem:[%s4294_s15 + $0x58] sm:$0xf0] }
 0xae4   : > { %v3989_v49 = vsub.f32 %v3960_v37, %v1790_v48  ;;  %v2855_v48 = vor.u32 %v3141_v47, %v2852_v19  ;;  %v3182_v47 = vld [vmem:[%s4296_s17 + $0x90] sm:$0xff] }
 0xae5   : > { %v3190_v19 = vld [vmem:[%s4296_s17 + $0xd0] sm:$0xff]  ;;  %2398 = vmatpush.bf16.msrb.mxu0 %v3182_v47 }
 0xae6   : > { %v1792_v50 = vmul.f32 %v3989_v49, %v3989_v49  ;;  %2059 = vmatpush.bf16.msrb.mxu1 %v2855_v48  ;;  %v3167_v48 = vld [vmem:[%s4296_s17 + $0x18] sm:$0xff] }
 0xae8   : > { %1793 = vadd.xlane.f32.xlu0 %v1792_v50  ;;  %v2826_v50 = vld [vmem:[%s4294_s15 + $0x20] sm:$0xf] }
 0xae9   : > { %v2827_v53 = vor.u32 %v3138_v51, %v2826_v50  ;;  %v3175_v50 = vld [vmem:[%s4296_s17 + $0x58] sm:$0xff]  ;;  %v3181_v51 = vld [vmem:[%s4296_s17 + $0x88] sm:$0xff] }
 0xaea   : > { %2060 = vmatpush.bf16.msrb.mxu1 %v2839_v63  ;;  %2399 = vmatpush.bf16.msrb.mxu0 %v3181_v51  ;;  %v1849_v63 = vperm.slane %v1845_v60, 2 }
 0xaeb   : > { %2021 = vmatpush.bf16.msra.mxu2 %v2827_v53  ;;  %v3166_v53 = vld [vmem:[%s4296_s17 + $0x10] sm:$0xff] }
 0xaee   : > { %2061 = vmatpush.bf16.msrb.mxu1 %v2823_v11  ;;  %2400 = vmatpush.bf16.msrb.mxu0 %v3180_v56 }
 0xaef   : > { %2022 = vmatpush.bf16.msra.mxu2 %v2811_v54 }
 0xaf2   : > { %2406 = vmatpush.bf16.msra.mxu1 %v3195_v14 }
 0xaf3   : > { %2367 = vmatpush.bf16.msrb.mxu2 %v3171_v36 }
 0xaf6   : > { %2407 = vmatpush.bf16.msra.mxu1 %v3194_v18 }
 0xaf7   : > { %2368 = vmatpush.bf16.msrb.mxu2 %v3170_v31 }
 0xafa   : > { %2408 = vmatpush.bf16.msra.mxu1 %v3193_v40 }
 0xafb   : > { %2369 = vmatpush.bf16.msrb.mxu2 %v3169_v42 }
 0xafe   : > { %2409 = vmatpush.bf16.msra.mxu1 %v3192_v38 }
 0xaff   : > { %2370 = vmatpush.bf16.msrb.mxu2 %v3168_v45 }
 0xb02   : > { %2410 = vmatpush.bf16.msra.mxu1 %v3191_v44 }
 0xb03   : > { %2371 = vmatpush.bf16.msrb.mxu2 %v3167_v48 }
 0xb06   : > { %2411 = vmatpush.bf16.msra.mxu1 %v3190_v19 }
 0xb07   : > { %2372 = vmatpush.bf16.msrb.mxu2 %v3166_v53 }
 0xb0a   : > { %2412 = vmatpush.bf16.msra.mxu1 %v3189_v52 }
 0xb0b   : > { %2373 = vmatpush.bf16.msrb.mxu2 %v3165_v58 }
 0xb0e   : > { %2413 = vmatpush.bf16.msra.mxu1 %v3188_v57 }
 0xb0f   : > { %2374 = vmatpush.bf16.msrb.mxu2 %v3164_v61 }
 0xb5b   : > { %v1794_v12 = vpop.xlane.xlu0 %1793 }
 0xb5c   : > { %v1795_v15 = vmul.f32 %v1794_v12, %v3598_v16 }
 0xb5e   : > { %v1796_v4 = vadd.f32 1e-05, %v1795_v15 }
 0xb60   : > { %3285 = vrsqrt.f32 %v1796_v4  ;;  %vm1803_vm1 = vweird.f32 %v1796_v4 }
 0xb66   : > { %v3286_v20 = vpop.eup %3285 }
 0xb67   : > { %v1798_v21 = vmul.f32 %v3286_v20, %v1796_v4  ;;  %vm1804_vm0 = vweird.f32 %v3286_v20 }
 0xb68   : > { %vm1805_vm2 = vmor %vm1803_vm1, %vm1804_vm0 }
 0xb69   : > { %v1799_v23 = vmul.f32 %v3286_v20, %v1798_v21 }
 0xb6b   : > { %v1800_v24 = vmul.f32 0.5, %v1799_v23 }
 0xb6d   : > { %v1801_v25 = vsub.f32 1.5, %v1800_v24 }
 0xb6f   : > { %v1802_v16 = vmul.f32 %v3286_v20, %v1801_v25 }
 0xb71   : > { %v1806_v28 = vsel %vm1805_vm2, %v3286_v20, %v1802_v16 }
 0xb72   : > { %v1807_v29 = vmul.f32 %v1806_v28, %v3989_v49  ;;  %v3179_v49 = vld [vmem:[%s4296_s17 + $0x78] sm:$0xff] }
 0xb73   : > { %2380 = vmatpush.bf16.msra.mxu3 %v3179_v49 }
 0xb74   : > { %v1809_v32 = vmul.f32 %v1808_v27, %v1807_v29 }
 0xb76   : > { %v1811_v34 = vadd.f32 %v1810_v30, %v1809_v32 }
 0xb77   : > { %2381 = vmatpush.bf16.msra.mxu3 %v3178_v33 }
 0xb78   : > { %v1812_v35 = vpack.c.bf16 %v1811_v34, %v1811_v34 }
 0xb7a   : > { %2023 = vmatmul.bf16.vlgmr.msra.gmra.mxu2 %v1812_v35  ;;  %2036 = vmatmul.bf16.vlgmr.msrb.gmra.mxu3 %v1812_v35 }
 0xb7b   : > { %2049 = vmatmul.bf16.vlgmr.msra.gmra.mxu0 %v1812_v35  ;;  %2062 = vmatmul.bf16.vlgmr.msrb.gmra.mxu1 %v1812_v35 }
 0xb7c   : > { %2382 = vmatpush.bf16.msra.mxu3 %v3177_v43 }
 0xb80   : > { %2383 = vmatpush.bf16.msra.mxu3 %v3176_v46 }
 0xb84   : > { %2384 = vmatpush.bf16.msra.mxu3 %v3175_v50 }
 0xb88   : > { %2385 = vmatpush.bf16.msra.mxu3 %v3174_v55 }
 0xb8c   : > { %2386 = vmatpush.bf16.msra.mxu3 %v3173_v59  ;;  %v3246_v59 = vld [vmem:[%s4297_s18] ss:$0 sm:$0xff] }
 0xb90   : > { %2387 = vmatpush.bf16.msra.mxu3 %v3172_v62 }
 0xbf8   : > { %v2050_v2 = vpop.f32.mrf.mxu0  ;;  %v2063_v3 = vpop.f32.mrf.mxu1 }
 0xbf9   : > { %v2051_v54 = vadd.f32 %v2050_v2, %v1849_v63  ;;  %v2064_v5 = vadd.f32 %v2063_v3, %v1850_v1 }
 0xbfb   : > { %v2073_v8 = vmul.f32 %v2051_v54, %v2051_v54  ;;  %v2074_v9 = vmul.f32 %v2064_v5, %v2064_v5  ;;  %v2069_v31 = vmul.f32 0.5, %v2051_v54  ;;  %v2070_v41 = vmul.f32 0.5, %v2064_v5 }
 0xbfd   : > { %v2077_v10 = vmul.f32 %v2073_v8, %v2051_v54  ;;  %v2078_v11 = vmul.f32 %v2074_v9, %v2064_v5  ;;  %v2024_v12 = vpop.f32.mrf.mxu2  ;;  %v2037_v13 = vpop.f32.mrf.mxu3 }
 0xbfe   : > { %v2025_v14 = vadd.f32 %v2024_v12, %v1847_v6  ;;  %v2038_v15 = vadd.f32 %v2037_v13, %v1848_v7 }
 0xbff   : > { %v2081_v17 = vmul.f32 0.044715, %v2077_v10  ;;  %v2082_v18 = vmul.f32 0.044715, %v2078_v11 }
 0xc00   : > { %v2071_v4 = vmul.f32 %v2025_v14, %v2025_v14  ;;  %v2072_v20 = vmul.f32 %v2038_v15, %v2038_v15  ;;  %v2052_v21 = vpop.f32.mrf.mxu0  ;;  %v2065_v23 = vpop.f32.mrf.mxu1  ;;  %v2067_v46 = vmul.f32 0.5, %v2025_v14  ;;  %v2068_v48 = vmul.f32 0.5, %v2038_v15 }
 0xc01   : > { %v2085_v24 = vadd.f32 %v2081_v17, %v2051_v54  ;;  %v2086_v25 = vadd.f32 %v2082_v18, %v2064_v5 }
 0xc02   : > { %v2075_v16 = vmul.f32 %v2071_v4, %v2025_v14  ;;  %v2076_v26 = vmul.f32 %v2072_v20, %v2038_v15 }
 0xc03   : > { %v2089_v27 = vmul.f32 0.7978846, %v2085_v24  ;;  %v2090_v28 = vmul.f32 0.7978846, %v2086_v25 }
 0xc04   : > { %v2079_v29 = vmul.f32 0.044715, %v2075_v16  ;;  %v2080_v22 = vmul.f32 0.044715, %v2076_v26 }
 0xc05   : > { %3287 = vtanh.f32 %v2089_v27  ;;  %v2026_v30 = vpop.f32.mrf.mxu2  ;;  %v2039_v32 = vpop.f32.mrf.mxu3 }
 0xc06   : > { %3289 = vtanh.f32 %v2090_v28  ;;  %v2083_v34 = vadd.f32 %v2079_v29, %v2025_v14  ;;  %v2084_v35 = vadd.f32 %v2080_v22, %v2038_v15 }
 0xc08   : > { %v2087_v36 = vmul.f32 0.7978846, %v2083_v34  ;;  %v2088_v49 = vmul.f32 0.7978846, %v2084_v35 }
 0xc0a   : > { %3291 = vtanh.f32 %v2087_v36 }
 0xc0b   : > { %v3288_v39 = vpop.eup %3287  ;;  %3293 = vtanh.f32 %v2088_v49 }
 0xc0c   : > { %v3290_v40 = vpop.eup %3289  ;;  %v2097_v33 = vadd.f32 1.0, %v3288_v39 }
 0xc0d   : > { %v2098_v38 = vadd.f32 1.0, %v3290_v40 }
 0xc0e   : > { %v2101_v42 = vmul.f32 %v2097_v33, %v2069_v31 }
 0xc0f   : > { %v2102_v43 = vmul.f32 %v2098_v38, %v2070_v41 }
 0xc10   : > { %v3292_v0 = vpop.eup %3291  ;;  %v2105_v44 = vpack.c.bf16 %v2101_v42, %v2101_v42 }
 0xc11   : > { %v3294_v45 = vpop.eup %3293  ;;  %v2106_v47 = vpack.c.bf16 %v2102_v43, %v2102_v43  ;;  %v2095_v19 = vadd.f32 1.0, %v3292_v0 }
 0xc12   : > { %2401 = vmatmul.bf16.vlgmr.msrb.gmra.mxu0 %v2105_v44  ;;  %v2096_v50 = vadd.f32 1.0, %v3294_v45 }
 0xc13   : > { %2414 = vmatmul.bf16.vlgmr.msra.gmra.mxu1 %v2106_v47  ;;  %v2099_v51 = vmul.f32 %v2095_v19, %v2067_v46 }
 0xc14   : > { %v2100_v52 = vmul.f32 %v2096_v50, %v2068_v48 }
 0xc15   : > { %v2103_v53 = vpack.c.bf16 %v2099_v51, %v2099_v51 }
 0xc16   : > { %v2104_v55 = vpack.c.bf16 %v2100_v52, %v2100_v52 }
 0xc17   : > { %2375 = vmatmul.bf16.vlgmr.msrb.gmra.mxu2 %v2103_v53 }
 0xc18   : > { %2388 = vmatmul.bf16.vlgmr.msra.gmra.mxu3 %v2104_v55 }
 0xc8f   : > { %v2402_v56 = vpop.f32.mrf.mxu0 }
 0xc90   : > { %v2415_v57 = vpop.f32.mrf.mxu1 }
 0xc97   : > { %v2404_v58 = vpop.f32.mrf.mxu0 }
 0xc98   : > { %v2417_v60 = vpop.f32.mrf.mxu1 }
 0xc9a   : > { %v2376_v61 = vpop.f32.mrf.mxu2 }
 0xc9b   : > { %v2377_v62 = vadd.f32 %v3246_v59, %v2376_v61  ;;  %v2389_v63 = vpop.f32.mrf.mxu3 }
 0xc9d   : > { %v2390_v1 = vadd.f32 %v2389_v63, %v2377_v62 }
 0xc9f   : > { %v2403_v2 = vadd.f32 %v2402_v56, %v2390_v1 }
 0xca1   : > { %v2416_v3 = vadd.f32 %v2415_v57, %v2403_v2 }
 0xca2   : > { %v2378_v54 = vpop.f32.mrf.mxu2 }
 0xca3   : > { %v2419_v5 = vadd.f32 %v2416_v3, %v3960_v37  ;;  %v2391_v6 = vpop.f32.mrf.mxu3 }
 0xca5   : > { %2420 = vst [vmem:[%s649_s22] sm:$0xff] %v2419_v5 }
 0xca6 PF: > { %s39_s1 = sadd.s32 1, %s3415_s1  }
 0xca7   : > { %p36_p7 = scmp.ge.s32.totalorder %s39_s1, 4  }
 0xca9   :  { %38 = sbr.rel (!%p36_p7) target bundleno = 19 (0x13), region = 138 }
 0xcae   :  { %2440 = vsyncpa [#allocation5], 1 }
 0xcaf   :  { %2442 = vsyncpa [#allocation5 + $0x1], 1 }
 0xcb0   :  { %2443 = vsyncpa [#allocation7], 1 }

// kernel: _forward_core.6
= control target key start
LH: loop header
LB: loop body
LE: loop exit
PB: predicated region body
PF: predicated region fallthrough
CT: control target
= control target key end

     0   :  { %s3492_s21 = smov [#allocation3]   ;;  %s4232_s0 = inlined_call_operand.vmem [shape: s32[2], index: 0, kind: input, shape index: {}]   ;;  %s4233_s1 = inlined_call_operand.vmem [shape: f32[2,8,128], index: 1, kind: input, shape index: {}]   ;;  %s4234_s2 = inlined_call_operand.vmem [shape: bf16[2,16,128], index: 2, kind: input, shape index: {}]   ;;  %s4235_s3 = inlined_call_operand.vmem [shape: f32[3,128], index: 3, kind: input, shape index: {}]   ;;  %s4236_s4 = inlined_call_operand.vmem [shape: f32[3,128], index: 4, kind: input, shape index: {}]   ;;  %s4237_s5 = inlined_call_operand.hbm [shape: bf16[128,384], index: 5, kind: input, shape index: {}]   ;;  %s4238_s6 = inlined_call_operand.vmem [shape: f32[1,384], index: 6, kind: input, shape index: {}]   ;;  %s4239_s7 = inlined_call_operand.hbm [shape: bf16[128,128], index: 7, kind: input, shape index: {}]   ;;  %s4240_s8 = inlined_call_operand.vmem [shape: f32[1,128], index: 8, kind: input, shape index: {}]   ;;  %s4241_s9 = inlined_call_operand.hbm [shape: bf16[128,128], index: 9, kind: input, shape index: {}]   ;;  %s4242_s10 = inlined_call_operand.vmem [shape: f32[1,128], index: 10, kind: input, shape index: {}]   ;;  %s4243_s11 = inlined_call_operand.vmem [shape: bf16[128,256], index: 11, kind: input, shape index: {}]   ;;  %s4244_s12 = inlined_call_operand.vmem [shape: f32[1,256], index: 12, kind: input, shape index: {}]   ;;  %s4245_s13 = inlined_call_operand.hbm [shape: bf16[128,128], index: 13, kind: input, shape index: {}]   ;;  %s4246_s14 = inlined_call_operand.vmem [shape: f32[1,128], index: 14, kind: input, shape index: {}]   ;;  %s4247_s15 = inlined_call_operand.vmem [shape: bf16[128,512], index: 15, kind: input, shape index: {}]   ;;  %s4248_s16 = inlined_call_operand.vmem [shape: f32[1,512], index: 16, kind: input, shape index: {}]   ;;  %s4249_s17 = inlined_call_operand.vmem [shape: bf16[512,128], index: 17, kind: input, shape index: {}]   ;;  %s4250_s18 = inlined_call_operand.vmem [shape: f32[1,128], index: 18, kind: input, shape index: {}]   ;;  %s4251_s19 = inlined_call_operand.vmem [shape: f32[2,8,128], index: 19, kind: output, shape index: {}]  }
   0x1   :  { %4254 = sst [smem:[#allocation16_spill]] %s4232_s0 }
   0x2   :  { %4255 = sst [smem:[#allocation17_spill]] %s4233_s1 }
   0x3   :  { %4256 = sst [smem:[#allocation18_spill]] %s4234_s2 }
   0x4   :  { %4257 = sst [smem:[#allocation19_spill]] %s4235_s3 }
   0x5   :  { %4258 = sst [smem:[#allocation20_spill]] %s4237_s5 }
   0x6   :  { %4259 = sst [smem:[#allocation21_spill]] %s4239_s7 }
   0x7   :  { %4260 = sst [smem:[#allocation22_spill]] %s4242_s10 }
   0x8   :  { %4261 = sst [smem:[#allocation23_spill]] %s4251_s19 }
   0x9   :  { %s4262_s20 = sld [smem:[#allocation16_spill]] }
   0xf   :  { %s25_s10 = sshll.u32 %s4262_s20, 4  ;;  %s26_s10 = int_to_ptr.vmem [resolvable:$true] %s25_s10 }
  0x10   :  { %28 = dma.vmem_to_smem %s26_s10, 16, %s3492_s21, [#allocation2] }
  0x11   :  { %3474 = dma.done.wait [#allocation2], 16 }
  0x12   :  { %3475 = vsyncadd [#allocation2], 4294967280 }
  0x13   :  { %31 = sfence }
  0x14   :  { %32 = vsyncpa [#allocation5], 0 }
  0x15   :  { %33 = vsyncpa [#allocation7], 0 }
  0x16   :  { %34 = vsyncpa [#allocation10], 0  ;;  %s3609_s1 = smov 0  }
  0x17 LB: > { %4263 = sst [smem:[#allocation15_spill]] %s3490_s1  ;;  %s3618_s23 = sadd.s32 4294967295, %s3490_s1   ;;  %s3490_s1 = sphi %s3609_s1, %s40_s1  }
  0x18   : > { %s4264_s7 = sld [smem:[#allocation21_spill]]  ;;  %p2546_p0 = scmp.ge.s32.totalorder %s3490_s1, 1 }
  0x19   : > { %p459_p1 = scmp.lt.s32.totalorder %s3490_s1, 3  ;;  %p3254_p2 = scmp.eq.s32.totalorder %s3618_s23, 0 }
  0x1a   : > { %s3493_s25 = smov [#allocation6]   ;;  %s4266_s5 = sld [smem:[#allocation20_spill]] }
  0x1b   : > { %p3623_p3 = pnand %p2546_p0, %p459_p1  ;;  %s495_s3 = sshll.u32 %s3493_s25, 4  ;;  %s496_s3 = int_to_ptr.vmem [resolvable:$true] %s495_s3 }
  0x1c   : > { %s3494_s0 = smov [#allocation4]   ;;  %s3495_s20 = smov 64  }
  0x1d   : > { %p3241_p4 = pneg %p3623_p3  ;;  %s478_s30 = sshll.u32 %s3494_s0, 4  ;;  %s479_s30 = int_to_ptr.vmem [resolvable:$true] %s478_s30 }
  0x1e   : > { %s493_s10 = sshll.u32 %s4264_s7, 4  ;;  %s3496_s21 = smov 4   ;;  %s494_s10 = int_to_ptr.hbm [resolvable:$true] %s493_s10 }
  0x1f   : > { %p3634_p5 = pnand %p3254_p2, %p3241_p4  ;;  %s510_s25 = sshll.u32 %s4241_s9, 4  ;;  %s511_s25 = int_to_ptr.hbm [resolvable:$true] %s510_s25 }
  0x20   : > { %s476_s28 = sshll.u32 %s4266_s5, 4  ;;  %s3497_s26 = smov 192   ;;  %s477_s28 = int_to_ptr.hbm [resolvable:$true] %s476_s28 }
  0x21   : > { %3247 = dma.hbm_to_vmem [thread:$0]  (!%p3634_p5), %s494_s10, 1024, %s496_s3, [#allocation7], %s3495_s20, %s3495_s20, %s3496_s21  }
  0x22   : > { %s3498_s27 = smov 12   ;;  %s3499_s5 = smov [#allocation8]  }
  0x23   : > { %3244 = dma.hbm_to_vmem [thread:$0]  (!%p3634_p5), %s477_s28, 3072, %s479_s30, [#allocation5], %s3497_s26, %s3497_s26, %s3498_s27  }
  0x24   : > { %s512_s7 = sshll.u32 %s3499_s5, 4  ;;  %s533_s0 = sshll.u32 %s4245_s13, 4  ;;  %s513_s7 = int_to_ptr.vmem [resolvable:$true] %s512_s7  ;;  %s534_s0 = int_to_ptr.hbm [resolvable:$true] %s533_s0 }
  0x25   : > { %3250 = dma.hbm_to_vmem [thread:$0]  (!%p3634_p5), %s511_s25, 1024, %s513_s7, [#allocation7], %s3495_s20, %s3495_s20, %s3496_s21  }
  0x26   : > { %s3500_s10 = smov [#allocation9]   ;;  %581 = sbr.rel (%p3623_p3) target bundleno = 3251 (0xcb3), region = 92 }
  0x27   : > { %s535_s3 = sshll.u32 %s3500_s10, 4  ;;  %s536_s3 = int_to_ptr.vmem [resolvable:$true] %s535_s3 }
  0x28   : > { %3253 = dma.hbm_to_vmem [thread:$0]  (!%p3634_p5), %s534_s0, 1024, %s536_s3, [#allocation10], %s3495_s20, %s3495_s20, %s3496_s21  }
  0x2b   : > { %3477 = dma.done.wait (%p3254_p2), [#allocation5], 3072  }
  0x2c   : > { %3479 = vsyncadd (%p3254_p2), [#allocation5], 4294964224 }
  0x2d   : > { %3481 = dma.done.wait (%p3254_p2), [#allocation7], 2048  }
  0x2e   : > { %3483 = vsyncadd (%p3254_p2), [#allocation7], 4294965248 }
  0x2f   : > { %3485 = dma.done.wait (%p3254_p2), [#allocation10], 1024  }
  0x30   : > { %3487 = vsyncadd (%p3254_p2), [#allocation10], 4294966272  ;;  %p654_p6 = scmp.lt.s32.totalorder %s3618_s23, 1  ;;  %s4268_s24 = sld [smem:[#allocation17_spill]]  ;;  %v3501_v1 = vmov 128.0   ;;  %vm924_vm4 = vcmask 261120  }
  0x31   : > { %3288 = vrcp.f32 %v3501_v1  ;;  %v2647_v2 = vld [vmem:[#allocation4 + $0xa8] sm:$0xf]  ;;  %v3119_v3 = vld [vmem:[#allocation4 + $0xb0] sm:$0xf0]  ;;  %v3118_v4 = vld [vmem:[#allocation4 + $0xac] sm:$0xf] }
  0x32   : > { %s655_s5 = scalar_select %p654_p6, %s3618_s23, 1  ;;  %v2648_v5 = vor.u32 %v3119_v3, %v2647_v2  ;;  %v2649_v6 = vld [vmem:[#allocation4 + $0xb4] sm:$0xf0]  ;;  %v2655_v7 = vld [vmem:[#allocation4 + $0xb0] sm:$0xf]  ;;  %vm1065_vm5 = vcmask 1043456  }
  0x33   : > { %v3120_v8 = vld [vmem:[#allocation4 + $0xb8] sm:$0xf0]  ;;  %v2652_v9 = vor.u32 %v3118_v4, %v2649_v6  ;;  %v2635_v21 = vld [vmem:[#allocation4 + $0x90] sm:$0xf]  ;;  %v3115_v23 = vld [vmem:[#allocation4 + $0x94] sm:$0xf] }
  0x34   : > { %s3668_s7 = sshll.u32 %s655_s5, 3  ;;  %v2656_v10 = vor.u32 %v3120_v8, %v2655_v7  ;;  %883 = vmatpush.bf16.msra.mxu0 %v2648_v5  ;;  %v3116_v22 = vld [vmem:[#allocation4 + $0x98] sm:$0xf0]  ;;  %v2637_v25 = vld [vmem:[#allocation4 + $0x9c] sm:$0xf0]  ;;  %s4269_s20 = sld [smem:[#allocation19_spill]] }
  0x35   : > { %896 = vmatpush.bf16.msra.mxu1 %v2652_v9  ;;  %v2636_v24 = vor.u32 %v3116_v22, %v2635_v21  ;;  %v2643_v26 = vld [vmem:[#allocation4 + $0x98] sm:$0xf]  ;;  %v3117_v27 = vld [vmem:[#allocation4 + $0xa0] sm:$0xf0]  ;;  %v2640_v28 = vor.u32 %v3115_v23, %v2637_v25  ;;  %v3112_v32 = vld [vmem:[#allocation4 + $0x7c] sm:$0xf] }
  0x36   : > { %s657_s28 = scalar_lea.vmem %s4268_s24, %s3668_s7  ;;  %909 = vmatpush.bf16.msra.mxu2 %v2656_v10  ;;  %v2644_v29 = vor.u32 %v3117_v27, %v2643_v26  ;;  %v2623_v30 = vld [vmem:[#allocation4 + $0x78] sm:$0xf]  ;;  %v3113_v31 = vld [vmem:[#allocation4 + $0x80] sm:$0xf0]  ;;  %v2625_v34 = vld [vmem:[#allocation4 + $0x84] sm:$0xf0] }
  0x37   : > { %v3674_v0 = vld [vmem:[%s657_s28] sm:$0xff]  ;;  %v3289_v11 = vpop.eup %3288  ;;  %v2624_v33 = vor.u32 %v3113_v31, %v2623_v30  ;;  %v3114_v36 = vld [vmem:[#allocation4 + $0x88] sm:$0xf0]  ;;  %v2628_v37 = vor.u32 %v3112_v32, %v2625_v34  ;;  %v2613_v43 = vld [vmem:[#allocation4 + $0x6c] sm:$0xf0]  ;;  %s3502_s26 = smov 32  }
  0x38   : > { %683 = vadd.xlane.f32.xlu0 %v3674_v0  ;;  %v686_v12 = vmul.f32 128.0, %v3289_v11  ;;  %vm690_vm0 = vweird.f32 %v3289_v11  ;;  %884 = vmatpush.bf16.msra.mxu0 %v2636_v24  ;;  %v2631_v35 = vld [vmem:[#allocation4 + $0x80] sm:$0xf]  ;;  %v3110_v40 = vld [vmem:[#allocation4 + $0x68] sm:$0xf0]  ;;  %s3503_s27 = smov 64  }
  0x39   : > { %897 = vmatpush.bf16.msra.mxu1 %v2640_v28  ;;  %v2632_v38 = vor.u32 %v3114_v36, %v2631_v35  ;;  %v2611_v39 = vld [vmem:[#allocation4 + $0x60] sm:$0xf]  ;;  %v3109_v41 = vld [vmem:[#allocation4 + $0x64] sm:$0xf]  ;;  %v2619_v44 = vld [vmem:[#allocation4 + $0x68] sm:$0xf] }
  0x3a   : > { %v687_v13 = vsub.f32 1.0, %v686_v12  ;;  %910 = vmatpush.bf16.msra.mxu2 %v2644_v29  ;;  %v2612_v42 = vor.u32 %v3110_v40, %v2611_v39  ;;  %v3111_v45 = vld [vmem:[#allocation4 + $0x70] sm:$0xf0]  ;;  %v2616_v46 = vor.u32 %v3109_v41, %v2613_v43  ;;  %v2599_v48 = vld [vmem:[#allocation4 + $0x48] sm:$0xf]  ;;  %s3504_s0 = smov 96  }
  0x3b   : > { %v2620_v47 = vor.u32 %v3111_v45, %v2619_v44  ;;  %v3107_v49 = vld [vmem:[#allocation4 + $0x50] sm:$0xf0]  ;;  %v3106_v50 = vld [vmem:[#allocation4 + $0x4c] sm:$0xf]  ;;  %v2601_v52 = vld [vmem:[#allocation4 + $0x54] sm:$0xf0] }
  0x3c   : > { %v688_v14 = vmul.f32 %v3289_v11, %v687_v13  ;;  %885 = vmatpush.bf16.msra.mxu0 %v2624_v33  ;;  %v2600_v51 = vor.u32 %v3107_v49, %v2599_v48  ;;  %v2607_v53 = vld [vmem:[#allocation4 + $0x50] sm:$0xf]  ;;  %v3108_v54 = vld [vmem:[#allocation4 + $0x58] sm:$0xf0]  ;;  %v2604_v55 = vor.u32 %v3106_v50, %v2601_v52  ;;  %v3103_v59 = vld [vmem:[#allocation4 + $0x34] sm:$0xf] }
  0x3d   : > { %898 = vmatpush.bf16.msra.mxu1 %v2628_v37  ;;  %v2608_v56 = vor.u32 %v3108_v54, %v2607_v53  ;;  %v2587_v57 = vld [vmem:[#allocation4 + $0x30] sm:$0xf]  ;;  %v3104_v58 = vld [vmem:[#allocation4 + $0x38] sm:$0xf0]  ;;  %v2589_v61 = vld [vmem:[#allocation4 + $0x3c] sm:$0xf0] }
  0x3e   : > { %v689_v15 = vadd.f32 %v3289_v11, %v688_v14  ;;  %911 = vmatpush.bf16.msra.mxu2 %v2632_v38  ;;  %v2588_v60 = vor.u32 %v3104_v58, %v2587_v57  ;;  %v2595_v62 = vld [vmem:[#allocation4 + $0x38] sm:$0xf]  ;;  %v3105_v63 = vld [vmem:[#allocation4 + $0x40] sm:$0xf0]  ;;  %v2592_v1 = vor.u32 %v3103_v59, %v2589_v61  ;;  %v3100_v5 = vld [vmem:[#allocation4 + $0x1c] sm:$0xf] }
  0x3f   : > { %v2596_v2 = vor.u32 %v3105_v63, %v2595_v62  ;;  %v2575_v3 = vld [vmem:[#allocation4 + $0x18] sm:$0xf]  ;;  %v3101_v4 = vld [vmem:[#allocation4 + $0x20] sm:$0xf0]  ;;  %v2577_v7 = vld [vmem:[#allocation4 + $0x24] sm:$0xf0] }
  0x40   : > { %v3677_v16 = vsel %vm690_vm0, %v3289_v11, %v689_v15  ;;  %886 = vmatpush.bf16.msra.mxu0 %v2612_v42  ;;  %v2576_v6 = vor.u32 %v3101_v4, %v2575_v3  ;;  %v2583_v8 = vld [vmem:[#allocation4 + $0x20] sm:$0xf]  ;;  %v3102_v9 = vld [vmem:[#allocation4 + $0x28] sm:$0xf0]  ;;  %v2580_v10 = vor.u32 %v3100_v5, %v2577_v7  ;;  %v3097_v14 = vld [vmem:[#allocation4 + $0x4] sm:$0xf] }
  0x41   : > { %899 = vmatpush.bf16.msra.mxu1 %v2616_v46  ;;  %v2584_v11 = vor.u32 %v3102_v9, %v2583_v8  ;;  %v2563_v12 = vld [vmem:[#allocation4] sm:$0xf]  ;;  %v3098_v13 = vld [vmem:[#allocation4 + $0x8] sm:$0xf0]  ;;  %s673_s10 = sld [smem:[#allocation3 + %s3618_s23]]  ;;  %v3505_v7 = vmov 0.0  }
  0x42   : > { %912 = vmatpush.bf16.msra.mxu2 %v2620_v47  ;;  %v2564_v15 = vor.u32 %v3098_v13, %v2563_v12  ;;  %v3689_v31 = vld [vmem:[%s4269_s20] sm:$0x7]  ;;  %vm1015_vm9 = vcmask 64512   ;;  %vm1162_vm10 = vcmask 523264   ;;  %vm1164_vm11 = vcmask 785408   ;;  %s4270_s30 = sld [smem:[#allocation18_spill]] }
  0x43   : > { %v3694_v33 = vld [vmem:[%s4236_s4] sm:$0x7]  ;;  %v710_v34 = vperm.slane %v3689_v31, 0  ;;  %s4271_s25 = sld [smem:[#allocation22_spill]]  ;;  %vm1583_vm15 = vcmask 130048  }
  0x44   : > { %887 = vmatpush.bf16.msra.mxu0 %v2600_v51  ;;  %v712_v37 = vperm.slane %v3694_v33, 0  ;;  %v747_v41 = vld [vmem:[%s4238_s6] sm:$0x7] }
  0x45   : > { %900 = vmatpush.bf16.msra.mxu1 %v2604_v55  ;;  %v750_v42 = vperm.slane %v747_v41, 1  ;;  %v749_v46 = vperm.slane %v747_v41, 0 }
  0x46   : > { %913 = vmatpush.bf16.msra.mxu2 %v2608_v56 }
  0x47   : > { %v679_v5 = vstv %s673_s10 }
  0x48   : > { %888 = vmatpush.bf16.msra.mxu0 %v2588_v60  ;;  %s662_s21 = scalar_lea.vmem %s4270_s30, %s3668_s7 }
  0x49   : > { %901 = vmatpush.bf16.msra.mxu1 %v2592_v1 }
  0x4a   : > { %914 = vmatpush.bf16.msra.mxu2 %v2596_v2  ;;  %v674_v2 = vlaneseq }
  0x4c   : > { %889 = vmatpush.bf16.msra.mxu0 %v2576_v6  ;;  %v675_v3 = vshrl.u32 %v674_v2, 7  ;;  %v677_v4 = vand.u32 127, %v674_v2 }
  0x4d   : > { %902 = vmatpush.bf16.msra.mxu1 %v2580_v10 }
  0x4e   : > { %915 = vmatpush.bf16.msra.mxu2 %v2584_v11  ;;  %vm678_vm6 = vcmp.gt.s32.totalorder %v677_v4, %v675_v3  ;;  %vm680_vm7 = vcmp.ge.s32.totalorder %v677_v4, %v679_v5 }
  0x4f   : > { %vm681_vm8 = vmor %vm678_vm6, %vm680_vm7 }
  0x50   : > { %890 = vmatpush.bf16.msra.mxu0 %v2564_v15  ;;  %v682_v8 = vsel %vm681_vm8, -1e+30, %v3505_v7 }
  0xab   : > { %v684_v17 = vpop.xlane.xlu0 %683 }
  0xac   : > { %v692_v18 = vmul.f32 %v3677_v16, %v684_v17  ;;  %v2565_v17 = vld [vmem:[#allocation4 + $0xc] sm:$0xf0] }
  0xad   : > { %v2568_v21 = vor.u32 %v3097_v14, %v2565_v17 }
  0xae   : > { %v3681_v19 = vsub.f32 %v3674_v0, %v692_v18  ;;  %v2571_v18 = vld [vmem:[#allocation4 + $0x8] sm:$0xf] }
  0xaf   : > { %903 = vmatpush.bf16.msra.mxu1 %v2568_v21 }
  0xb0   : > { %v694_v20 = vmul.f32 %v3681_v19, %v3681_v19 }
  0xb2   : > { %695 = vadd.xlane.f32.xlu0 %v694_v20  ;;  %v3099_v20 = vld [vmem:[#allocation4 + $0x10] sm:$0xf0] }
  0xb3   : > { %v2572_v22 = vor.u32 %v3099_v20, %v2571_v18 }
  0xb5   : > { %916 = vmatpush.bf16.msra.mxu2 %v2572_v22 }
 0x125   : > { %v696_v23 = vpop.xlane.xlu0 %695 }
 0x126   : > { %v697_v24 = vmul.f32 %v696_v23, %v3677_v16 }
 0x128   : > { %v698_v25 = vadd.f32 1e-05, %v697_v24 }
 0x12a   : > { %3290 = vrsqrt.f32 %v698_v25  ;;  %vm705_vm2 = vweird.f32 %v698_v25 }
 0x130   : > { %v3291_v26 = vpop.eup %3290 }
 0x131   : > { %v700_v27 = vmul.f32 %v3291_v26, %v698_v25  ;;  %vm706_vm1 = vweird.f32 %v3291_v26 }
 0x132   : > { %vm707_vm3 = vmor %vm705_vm2, %vm706_vm1 }
 0x133   : > { %v701_v28 = vmul.f32 %v3291_v26, %v700_v27 }
 0x135   : > { %v702_v29 = vmul.f32 0.5, %v701_v28 }
 0x137   : > { %v703_v30 = vsub.f32 1.5, %v702_v29 }
 0x139   : > { %v704_v32 = vmul.f32 %v3291_v26, %v703_v30 }
 0x13b   : > { %v708_v35 = vsel %vm707_vm3, %v3291_v26, %v704_v32 }
 0x13c   : > { %v709_v36 = vmul.f32 %v708_v35, %v3681_v19  ;;  %v751_v19 = vperm.slane %v747_v41, 2 }
 0x13e   : > { %v711_v38 = vmul.f32 %v710_v34, %v709_v36 }
 0x140   : > { %v713_v39 = vadd.f32 %v712_v37, %v711_v38 }
 0x142   : > { %v714_v40 = vpack.c.bf16 %v713_v39, %v713_v39 }
 0x144   : > { %891 = vmatmul.bf16.vlgmr.msra.gmra.mxu0 %v714_v40  ;;  %904 = vmatmul.bf16.vlgmr.msra.gmra.mxu1 %v714_v40 }
 0x145   : > { %917 = vmatmul.bf16.vlgmr.msra.gmra.mxu2 %v714_v40 }
 0x1c1   : > { %v892_v43 = vpop.f32.mrf.mxu0  ;;  %v905_v44 = vpop.f32.mrf.mxu1 }
 0x1c2   : > { %v906_v45 = vadd.f32 %v905_v44, %v750_v42  ;;  %v893_v49 = vadd.f32 %v892_v43, %v749_v46 }
 0x1c4   : > { %v923_v47 = vpack.c.bf16 %v906_v45, %v906_v45  ;;  %v922_v55 = vpack.c.bf16 %v893_v49, %v893_v49 }
 0x1c6   : > { %994 = vrot.lane.b32.xlu0 %v923_v47, %s3502_s26  ;;  %971 = vrot.lane.b32.xlu2 %v923_v47, %s3503_s27  ;;  %v929_v48 = vsel %vm924_vm4, %v923_v47, 0 }
 0x1c7   : > { %948 = vrot.lane.b32.xlu1 %v923_v47, %s3504_s0  ;;  %938 = vmatpush.bf16.xpose.msra.mxu3 %v929_v48 }
 0x1c8   : > { %v918_v50 = vpop.f32.mrf.mxu2 }
 0x1c9   : > { %v919_v51 = vadd.f32 %v918_v50, %v751_v19  ;;  %v894_v52 = vpop.f32.mrf.mxu0  ;;  %v907_v53 = vpop.f32.mrf.mxu1 }
 0x1cb   : > { %v3706_v54 = vpack.c.bf16 %v919_v51, %v919_v51 }
 0x1cd   : > { %v1067_v56 = vsel %vm1065_vm5, %v3706_v54, 0 }
 0x1ce   : > { %1076 = vmatpush.bf16.msrb.mxu2 %v1067_v56  ;;  %969 = vrot.lane.b32.xlu2 %v922_v55, %s3503_s27 }
 0x1cf   : > { %945 = vrot.lane.b32.xlu1 %v922_v55, %s3504_s0  ;;  %2657 = vmatmul.msk.bf16.vlgmr.msra.gmra.mxu3 %vm924_vm4, %v922_v55 }
 0x1d0   : > { %v920_v57 = vpop.f32.mrf.mxu2 }
 0x1d7   : > { %992 = vrot.lane.b32.xlu1 %v922_v55, %s3502_s26 }
 0x220   : > { %v972_v58 = vpop.permute.xlu2 %971 }
 0x221   : > { %v977_v63 = vsel %vm924_vm4, %v972_v58, 0 }
 0x228   : > { %v970_v9 = vpop.permute.xlu2 %969 }
 0x238   : > { %v995_v59 = vpop.permute.xlu0 %994 }
 0x239   : > { %v949_v60 = vpop.permute.xlu1 %948  ;;  %v1000_v61 = vsel %vm924_vm4, %v995_v59, 0 }
 0x23a   : > { %v954_v62 = vsel %vm924_vm4, %v949_v60, 0  ;;  %1009 = vmatpush.bf16.xpose.msrb.mxu0 %v1000_v61 }
 0x23b   : > { %963 = vmatpush.bf16.xpose.msrb.mxu3 %v954_v62 }
 0x241   : > { %v946_v1 = vpop.permute.xlu1 %945 }
 0x242   : > { %2658 = vmatmul.msk.bf16.vlgmr.msrb.gmra.mxu3 %vm924_vm4, %v946_v1 }
 0x243   : > { %986 = vmatpush.bf16.xpose.msra.mxu3 %v977_v63 }
 0x249   : > { %v993_v6 = vpop.permute.xlu1 %992 }
 0x24a   : > { %2660 = vmatmul.msk.bf16.vlgmr.msrb.gmra.mxu0 %vm924_vm4, %v993_v6 }
 0x252   : > { %v940_v10 = vpop.f32.mrf.mxu3  ;;  %2659 = vmatmul.msk.bf16.vlgmr.msra.gmra.mxu3 %vm924_vm4, %v970_v9 }
 0x253   : > { %v941_v11 = vadd.f32 %v940_v10, %v682_v8 }
 0x255   : > { %v1016_v12 = vsel %vm1015_vm9, %v941_v11, -inf }
 0x256   : > { %1017 = vmax.xlane.f32.xlu2 %v1016_v12 }
 0x25a   : > { %v942_v13 = vpop.f32.mrf.mxu3 }
 0x2c5   : > { %v965_v14 = vpop.f32.mrf.mxu3 }
 0x2c6   : > { %v966_v15 = vadd.f32 %v965_v14, %v682_v8 }
 0x2c7   : > { %v1011_v17 = vpop.f32.mrf.mxu0 }
 0x2c8   : > { %v1012_v18 = vadd.f32 %v1011_v17, %v682_v8  ;;  %v1019_v20 = vsel %vm1015_vm9, %v966_v15, -inf  ;;  %v3128_v17 = vld [vmem:[#allocation6 + $0x38] sm:$0xff] }
 0x2c9   : > { %1020 = vmax.xlane.f32.xlu1 %v1019_v20  ;;  %v1018_v21 = vpop.xlane.xlu2 %1017  ;;  %1235 = vmatpush.bf16.msrb.mxu1 %v3128_v17  ;;  %v3126_v20 = vld [vmem:[#allocation6 + $0x28] sm:$0xff] }
 0x2ca   : > { %v1028_v22 = vsub.f32 %v941_v11, %v1018_v21  ;;  %v1025_v23 = vsel %vm1015_vm9, %v1012_v18, -inf  ;;  %v3125_v21 = vld [vmem:[#allocation6 + $0x20] sm:$0xff] }
 0x2cb   : > { %1026 = vmax.xlane.f32.xlu2 %v1025_v23  ;;  %v3123_v23 = vld [vmem:[#allocation6 + $0x10] sm:$0xff] }
 0x2cc   : > { %v1032_v24 = vmul.f32 1.442695, %v1028_v22  ;;  %v3124_v22 = vld [vmem:[#allocation6 + $0x18] sm:$0xff] }
 0x2cd   : > { %v967_v25 = vpop.f32.mrf.mxu3 }
 0x2ce   : > { %3292 = vpow2.f32 %v1032_v24  ;;  %v3122_v24 = vld [vmem:[#allocation6 + $0x8] sm:$0xff]  ;;  %v3121_v25 = vld [vmem:[#allocation6] sm:$0xff] }
 0x2cf   : > { %v1013_v26 = vpop.f32.mrf.mxu0 }
 0x2d4   : > { %v3293_v27 = vpop.eup %3292 }
 0x2d5   : > { %v988_v28 = vpop.f32.mrf.mxu3  ;;  %v1040_v29 = vsel %vm1015_vm9, %v3293_v27, 0.0 }
 0x2d6   : > { %v989_v30 = vadd.f32 %v988_v28, %v682_v8  ;;  %1041 = vadd.xlane.f32.xlu2 %v1040_v29 }
 0x2d8   : > { %v1022_v32 = vsel %vm1015_vm9, %v989_v30, -inf }
 0x2d9   : > { %1023 = vmax.xlane.f32.xlu0 %v1022_v32 }
 0x2dd   : > { %v990_v34 = vpop.f32.mrf.mxu3 }
 0x2ed   : > { %1084 = vrot.lane.b32.xlu0 %v3706_v54, %s3504_s0 }
 0x33c   : > { %v1021_v35 = vpop.xlane.xlu1 %1020 }
 0x33d   : > { %v1029_v38 = vsub.f32 %v966_v15, %v1021_v35  ;;  %v3284_v35 = vld [vmem:[%s4240_s8] ss:$0 sm:$0xff] }
 0x33e   : > { %v1027_v36 = vpop.xlane.xlu2 %1026 }
 0x33f   : > { %v1031_v37 = vsub.f32 %v1012_v18, %v1027_v36  ;;  %v1034_v40 = vmul.f32 1.442695, %v1029_v38  ;;  %v3127_v18 = vld [vmem:[#allocation6 + $0x30] sm:$0xff] }
 0x340   : > { %1236 = vmatpush.bf16.msrb.mxu1 %v3127_v18 }
 0x341   : > { %v1038_v39 = vmul.f32 1.442695, %v1031_v37 }
 0x343   : > { %3294 = vpow2.f32 %v1038_v39 }
 0x344   : > { %3296 = vpow2.f32 %v1034_v40  ;;  %1237 = vmatpush.bf16.msrb.mxu1 %v3126_v20  ;;  %v2791_v40 = vld [vmem:[%s4243_s11 + $0x70] sm:$0xf] }
 0x348   : > { %1238 = vmatpush.bf16.msrb.mxu1 %v3125_v21 }
 0x349   : > { %v3295_v41 = vpop.eup %3294  ;;  %v1042_v42 = vpop.xlane.xlu2 %1041 }
 0x34a   : > { %3298 = vrcp.f32 %v1042_v42  ;;  %v1049_v43 = vsel %vm1015_vm9, %v3295_v41, 0.0  ;;  %v3297_v46 = vpop.eup %3296  ;;  %v2783_v42 = vld [vmem:[%s4243_s11 + $0x60] sm:$0xf] }
 0x34b   : > { %1050 = vadd.xlane.f32.xlu1 %v1049_v43  ;;  %v1043_v49 = vsel %vm1015_vm9, %v3297_v46, 0.0 }
 0x34c   : > { %v1024_v44 = vpop.xlane.xlu0 %1023  ;;  %1239 = vmatpush.bf16.msrb.mxu1 %v3124_v22  ;;  %v3816_v22 = vld [vmem:[%s4244_s12] sm:$0x3] }
 0x34d   : > { %v1030_v45 = vsub.f32 %v989_v30, %v1024_v44 }
 0x34f   : > { %v1036_v47 = vmul.f32 1.442695, %v1030_v45  ;;  %v2775_v45 = vld [vmem:[%s4243_s11 + $0x50] sm:$0xf] }
 0x350   : > { %v3299_v19 = vpop.eup %3298  ;;  %1240 = vmatpush.bf16.msrb.mxu1 %v3123_v23 }
 0x351   : > { %v1056_v48 = vmul.f32 %v3299_v19, %v3293_v27  ;;  %3300 = vpow2.f32 %v1036_v47  ;;  %v3136_v47 = vld [vmem:[#allocation8 + $0x38] sm:$0xff] }
 0x353   : > { %1044 = vadd.xlane.f32.xlu1 %v1043_v49  ;;  %v1060_v50 = vpack.c.bf16 %v1056_v48, %v1056_v48  ;;  %v2767_v48 = vld [vmem:[%s4243_s11 + $0x40] sm:$0xf]  ;;  %v3146_v49 = vld [vmem:[%s4243_s11 + $0x44] sm:$0xf0] }
 0x354   : > { %1241 = vmatpush.bf16.msrb.mxu1 %v3122_v24 }
 0x355   : > { %2661 = vmatmul.msk.bf16.vlgmr.msrb.gmra.mxu2 %vm1015_vm9, %v1060_v50  ;;  %v2768_v50 = vor.u32 %v3146_v49, %v2767_v48  ;;  %v3285_v48 = vld [vmem:[%s4271_s25] ss:$0 sm:$0xff] }
 0x357   : > { %v3301_v51 = vpop.eup %3300 }
 0x358   : > { %v1046_v52 = vsel %vm1015_vm9, %v3301_v51, 0.0  ;;  %1242 = vmatpush.bf16.msrb.mxu1 %v3121_v25  ;;  %v1269_v25 = vperm.slane %v3689_v31, 1 }
 0x359   : > { %1047 = vadd.xlane.f32.xlu2 %v1046_v52  ;;  %v3144_v52 = vld [vmem:[%s4243_s11 + $0x34] sm:$0xf0] }
 0x35f   : > { %v1085_v53 = vpop.permute.xlu0 %1084 }
 0x360   : > { %v1090_v55 = vsel %vm1065_vm5, %v1085_v53, 0 }
 0x361   : > { %1099 = vmatpush.bf16.msra.mxu2 %v1090_v55  ;;  %v2751_v55 = vld [vmem:[%s4243_s11 + $0x20] sm:$0xf] }
 0x365   : > { %1342 = vmatpush.bf16.msrb.mxu2 %v3136_v47  ;;  %v2777_v47 = vld [vmem:[%s4243_s11 + $0x58] sm:$0xf0] }
 0x36c   : > { %1128 = vrot.lane.b32.xlu1 %v3706_v54, %s3502_s26 }
 0x371   : > { %1106 = vrot.lane.b32.xlu2 %v3706_v54, %s3503_s27 }
 0x3be   : > { %v1051_v56 = vpop.xlane.xlu1 %1050 }
 0x3c6   : > { %v1045_v57 = vpop.xlane.xlu1 %1044 }
 0x3c7   : > { %3302 = vrcp.f32 %v1045_v57 }
 0x3cc   : > { %v1048_v58 = vpop.xlane.xlu2 %1047 }
 0x3cd   : > { %v3303_v59 = vpop.eup %3302  ;;  %3304 = vrcp.f32 %v1048_v58  ;;  %v2743_v58 = vld [vmem:[%s4243_s11 + $0x10] sm:$0xf] }
 0x3ce   : > { %v1057_v60 = vmul.f32 %v3303_v59, %v3297_v46  ;;  %3306 = vrcp.f32 %v1051_v56  ;;  %v3148_v46 = vld [vmem:[%s4243_s11 + $0x54] sm:$0xf0]  ;;  %v3142_v56 = vld [vmem:[%s4243_s11 + $0x24] sm:$0xf0] }
 0x3cf   : > { %v2776_v19 = vor.u32 %v3148_v46, %v2775_v45  ;;  %v2752_v57 = vor.u32 %v3142_v56, %v2751_v55  ;;  %v3140_v59 = vld [vmem:[%s4243_s11 + $0x14] sm:$0xf0]  ;;  %v3147_v46 = vld [vmem:[%s4243_s11 + $0x54] sm:$0xf] }
 0x3d0   : > { %v1082_v61 = vpack.c.bf16 %v1057_v60, %v1057_v60  ;;  %v2744_v60 = vor.u32 %v3140_v59, %v2743_v58  ;;  %v2761_v58 = vld [vmem:[%s4243_s11 + $0x38] sm:$0xf0] }
 0x3d2   : > { %2662 = vmatmul.msk.bf16.vlgmr.msra.gmra.mxu2 %vm1015_vm9, %v1082_v61  ;;  %v2735_v61 = vld [vmem:[%s4243_s11] sm:$0xf] }
 0x3d3   : > { %v3305_v62 = vpop.eup %3304 }
 0x3d4   : > { %v1058_v63 = vmul.f32 %v3305_v62, %v3301_v51  ;;  %v1107_v1 = vpop.permute.xlu2 %1106  ;;  %v3307_v54 = vpop.eup %3306  ;;  %v2759_v51 = vld [vmem:[%s4243_s11 + $0x30] sm:$0xf]  ;;  %v3138_v62 = vld [vmem:[%s4243_s11 + $0x4] sm:$0xf0] }
 0x3d5   : > { %v1112_v2 = vsel %vm1065_vm5, %v1107_v1, 0  ;;  %v1059_v5 = vmul.f32 %v3307_v54, %v3295_v41  ;;  %v3152_v41 = vld [vmem:[%s4243_s11 + $0x74] sm:$0xf0]  ;;  %v2760_v53 = vor.u32 %v3144_v52, %v2759_v51  ;;  %v2769_v51 = vld [vmem:[%s4243_s11 + $0x48] sm:$0xf0] }
 0x3d6   : > { %v1105_v3 = vpack.c.bf16 %v1058_v63, %v1058_v63  ;;  %1121 = vmatpush.bf16.msrb.mxu3 %v1112_v2  ;;  %v2792_v43 = vor.u32 %v3152_v41, %v2791_v40  ;;  %v2736_v2 = vor.u32 %v3138_v62, %v2735_v61  ;;  %v2793_v41 = vld [vmem:[%s4243_s11 + $0x78] sm:$0xf0]  ;;  %v3141_v61 = vld [vmem:[%s4243_s11 + $0x24] sm:$0xf]  ;;  %v2753_v62 = vld [vmem:[%s4243_s11 + $0x28] sm:$0xf0] }
 0x3d7   : > { %v1127_v9 = vpack.c.bf16 %v1059_v5, %v1059_v5  ;;  %v3135_v5 = vld [vmem:[#allocation8 + $0x30] sm:$0xff] }
 0x3d8   : > { %v1078_v4 = vpop.f32.mrf.mxu2  ;;  %1343 = vmatpush.bf16.msrb.mxu2 %v3135_v5  ;;  %v3137_v5 = vld [vmem:[%s4243_s11 + $0x4] sm:$0xf] }
 0x3d9   : > { %2663 = vmatmul.msk.bf16.vlgmr.msrb.gmra.mxu3 %vm1015_vm9, %v1105_v3 }
 0x3da   : > { %1463 = vmatpush.bf16.msra.mxu3 %v2792_v43 }
 0x3de   : > { %v1129_v6 = vpop.permute.xlu1 %1128 }
 0x3df   : > { %v1134_v7 = vsel %vm1065_vm5, %v1129_v6, 0  ;;  %v3134_v6 = vld [vmem:[#allocation8 + $0x28] sm:$0xff] }
 0x3e0   : > { %v1080_v8 = vpop.f32.mrf.mxu2  ;;  %1143 = vmatpush.bf16.msra.mxu0 %v1134_v7  ;;  %1344 = vmatpush.bf16.msrb.mxu2 %v3134_v6  ;;  %v3133_v7 = vld [vmem:[#allocation8 + $0x20] sm:$0xff]  ;;  %v2737_v6 = vld [vmem:[%s4243_s11 + $0x8] sm:$0xf0] }
 0x3e1   : > { %v3132_v8 = vld [vmem:[#allocation8 + $0x18] sm:$0xff] }
 0x3e3   : > { %2664 = vmatmul.msk.bf16.vlgmr.msra.gmra.mxu0 %vm1015_vm9, %v1127_v9  ;;  %v3131_v9 = vld [vmem:[#allocation8 + $0x10] sm:$0xff] }
 0x3e4   : > { %1345 = vmatpush.bf16.msrb.mxu2 %v3133_v7  ;;  %v2740_v7 = vor.u32 %v3137_v5, %v2737_v6 }
 0x3e8   : > { %1346 = vmatpush.bf16.msrb.mxu2 %v3132_v8 }
 0x3ec   : > { %1347 = vmatpush.bf16.msrb.mxu2 %v3131_v9 }
 0x455   : > { %v1101_v10 = vpop.f32.mrf.mxu2 }
 0x456   : > { %1150 = vrot.lane.b32.xlu0 %v1101_v10, %s3502_s26  ;;  %v3130_v10 = vld [vmem:[#allocation8 + $0x8] sm:$0xff] }
 0x457   : > { %1348 = vmatpush.bf16.msrb.mxu2 %v3130_v10 }
 0x45c   : > { %v1123_v11 = vpop.f32.mrf.mxu3 }
 0x45d   : > { %v1103_v12 = vpop.f32.mrf.mxu2  ;;  %1154 = vrot.lane.b32.xlu2 %v1123_v11, %s3503_s27  ;;  %v3129_v11 = vld [vmem:[#allocation8] sm:$0xff] }
 0x45e   : > { %1349 = vmatpush.bf16.msrb.mxu2 %v3129_v11 }
 0x460   : > { %v1145_v13 = vpop.f32.mrf.mxu0 }
 0x461   : > { %1158 = vrot.lane.b32.xlu0 %v1145_v13, %s3504_s0 }
 0x464   : > { %v1125_v14 = vpop.f32.mrf.mxu3 }
 0x468   : > { %v1147_v15 = vpop.f32.mrf.mxu0 }
 0x4b7   : > { %v1155_v28 = vpop.permute.xlu2 %1154 }
 0x4c8   : > { %v1151_v26 = vpop.permute.xlu0 %1150 }
 0x4c9   : > { %v1161_v27 = vsel %vm924_vm4, %v1078_v4, %v1151_v26  ;;  %v3809_v4 = vld [vmem:[%s662_s21] sm:$0xff]  ;;  %v1373_v26 = vperm.slane %v3816_v22, 0 }
 0x4ca   : > { %v1163_v30 = vsel %vm1162_vm10, %v1161_v27, %v1155_v28 }
 0x4d3   : > { %v1159_v29 = vpop.permute.xlu0 %1158 }
 0x4d4   : > { %v1165_v32 = vsel %vm1164_vm11, %v1163_v30, %v1159_v29  ;;  %v1271_v29 = vperm.slane %v3694_v33, 1  ;;  %v3151_v33 = vld [vmem:[%s4243_s11 + $0x74] sm:$0xf] }
 0x4d5   : > { %v1166_v34 = vpack.c.bf16 %v1165_v32, %v1165_v32 }
 0x4d7   : > { %1243 = vmatmul.bf16.vlgmr.msrb.gmra.mxu1 %v1166_v34 }
 0x554   : > { %v1244_v36 = vpop.f32.mrf.mxu1 }
 0x555   : > { %v1245_v37 = vadd.f32 %v3284_v35, %v1244_v36 }
 0x557   : > { %v3752_v38 = vadd.f32 %v1245_v37, %v3674_v0  ;;  %v3150_v0 = vld [vmem:[%s4243_s11 + $0x64] sm:$0xf0] }
 0x558   : > { %v2784_v44 = vor.u32 %v3150_v0, %v2783_v42  ;;  %v3149_v42 = vld [vmem:[%s4243_s11 + $0x64] sm:$0xf]  ;;  %v2796_v0 = vor.u32 %v3151_v33, %v2793_v41 }
 0x559   : > { %1249 = vadd.xlane.f32.xlu1 %v3752_v38 }
 0x55a   : > { %1464 = vmatpush.bf16.msra.mxu3 %v2784_v44  ;;  %v2785_v44 = vld [vmem:[%s4243_s11 + $0x68] sm:$0xf0]  ;;  %1477 = vmatpush.bf16.msrb.mxu0 %v2796_v0 }
 0x55b   : > { %v2788_v45 = vor.u32 %v3149_v42, %v2785_v44 }
 0x55c   : > { %v1246_v39 = vpop.f32.mrf.mxu1 }
 0x55e   : > { %1465 = vmatpush.bf16.msra.mxu3 %v2776_v19  ;;  %1478 = vmatpush.bf16.msrb.mxu0 %v2788_v45  ;;  %v2780_v19 = vor.u32 %v3147_v46, %v2777_v47 }
 0x562   : > { %1466 = vmatpush.bf16.msra.mxu3 %v2768_v50  ;;  %v3145_v50 = vld [vmem:[%s4243_s11 + $0x44] sm:$0xf]  ;;  %1479 = vmatpush.bf16.msrb.mxu0 %v2780_v19 }
 0x563   : > { %v2772_v55 = vor.u32 %v3145_v50, %v2769_v51 }
 0x566   : > { %1467 = vmatpush.bf16.msra.mxu3 %v2760_v53  ;;  %1480 = vmatpush.bf16.msrb.mxu0 %v2772_v55 }
 0x56a   : > { %1468 = vmatpush.bf16.msra.mxu3 %v2752_v57  ;;  %v3143_v57 = vld [vmem:[%s4243_s11 + $0x34] sm:$0xf] }
 0x56e   : > { %1469 = vmatpush.bf16.msra.mxu3 %v2744_v60  ;;  %v2764_v60 = vor.u32 %v3143_v57, %v2761_v58 }
 0x570   : > { %1481 = vmatpush.bf16.msrb.mxu0 %v2764_v60 }
 0x572   : > { %1470 = vmatpush.bf16.msra.mxu3 %v2736_v2  ;;  %v3139_v2 = vld [vmem:[%s4243_s11 + $0x14] sm:$0xf] }
 0x575   : > { %1471 = vmatmul.bf16.vlgmr.msra.gmra.mxu3 %v3809_v4 }
 0x5cc   : > { %v1250_v63 = vpop.xlane.xlu1 %1249 }
 0x5cd   : > { %v1251_v1 = vmul.f32 %v1250_v63, %v3677_v16 }
 0x5cf   : > { %v1252_v3 = vsub.f32 %v3752_v38, %v1251_v1  ;;  %v2756_v1 = vor.u32 %v3141_v61, %v2753_v62 }
 0x5d1   : > { %v1253_v54 = vmul.f32 %v1252_v3, %v1252_v3  ;;  %1482 = vmatpush.bf16.msrb.mxu0 %v2756_v1 }
 0x5d3   : > { %1254 = vadd.xlane.f32.xlu2 %v1253_v54 }
 0x5f8   : > { %v1472_v23 = vpop.f32.mrf.mxu3 }
 0x5f9   : > { %v1473_v32 = vadd.f32 %v1472_v23, %v1373_v26 }
 0x600   : > { %v1474_v34 = vpop.f32.mrf.mxu3 }
 0x601   : > { %v1475_v36 = vadd.f32 %v1474_v34, %v1373_v26 }
 0x603   : > { %v1492_v39 = vpack.c.bf16 %v1475_v36, %v1473_v32 }
 0x605   : > { %1516 = vrot.lane.b32.xlu0 %v1492_v39, %s3504_s0  ;;  %v1497_v40 = vsel %vm924_vm4, %v1492_v39, 0 }
 0x606   : > { %1506 = vmatpush.bf16.xpose.msra.mxu1 %v1497_v40 }
 0x60d   : > { %1539 = vrot.lane.b32.xlu0 %v1492_v39, %s3503_s27 }
 0x646   : > { %v1255_v12 = vpop.xlane.xlu2 %1254 }
 0x647   : > { %v1256_v13 = vmul.f32 %v1255_v12, %v3677_v16 }
 0x649   : > { %v1257_v14 = vadd.f32 1e-05, %v1256_v13 }
 0x64b   : > { %3308 = vrsqrt.f32 %v1257_v14  ;;  %vm1264_vm13 = vweird.f32 %v1257_v14 }
 0x651   : > { %v3309_v15 = vpop.eup %3308 }
 0x652   : > { %v1259_v17 = vmul.f32 %v3309_v15, %v1257_v14  ;;  %vm1265_vm12 = vweird.f32 %v3309_v15 }
 0x653   : > { %vm1266_vm14 = vmor %vm1264_vm13, %vm1265_vm12 }
 0x654   : > { %v1260_v18 = vmul.f32 %v3309_v15, %v1259_v17  ;;  %v1374_v17 = vperm.slane %v3816_v22, 1 }
 0x656   : > { %v1261_v20 = vmul.f32 0.5, %v1260_v18 }
 0x658   : > { %v1262_v21 = vsub.f32 1.5, %v1261_v20 }
 0x65a   : > { %v1263_v24 = vmul.f32 %v3309_v15, %v1262_v21 }
 0x65c   : > { %v1267_v27 = vsel %vm1266_vm14, %v3309_v15, %v1263_v24 }
 0x65d   : > { %v1268_v28 = vmul.f32 %v1267_v27, %v1252_v3  ;;  %v2745_v3 = vld [vmem:[%s4243_s11 + $0x18] sm:$0xf0] }
 0x65e   : > { %v2748_v54 = vor.u32 %v3139_v2, %v2745_v3 }
 0x65f   : > { %v1270_v30 = vmul.f32 %v1269_v25, %v1268_v28 }
 0x660   : > { %1483 = vmatpush.bf16.msrb.mxu0 %v2748_v54 }
 0x661   : > { %v1272_v35 = vadd.f32 %v1271_v29, %v1270_v30 }
 0x663   : > { %v1273_v37 = vpack.c.bf16 %v1272_v35, %v1272_v35 }
 0x664   : > { %1484 = vmatpush.bf16.msrb.mxu0 %v2740_v7 }
 0x665   : > { %1350 = vmatmul.bf16.vlgmr.msrb.gmra.mxu2 %v1273_v37 }
 0x667   : > { %1485 = vmatmul.bf16.vlgmr.msrb.gmra.mxu0 %v3809_v4 }
 0x677   : > { %v1517_v31 = vpop.permute.xlu0 %1516 }
 0x678   : > { %v1522_v43 = vsel %vm924_vm4, %v1517_v31, 0 }
 0x679   : > { %1531 = vmatpush.bf16.xpose.msra.mxu2 %v1522_v43 }
 0x67f   : > { %v1540_v49 = vpop.permute.xlu0 %1539 }
 0x680   : > { %v1545_v52 = vsel %vm924_vm4, %v1540_v49, 0 }
 0x681   : > { %1554 = vmatpush.bf16.xpose.msrb.mxu3 %v1545_v52 }
 0x6e4   : > { %v1486_v15 = vpop.f32.mrf.mxu0 }
 0x6e5   : > { %v1487_v18 = vadd.f32 %v1486_v15, %v1374_v17 }
 0x6e8   : > { %v1351_v53 = vpop.f32.mrf.mxu2 }
 0x6e9   : > { %v1352_v56 = vadd.f32 %v3285_v48, %v1351_v53 }
 0x6eb   : > { %v1491_v59 = vpack.c.bf16 %v1352_v56, %v1352_v56 }
 0x6ec   : > { %v1488_v4 = vpop.f32.mrf.mxu0 }
 0x6ed   : > { %1560 = vrot.lane.b32.xlu1 %v1491_v59, %s3502_s26  ;;  %1513 = vrot.lane.b32.xlu0 %v1491_v59, %s3504_s0  ;;  %v1489_v20 = vadd.f32 %v1488_v4, %v1374_v17  ;;  %v3158_v4 = vld [vmem:[#allocation9 + $0x28] sm:$0xff] }
 0x6ee   : > { %2797 = vmatmul.msk.bf16.vlgmr.msra.gmra.mxu1 %vm924_vm4, %v1491_v59 }
 0x6ef   : > { %v1629_v21 = vpack.c.bf16 %v1489_v20, %v1487_v18  ;;  %v3159_v18 = vld [vmem:[#allocation9 + $0x30] sm:$0xff]  ;;  %v3157_v20 = vld [vmem:[#allocation9 + $0x20] sm:$0xff] }
 0x6f0   : > { %v1353_v63 = vpop.f32.mrf.mxu2 }
 0x6f1   : > { %1640 = vmatpush.bf16.msrb.mxu1 %v1629_v21 }
 0x6f5   : > { %1537 = vrot.lane.b32.xlu0 %v1491_v59, %s3503_s27 }
 0x6fd   : > { %1562 = vrot.lane.b32.xlu0 %v1492_v39, %s3502_s26 }
 0x75f   : > { %v1514_v8 = vpop.permute.xlu0 %1513  ;;  %v1561_v14 = vpop.permute.xlu1 %1560 }
 0x760   : > { %2798 = vmatmul.msk.bf16.vlgmr.msra.gmra.mxu2 %vm924_vm4, %v1514_v8  ;;  %v3160_v8 = vld [vmem:[#allocation9 + $0x38] sm:$0xff] }
 0x761   : > { %1791 = vmatpush.bf16.msra.mxu1 %v3160_v8 }
 0x765   : > { %1792 = vmatpush.bf16.msra.mxu1 %v3159_v18  ;;  %v2905_v18 = vld [vmem:[%s4247_s15 + $0x90] sm:$0xf0] }
 0x767   : > { %v1538_v9 = vpop.permute.xlu0 %1537 }
 0x768   : > { %2799 = vmatmul.msk.bf16.vlgmr.msrb.gmra.mxu3 %vm924_vm4, %v1538_v9 }
 0x769   : > { %1793 = vmatpush.bf16.msra.mxu1 %v3158_v4  ;;  %v2911_v4 = vld [vmem:[%s4247_s15 + $0x88] sm:$0xf] }
 0x76b   : > { %v1508_v10 = vpop.f32.mrf.mxu1 }
 0x76c   : > { %v1584_v32 = vsel %vm1583_vm15, %v1508_v10, -inf }
 0x76d   : > { %1794 = vmatpush.bf16.msra.mxu1 %v3157_v20  ;;  %v3180_v20 = vld [vmem:[%s4247_s15 + $0x94] sm:$0xf0] }
 0x76f   : > { %v1563_v11 = vpop.permute.xlu0 %1562 }
 0x770   : > { %v1568_v12 = vsel %vm924_vm4, %v1563_v11, 0 }
 0x771   : > { %1577 = vmatpush.bf16.xpose.msra.mxu0 %v1568_v12 }
 0x773   : > { %v1510_v13 = vpop.f32.mrf.mxu1 }
 0x778   : > { %2800 = vmatmul.msk.bf16.vlgmr.msra.gmra.mxu0 %vm924_vm4, %v1561_v14 }
 0x7e3   : > { %v1533_v23 = vpop.f32.mrf.mxu2 }
 0x7e4   : > { %v1587_v24 = vsel %vm1583_vm15, %v1533_v23, -inf }
 0x7e5   : > { %1588 = vmax.xlane.f32.xlu0 %v1587_v24  ;;  %v3154_v24 = vld [vmem:[#allocation9 + $0x8] sm:$0xff] }
 0x7eb   : > { %v1535_v25 = vpop.f32.mrf.mxu2  ;;  %v1556_v26 = vpop.f32.mrf.mxu3 }
 0x7ec   : > { %v1590_v30 = vsel %vm1583_vm15, %v1556_v26, -inf  ;;  %v3153_v25 = vld [vmem:[#allocation9] sm:$0xff] }
 0x7f3   : > { %v1558_v27 = vpop.f32.mrf.mxu3 }
 0x7f5   : > { %v1579_v28 = vpop.f32.mrf.mxu0 }
 0x7f6   : > { %v1593_v29 = vsel %vm1583_vm15, %v1579_v28, -inf }
 0x7f7   : > { %1594 = vmax.xlane.f32.xlu2 %v1593_v29 }
 0x7f9   : > { %1668 = vrot.lane.b32.xlu0 %v1629_v21, %s3503_s27 }
 0x7fd   : > { %v1581_v22 = vpop.f32.mrf.mxu0 }
 0x7ff   : > { %1591 = vmax.xlane.f32.xlu2 %v1590_v30 }
 0x801   : > { %1688 = vrot.lane.b32.xlu0 %v1629_v21, %s3502_s26 }
 0x807   : > { %1585 = vmax.xlane.f32.xlu2 %v1584_v32 }
 0x858   : > { %v1589_v34 = vpop.xlane.xlu0 %1588 }
 0x859   : > { %v1597_v35 = vsub.f32 %v1533_v23, %v1589_v34  ;;  %v3155_v23 = vld [vmem:[#allocation9 + $0x10] sm:$0xff]  ;;  %v3286_v34 = vld [vmem:[%s4246_s14] ss:$0 sm:$0xff] }
 0x85b   : > { %v1602_v36 = vmul.f32 1.442695, %v1597_v35 }
 0x85d   : > { %3310 = vpow2.f32 %v1602_v36 }
 0x863   : > { %v3311_v37 = vpop.eup %3310 }
 0x864   : > { %v1611_v39 = vsel %vm1583_vm15, %v3311_v37, 0.0 }
 0x865   : > { %1612 = vadd.xlane.f32.xlu1 %v1611_v39 }
 0x86a   : > { %v1595_v40 = vpop.xlane.xlu2 %1594 }
 0x86b   : > { %v1599_v31 = vsub.f32 %v1579_v28, %v1595_v40  ;;  %v1669_v33 = vpop.permute.xlu0 %1668  ;;  %v2951_v40 = vld [vmem:[%s4247_s15 + $0xe0] sm:$0xf] }
 0x86c   : > { %1681 = vmatpush.bf16.msra.mxu3 %v1669_v33  ;;  %v3189_v33 = vld [vmem:[%s4247_s15 + $0xe4] sm:$0xf] }
 0x86d   : > { %v1606_v41 = vmul.f32 1.442695, %v1599_v31  ;;  %v3191_v31 = vld [vmem:[%s4247_s15 + $0xec] sm:$0xf0] }
 0x86f   : > { %3312 = vpow2.f32 %v1606_v41  ;;  %v2952_v41 = vor.u32 %v3191_v31, %v2951_v40  ;;  %v2897_v40 = vld [vmem:[%s4247_s15 + $0x78] sm:$0xf0] }
 0x872   : > { %v1592_v42 = vpop.xlane.xlu2 %1591 }
 0x873   : > { %v1598_v43 = vsub.f32 %v1556_v26, %v1592_v42  ;;  %v1689_v0 = vpop.permute.xlu0 %1688  ;;  %v2959_v42 = vld [vmem:[%s4247_s15 + $0xe8] sm:$0xf] }
 0x874   : > { %1701 = vmatpush.bf16.msrb.mxu0 %v1689_v0 }
 0x875   : > { %v3313_v44 = vpop.eup %3312  ;;  %v1604_v45 = vmul.f32 1.442695, %v1598_v43  ;;  %v3192_v43 = vld [vmem:[%s4247_s15 + $0xf4] sm:$0xf0] }
 0x876   : > { %v1617_v46 = vsel %vm1583_vm15, %v3313_v44, 0.0 }
 0x877   : > { %3314 = vpow2.f32 %v1604_v45  ;;  %1618 = vadd.xlane.f32.xlu2 %v1617_v46  ;;  %v3190_v45 = vld [vmem:[%s4247_s15 + $0xec] sm:$0xf]  ;;  %v2961_v46 = vld [vmem:[%s4247_s15 + $0xf8] sm:$0xf0] }
 0x87a   : > { %v1586_v47 = vpop.xlane.xlu2 %1585 }
 0x87b   : > { %v1596_v19 = vsub.f32 %v1508_v10, %v1586_v47  ;;  %v2964_v47 = vor.u32 %v3190_v45, %v2961_v46 }
 0x87d   : > { %v3315_v48 = vpop.eup %3314  ;;  %v1600_v49 = vmul.f32 1.442695, %v1596_v19 }
 0x87e   : > { %v1614_v50 = vsel %vm1583_vm15, %v3315_v48, 0.0 }
 0x87f   : > { %3316 = vpow2.f32 %v1600_v49  ;;  %1615 = vadd.xlane.f32.xlu2 %v1614_v50 }
 0x885   : > { %v3317_v51 = vpop.eup %3316 }
 0x886   : > { %v1608_v52 = vsel %vm1583_vm15, %v3317_v51, 0.0 }
 0x887   : > { %1609 = vadd.xlane.f32.xlu1 %v1608_v52  ;;  %v3187_v52 = vld [vmem:[%s4247_s15 + $0xcc] sm:$0xf0] }
 0x897   : > { %1648 = vrot.lane.b32.xlu2 %v1629_v21, %s3504_s0  ;;  %v3156_v21 = vld [vmem:[#allocation9 + $0x18] sm:$0xff] }
 0x898   : > { %1795 = vmatpush.bf16.msra.mxu1 %v3156_v21 }
 0x89c   : > { %1796 = vmatpush.bf16.msra.mxu1 %v3155_v23  ;;  %v2912_v23 = vor.u32 %v3180_v20, %v2911_v4 }
 0x8a0   : > { %1797 = vmatpush.bf16.msra.mxu1 %v3154_v24  ;;  %v3178_v24 = vld [vmem:[%s4247_s15 + $0x8c] sm:$0xf] }
 0x8a4   : > { %1798 = vmatpush.bf16.msra.mxu1 %v3153_v25  ;;  %v2913_v25 = vld [vmem:[%s4247_s15 + $0x98] sm:$0xf0] }
 0x8d8   : > { %v1613_v55 = vpop.xlane.xlu1 %1612 }
 0x8ea   : > { %v1619_v53 = vpop.xlane.xlu2 %1618 }
 0x8eb   : > { %3318 = vrcp.f32 %v1619_v53  ;;  %v3185_v53 = vld [vmem:[%s4247_s15 + $0xc4] sm:$0xf] }
 0x8ec   : > { %3320 = vrcp.f32 %v1613_v55 }
 0x8f1   : > { %v3319_v56 = vpop.eup %3318 }
 0x8f2   : > { %v1627_v57 = vmul.f32 %v3319_v56, %v3313_v44  ;;  %v1616_v58 = vpop.xlane.xlu2 %1615  ;;  %v3321_v60 = vpop.eup %3320  ;;  %v2960_v44 = vor.u32 %v3192_v43, %v2959_v42  ;;  %v2937_v56 = vld [vmem:[%s4247_s15 + $0xd0] sm:$0xf0] }
 0x8f3   : > { %3322 = vrcp.f32 %v1616_v58  ;;  %v1625_v61 = vmul.f32 %v3321_v60, %v3311_v37  ;;  %v3188_v58 = vld [vmem:[%s4247_s15 + $0xd4] sm:$0xf0]  ;;  %v2873_v43 = vld [vmem:[%s4247_s15 + $0x50] sm:$0xf0] }
 0x8f4   : > { %v1687_v59 = vpack.c.bf16 %v1627_v57, %v1627_v57  ;;  %2058 = vmatpush.bf16.msra.mxu0 %v2960_v44  ;;  %v2943_v57 = vld [vmem:[%s4247_s15 + $0xc8] sm:$0xf]  ;;  %v3172_v44 = vld [vmem:[%s4247_s15 + $0x54] sm:$0xf0] }
 0x8f5   : > { %v1646_v3 = vpack.c.bf16 %v1625_v61, %v1625_v61  ;;  %v2944_v60 = vor.u32 %v3188_v58, %v2943_v57  ;;  %v3186_v61 = vld [vmem:[%s4247_s15 + $0xcc] sm:$0xf]  ;;  %v3168_v57 = vld [vmem:[%s4247_s15 + $0x34] sm:$0xf0] }
 0x8f6   : > { %2804 = vmatmul.msk.bf16.vlgmr.msrb.gmra.mxu0 %vm1583_vm15, %v1687_v59  ;;  %v2940_v59 = vor.u32 %v3185_v53, %v2937_v56  ;;  %v2863_v56 = vld [vmem:[%s4247_s15 + $0x28] sm:$0xf] }
 0x8f8   : > { %2059 = vmatpush.bf16.msra.mxu0 %v2944_v60  ;;  %v3166_v60 = vld [vmem:[%s4247_s15 + $0x2c] sm:$0xf] }
 0x8f9   : > { %v3323_v62 = vpop.eup %3322 }
 0x8fa   : > { %v1626_v63 = vmul.f32 %v3323_v62, %v3315_v48  ;;  %v1610_v1 = vpop.xlane.xlu1 %1609  ;;  %v1649_v2 = vpop.permute.xlu2 %1648  ;;  %v2945_v62 = vld [vmem:[%s4247_s15 + $0xd8] sm:$0xf0] }
 0x8fb   : > { %3324 = vrcp.f32 %v1610_v1  ;;  %1661 = vmatpush.bf16.msrb.mxu2 %v1649_v2  ;;  %v2919_v1 = vld [vmem:[%s4247_s15 + $0xa0] sm:$0xf]  ;;  %v3183_v2 = vld [vmem:[%s4247_s15 + $0xac] sm:$0xf0] }
 0x8fc   : > { %v1667_v54 = vpack.c.bf16 %v1626_v63, %v1626_v63  ;;  %v2948_v63 = vor.u32 %v3186_v61, %v2945_v62  ;;  %v2865_v61 = vld [vmem:[%s4247_s15 + $0x38] sm:$0xf0]  ;;  %v2839_v62 = vld [vmem:[%s4247_s15] sm:$0xf] }
 0x8fe   : > { %2802 = vmatmul.msk.bf16.vlgmr.msrb.gmra.mxu2 %vm1583_vm15, %v1646_v3  ;;  %2803 = vmatmul.msk.bf16.vlgmr.msra.gmra.mxu3 %vm1583_vm15, %v1667_v54  ;;  %v3181_v3 = vld [vmem:[%s4247_s15 + $0xa4] sm:$0xf]  ;;  %v2920_v54 = vor.u32 %v3183_v2, %v2919_v1  ;;  %v3163_v1 = vld [vmem:[%s4247_s15 + $0xc] sm:$0xf0] }
 0x8ff   : > { %2032 = vmatpush.bf16.msra.mxu2 %v2952_v41  ;;  %v3171_v41 = vld [vmem:[%s4247_s15 + $0x4c] sm:$0xf0]  ;;  %v3161_v2 = vld [vmem:[%s4247_s15 + $0x4] sm:$0xf] }
 0x901   : > { %v3325_v5 = vpop.eup %3324 }
 0x902   : > { %v1624_v6 = vmul.f32 %v3325_v5, %v3317_v51  ;;  %v2935_v51 = vld [vmem:[%s4247_s15 + $0xc0] sm:$0xf]  ;;  %v2921_v5 = vld [vmem:[%s4247_s15 + $0xb0] sm:$0xf0] }
 0x903   : > { %v2936_v55 = vor.u32 %v3187_v52, %v2935_v51  ;;  %v2924_v8 = vor.u32 %v3181_v3, %v2921_v5  ;;  %v3167_v51 = vld [vmem:[%s4247_s15 + $0x2c] sm:$0xf0]  ;;  %v3165_v52 = vld [vmem:[%s4247_s15 + $0x24] sm:$0xf]  ;;  %v2841_v3 = vld [vmem:[%s4247_s15 + $0x10] sm:$0xf0] }
 0x904   : > { %v1628_v7 = vpack.c.bf16 %v1624_v6, %v1624_v6  ;;  %v2927_v6 = vld [vmem:[%s4247_s15 + $0xa8] sm:$0xf]  ;;  %v2844_v5 = vor.u32 %v3161_v2, %v2841_v3 }
 0x905   : > { %2033 = vmatpush.bf16.msra.mxu2 %v2936_v55  ;;  %v2857_v55 = vld [vmem:[%s4247_s15 + $0x30] sm:$0xf0] }
 0x906   : > { %2801 = vmatmul.msk.bf16.vlgmr.msrb.gmra.mxu1 %vm1583_vm15, %v1628_v7  ;;  %v3184_v7 = vld [vmem:[%s4247_s15 + $0xb4] sm:$0xf0]  ;;  %v2860_v58 = vor.u32 %v3165_v52, %v2857_v55  ;;  %v3218_v52 = vld [vmem:[%s4249_s17 + $0xc8] sm:$0xff]  ;;  %v3203_v55 = vld [vmem:[%s4249_s17 + $0x50] sm:$0xff] }
 0x907   : > { %2071 = vmatpush.bf16.msrb.mxu1 %v2964_v47  ;;  %v3170_v47 = vld [vmem:[%s4247_s15 + $0x4c] sm:$0xf] }
 0x909   : > { %2034 = vmatpush.bf16.msra.mxu2 %v2920_v54  ;;  %v2840_v54 = vor.u32 %v3163_v1, %v2839_v62  ;;  %v3201_v62 = vld [vmem:[%s4249_s17 + $0x40] sm:$0xff] }
 0x90b   : > { %2072 = vmatpush.bf16.msrb.mxu1 %v2948_v63  ;;  %v2868_v63 = vor.u32 %v3166_v60, %v2865_v61  ;;  %v1862_v60 = vld [vmem:[%s4248_s16] sm:$0xf] }
 0x90c   : > { %v3193_v61 = vld [vmem:[%s4249_s17] sm:$0xff]  ;;  %v1867_v1 = vperm.slane %v1862_v60, 3 }
 0x973   : > { %v1703_v9 = vpop.f32.mrf.mxu0 }
 0x974   : > { %1716 = vrot.lane.b32.xlu1 %v1703_v9, %s3504_s0  ;;  %v2928_v9 = vor.u32 %v3184_v7, %v2927_v6  ;;  %v2847_v6 = vld [vmem:[%s4247_s15 + $0x8] sm:$0xf]  ;;  %v3164_v7 = vld [vmem:[%s4247_s15 + $0x14] sm:$0xf0] }
 0x976   : > { %2060 = vmatpush.bf16.msra.mxu0 %v2928_v9  ;;  %v2848_v9 = vor.u32 %v3164_v7, %v2847_v6  ;;  %v1864_v6 = vperm.slane %v1862_v60, 0  ;;  %v1865_v7 = vperm.slane %v1862_v60, 1 }
 0x97a   : > { %2061 = vmatpush.bf16.msra.mxu0 %v2912_v23 }
 0x97b   : > { %v1705_v10 = vpop.f32.mrf.mxu0 }
 0x97c   : > { %v3182_v10 = vld [vmem:[%s4247_s15 + $0xac] sm:$0xf] }
 0x981   : > { %v1663_v11 = vpop.f32.mrf.mxu2  ;;  %v1683_v12 = vpop.f32.mrf.mxu3 }
 0x982   : > { %1712 = vrot.lane.b32.xlu0 %v1683_v12, %s3503_s27  ;;  %1708 = vrot.lane.b32.xlu2 %v1663_v11, %s3502_s26  ;;  %v2929_v11 = vld [vmem:[%s4247_s15 + $0xb8] sm:$0xf0]  ;;  %s4272_s26 = sld [smem:[#allocation23_spill]] }
 0x983   : > { %v1642_v13 = vpop.f32.mrf.mxu1  ;;  %v2932_v12 = vor.u32 %v3182_v10, %v2929_v11  ;;  %v2849_v10 = vld [vmem:[%s4247_s15 + $0x18] sm:$0xf0] }
 0x985   : > { %2073 = vmatpush.bf16.msrb.mxu1 %v2932_v12 }
 0x988   : > { %s666_s27 = scalar_lea.vmem %s4272_s26, %s3668_s7 }
 0x989   : > { %v1665_v14 = vpop.f32.mrf.mxu2  ;;  %v1685_v15 = vpop.f32.mrf.mxu3 }
 0x98a   : > { %v3179_v14 = vld [vmem:[%s4247_s15 + $0x8c] sm:$0xf0]  ;;  %v3177_v15 = vld [vmem:[%s4247_s15 + $0x84] sm:$0xf] }
 0x98b   : > { %v1644_v17 = vpop.f32.mrf.mxu1  ;;  %v2908_v21 = vor.u32 %v3177_v15, %v2905_v18  ;;  %v3223_v18 = vld [vmem:[%s4249_s17 + $0xf0] sm:$0xff] }
 0x9dc   : > { %v1709_v26 = vpop.permute.xlu2 %1708 }
 0x9dd   : > { %v1719_v27 = vsel %vm924_vm4, %v1642_v13, %v1709_v26  ;;  %v2903_v13 = vld [vmem:[%s4247_s15 + $0x80] sm:$0xf]  ;;  %v2916_v26 = vor.u32 %v3178_v24, %v2913_v25 }
 0x9de   : > { %v2904_v17 = vor.u32 %v3179_v14, %v2903_v13  ;;  %v3216_v13 = vld [vmem:[%s4249_s17 + $0xb8] sm:$0xff] }
 0x9df   : > { %2074 = vmatpush.bf16.msrb.mxu1 %v2916_v26  ;;  %v3224_v14 = vld [vmem:[%s4249_s17 + $0xf8] sm:$0xff]  ;;  %v3336_v26 = vld [vmem:[%s4269_s20] sm:$0x7] }
 0x9e0   : > { %2035 = vmatpush.bf16.msra.mxu2 %v2904_v17  ;;  %v3215_v17 = vld [vmem:[%s4249_s17 + $0xb0] sm:$0xff] }
 0x9e6   : > { %v1717_v29 = vpop.permute.xlu1 %1716 }
 0x9f4   : > { %v1713_v28 = vpop.permute.xlu0 %1712 }
 0x9f5   : > { %v1720_v22 = vsel %vm1162_vm10, %v1719_v27, %v1713_v28  ;;  %v2887_v27 = vld [vmem:[%s4247_s15 + $0x60] sm:$0xf]  ;;  %v3175_v28 = vld [vmem:[%s4247_s15 + $0x6c] sm:$0xf0] }
 0x9f6   : > { %v1721_v30 = vsel %vm1164_vm11, %v1720_v22, %v1717_v29  ;;  %v3173_v29 = vld [vmem:[%s4247_s15 + $0x64] sm:$0xf]  ;;  %v2888_v22 = vor.u32 %v3175_v28, %v2887_v27  ;;  %v1825_v27 = vperm.slane %v3336_v26, 2 }
 0x9f7   : > { %v1722_v32 = vpack.c.bf16 %v1721_v30, %v1721_v30  ;;  %v2889_v30 = vld [vmem:[%s4247_s15 + $0x70] sm:$0xf0] }
 0x9f8   : > { %2036 = vmatpush.bf16.msra.mxu2 %v2888_v22  ;;  %v3337_v22 = vld [vmem:[%s4236_s4] sm:$0x7] }
 0x9f9   : > { %1799 = vmatmul.bf16.vlgmr.msra.gmra.mxu1 %v1722_v32  ;;  %v2895_v32 = vld [vmem:[%s4247_s15 + $0x68] sm:$0xf] }
 0xa76   : > { %v1800_v35 = vpop.f32.mrf.mxu1 }
 0xa77   : > { %v1801_v36 = vadd.f32 %v3286_v34, %v1800_v35  ;;  %v3176_v34 = vld [vmem:[%s4247_s15 + $0x74] sm:$0xf0]  ;;  %v2892_v35 = vor.u32 %v3173_v29, %v2889_v30  ;;  %v1827_v30 = vperm.slane %v3337_v22, 2 }
 0xa79   : > { %v3913_v37 = vadd.f32 %v1801_v36, %v3752_v38  ;;  %v2953_v38 = vld [vmem:[%s4247_s15 + $0xf0] sm:$0xf0]  ;;  %v2896_v36 = vor.u32 %v3176_v34, %v2895_v32 }
 0xa7a   : > { %v2956_v0 = vor.u32 %v3189_v33, %v2953_v38  ;;  %v2871_v33 = vld [vmem:[%s4247_s15 + $0x40] sm:$0xf]  ;;  %v3169_v38 = vld [vmem:[%s4247_s15 + $0x44] sm:$0xf] }
 0xa7b   : > { %1805 = vadd.xlane.f32.xlu2 %v3913_v37  ;;  %2062 = vmatpush.bf16.msra.mxu0 %v2896_v36  ;;  %v2872_v42 = vor.u32 %v3171_v41, %v2871_v33  ;;  %v2876_v45 = vor.u32 %v3169_v38, %v2873_v43  ;;  %v3200_v36 = vld [vmem:[%s4249_s17 + $0x38] sm:$0xff]  ;;  %v3207_v33 = vld [vmem:[%s4249_s17 + $0x70] sm:$0xff]  ;;  %v3213_v41 = vld [vmem:[%s4249_s17 + $0xa0] sm:$0xff] }
 0xa7c   : > { %2045 = vmatpush.bf16.msrb.mxu3 %v2956_v0  ;;  %v2879_v0 = vld [vmem:[%s4247_s15 + $0x48] sm:$0xf]  ;;  %v3221_v38 = vld [vmem:[%s4249_s17 + $0xe0] sm:$0xff] }
 0xa7d   : > { %v2880_v46 = vor.u32 %v3172_v44, %v2879_v0  ;;  %2037 = vmatpush.bf16.msra.mxu2 %v2872_v42  ;;  %v3198_v42 = vld [vmem:[%s4249_s17 + $0x28] sm:$0xff]  ;;  %v3212_v0 = vld [vmem:[%s4249_s17 + $0x98] sm:$0xff] }
 0xa7e   : > { %v1802_v39 = vpop.f32.mrf.mxu1  ;;  %v3206_v43 = vld [vmem:[%s4249_s17 + $0x68] sm:$0xff]  ;;  %v3220_v44 = vld [vmem:[%s4249_s17 + $0xd8] sm:$0xff] }
 0xa7f   : > { %v3174_v39 = vld [vmem:[%s4247_s15 + $0x6c] sm:$0xf]  ;;  %2063 = vmatpush.bf16.msra.mxu0 %v2880_v46  ;;  %v3205_v46 = vld [vmem:[%s4249_s17 + $0x60] sm:$0xff] }
 0xa80   : > { %2046 = vmatpush.bf16.msrb.mxu3 %v2940_v59  ;;  %v2900_v31 = vor.u32 %v3174_v39, %v2897_v40  ;;  %v2864_v59 = vor.u32 %v3168_v57, %v2863_v56  ;;  %v3214_v39 = vld [vmem:[%s4249_s17 + $0xa8] sm:$0xff]  ;;  %v3209_v56 = vld [vmem:[%s4249_s17 + $0x80] sm:$0xff] }
 0xa81   : > { %v3222_v40 = vld [vmem:[%s4249_s17 + $0xe8] sm:$0xff]  ;;  %v3217_v57 = vld [vmem:[%s4249_s17 + $0xc0] sm:$0xff] }
 0xa82   : > { %2075 = vmatpush.bf16.msrb.mxu1 %v2900_v31  ;;  %v3199_v31 = vld [vmem:[%s4249_s17 + $0x30] sm:$0xff] }
 0xa83   : > { %2064 = vmatpush.bf16.msra.mxu0 %v2864_v59  ;;  %v3202_v59 = vld [vmem:[%s4249_s17 + $0x48] sm:$0xff] }
 0xa84   : > { %2047 = vmatpush.bf16.msrb.mxu3 %v2924_v8  ;;  %v3162_v8 = vld [vmem:[%s4247_s15 + $0xc] sm:$0xf] }
 0xa85   : > { %v2852_v11 = vor.u32 %v3162_v8, %v2849_v10 }
 0xa87   : > { %2065 = vmatpush.bf16.msra.mxu0 %v2848_v9 }
 0xa88   : > { %2048 = vmatpush.bf16.msrb.mxu3 %v2908_v21 }
 0xa8b   : > { %2410 = vmatpush.bf16.msrb.mxu0 %v3216_v13 }
 0xa8c   : > { %2049 = vmatpush.bf16.msrb.mxu3 %v2892_v35 }
 0xa8f   : > { %2411 = vmatpush.bf16.msrb.mxu0 %v3215_v17 }
 0xa90   : > { %2050 = vmatpush.bf16.msrb.mxu3 %v2876_v45  ;;  %v3197_v45 = vld [vmem:[%s4249_s17 + $0x20] sm:$0xff] }
 0xa93   : > { %2412 = vmatpush.bf16.msrb.mxu0 %v3214_v39 }
 0xa94   : > { %2051 = vmatpush.bf16.msrb.mxu3 %v2860_v58  ;;  %v3194_v58 = vld [vmem:[%s4249_s17 + $0x8] sm:$0xff] }
 0xa97   : > { %2413 = vmatpush.bf16.msrb.mxu0 %v3213_v41 }
 0xa98   : > { %2052 = vmatpush.bf16.msrb.mxu3 %v2844_v5 }
 0xa9b   : > { %2414 = vmatpush.bf16.msrb.mxu0 %v3212_v0 }
 0xaee   : > { %v1806_v19 = vpop.xlane.xlu2 %1805 }
 0xaef   : > { %v1807_v48 = vmul.f32 %v1806_v19, %v3677_v16  ;;  %v2881_v19 = vld [vmem:[%s4247_s15 + $0x58] sm:$0xf0] }
 0xaf1   : > { %v3942_v49 = vsub.f32 %v3913_v37, %v1807_v48  ;;  %v2884_v48 = vor.u32 %v3170_v47, %v2881_v19  ;;  %v3211_v47 = vld [vmem:[%s4249_s17 + $0x90] sm:$0xff] }
 0xaf2   : > { %v3219_v19 = vld [vmem:[%s4249_s17 + $0xd0] sm:$0xff]  ;;  %2415 = vmatpush.bf16.msrb.mxu0 %v3211_v47 }
 0xaf3   : > { %v1809_v50 = vmul.f32 %v3942_v49, %v3942_v49  ;;  %2076 = vmatpush.bf16.msrb.mxu1 %v2884_v48  ;;  %v3196_v48 = vld [vmem:[%s4249_s17 + $0x18] sm:$0xff] }
 0xaf5   : > { %1810 = vadd.xlane.f32.xlu0 %v1809_v50  ;;  %v2855_v50 = vld [vmem:[%s4247_s15 + $0x20] sm:$0xf] }
 0xaf6   : > { %v2856_v53 = vor.u32 %v3167_v51, %v2855_v50  ;;  %v3204_v50 = vld [vmem:[%s4249_s17 + $0x58] sm:$0xff]  ;;  %v3210_v51 = vld [vmem:[%s4249_s17 + $0x88] sm:$0xff] }
 0xaf7   : > { %2077 = vmatpush.bf16.msrb.mxu1 %v2868_v63  ;;  %2416 = vmatpush.bf16.msrb.mxu0 %v3210_v51  ;;  %v1866_v63 = vperm.slane %v1862_v60, 2 }
 0xaf8   : > { %2038 = vmatpush.bf16.msra.mxu2 %v2856_v53  ;;  %v3195_v53 = vld [vmem:[%s4249_s17 + $0x10] sm:$0xff] }
 0xafb   : > { %2078 = vmatpush.bf16.msrb.mxu1 %v2852_v11  ;;  %2417 = vmatpush.bf16.msrb.mxu0 %v3209_v56 }
 0xafc   : > { %2039 = vmatpush.bf16.msra.mxu2 %v2840_v54 }
 0xaff   : > { %2423 = vmatpush.bf16.msra.mxu1 %v3224_v14 }
 0xb00   : > { %2384 = vmatpush.bf16.msrb.mxu2 %v3200_v36 }
 0xb03   : > { %2424 = vmatpush.bf16.msra.mxu1 %v3223_v18 }
 0xb04   : > { %2385 = vmatpush.bf16.msrb.mxu2 %v3199_v31 }
 0xb07   : > { %2425 = vmatpush.bf16.msra.mxu1 %v3222_v40 }
 0xb08   : > { %2386 = vmatpush.bf16.msrb.mxu2 %v3198_v42 }
 0xb0b   : > { %2426 = vmatpush.bf16.msra.mxu1 %v3221_v38 }
 0xb0c   : > { %2387 = vmatpush.bf16.msrb.mxu2 %v3197_v45 }
 0xb0f   : > { %2427 = vmatpush.bf16.msra.mxu1 %v3220_v44 }
 0xb10   : > { %2388 = vmatpush.bf16.msrb.mxu2 %v3196_v48 }
 0xb13   : > { %2428 = vmatpush.bf16.msra.mxu1 %v3219_v19 }
 0xb14   : > { %2389 = vmatpush.bf16.msrb.mxu2 %v3195_v53 }
 0xb17   : > { %2429 = vmatpush.bf16.msra.mxu1 %v3218_v52 }
 0xb18   : > { %2390 = vmatpush.bf16.msrb.mxu2 %v3194_v58 }
 0xb1b   : > { %2430 = vmatpush.bf16.msra.mxu1 %v3217_v57 }
 0xb1c   : > { %2391 = vmatpush.bf16.msrb.mxu2 %v3193_v61 }
 0xb68   : > { %v1811_v12 = vpop.xlane.xlu0 %1810 }
 0xb69   : > { %v1812_v15 = vmul.f32 %v1811_v12, %v3677_v16 }
 0xb6b   : > { %v1813_v4 = vadd.f32 1e-05, %v1812_v15 }
 0xb6d   : > { %3326 = vrsqrt.f32 %v1813_v4  ;;  %vm1820_vm1 = vweird.f32 %v1813_v4 }
 0xb73   : > { %v3327_v20 = vpop.eup %3326 }
 0xb74   : > { %v1815_v21 = vmul.f32 %v3327_v20, %v1813_v4  ;;  %vm1821_vm0 = vweird.f32 %v3327_v20 }
 0xb75   : > { %vm1822_vm2 = vmor %vm1820_vm1, %vm1821_vm0 }
 0xb76   : > { %v1816_v23 = vmul.f32 %v3327_v20, %v1815_v21 }
 0xb78   : > { %v1817_v24 = vmul.f32 0.5, %v1816_v23 }
 0xb7a   : > { %v1818_v25 = vsub.f32 1.5, %v1817_v24 }
 0xb7c   : > { %v1819_v16 = vmul.f32 %v3327_v20, %v1818_v25 }
 0xb7e   : > { %v1823_v28 = vsel %vm1822_vm2, %v3327_v20, %v1819_v16 }
 0xb7f   : > { %v1824_v29 = vmul.f32 %v1823_v28, %v3942_v49  ;;  %v3208_v49 = vld [vmem:[%s4249_s17 + $0x78] sm:$0xff] }
 0xb80   : > { %2397 = vmatpush.bf16.msra.mxu3 %v3208_v49 }
 0xb81   : > { %v1826_v32 = vmul.f32 %v1825_v27, %v1824_v29 }
 0xb83   : > { %v1828_v34 = vadd.f32 %v1827_v30, %v1826_v32 }
 0xb84   : > { %2398 = vmatpush.bf16.msra.mxu3 %v3207_v33 }
 0xb85   : > { %v1829_v35 = vpack.c.bf16 %v1828_v34, %v1828_v34 }
 0xb87   : > { %2040 = vmatmul.bf16.vlgmr.msra.gmra.mxu2 %v1829_v35  ;;  %2053 = vmatmul.bf16.vlgmr.msrb.gmra.mxu3 %v1829_v35 }
 0xb88   : > { %2066 = vmatmul.bf16.vlgmr.msra.gmra.mxu0 %v1829_v35  ;;  %2079 = vmatmul.bf16.vlgmr.msrb.gmra.mxu1 %v1829_v35 }
 0xb89   : > { %2399 = vmatpush.bf16.msra.mxu3 %v3206_v43 }
 0xb8d   : > { %2400 = vmatpush.bf16.msra.mxu3 %v3205_v46 }
 0xb91   : > { %2401 = vmatpush.bf16.msra.mxu3 %v3204_v50 }
 0xb95   : > { %2402 = vmatpush.bf16.msra.mxu3 %v3203_v55 }
 0xb99   : > { %2403 = vmatpush.bf16.msra.mxu3 %v3202_v59  ;;  %v3287_v59 = vld [vmem:[%s4250_s18] ss:$0 sm:$0xff] }
 0xb9d   : > { %2404 = vmatpush.bf16.msra.mxu3 %v3201_v62 }
 0xc05   : > { %v2067_v2 = vpop.f32.mrf.mxu0  ;;  %v2080_v3 = vpop.f32.mrf.mxu1 }
 0xc06   : > { %v2068_v54 = vadd.f32 %v2067_v2, %v1866_v63  ;;  %v2081_v5 = vadd.f32 %v2080_v3, %v1867_v1 }
 0xc08   : > { %v2090_v8 = vmul.f32 %v2068_v54, %v2068_v54  ;;  %v2091_v9 = vmul.f32 %v2081_v5, %v2081_v5  ;;  %v2086_v31 = vmul.f32 0.5, %v2068_v54  ;;  %v2087_v41 = vmul.f32 0.5, %v2081_v5 }
 0xc0a   : > { %v2094_v10 = vmul.f32 %v2090_v8, %v2068_v54  ;;  %v2095_v11 = vmul.f32 %v2091_v9, %v2081_v5  ;;  %v2041_v12 = vpop.f32.mrf.mxu2  ;;  %v2054_v13 = vpop.f32.mrf.mxu3 }
 0xc0b   : > { %v2042_v14 = vadd.f32 %v2041_v12, %v1864_v6  ;;  %v2055_v15 = vadd.f32 %v2054_v13, %v1865_v7 }
 0xc0c   : > { %v2098_v17 = vmul.f32 0.044715, %v2094_v10  ;;  %v2099_v18 = vmul.f32 0.044715, %v2095_v11 }
 0xc0d   : > { %v2088_v4 = vmul.f32 %v2042_v14, %v2042_v14  ;;  %v2089_v20 = vmul.f32 %v2055_v15, %v2055_v15  ;;  %v2069_v21 = vpop.f32.mrf.mxu0  ;;  %v2082_v23 = vpop.f32.mrf.mxu1  ;;  %v2084_v46 = vmul.f32 0.5, %v2042_v14  ;;  %v2085_v48 = vmul.f32 0.5, %v2055_v15 }
 0xc0e   : > { %v2102_v24 = vadd.f32 %v2098_v17, %v2068_v54  ;;  %v2103_v25 = vadd.f32 %v2099_v18, %v2081_v5 }
 0xc0f   : > { %v2092_v16 = vmul.f32 %v2088_v4, %v2042_v14  ;;  %v2093_v26 = vmul.f32 %v2089_v20, %v2055_v15 }
 0xc10   : > { %v2106_v27 = vmul.f32 0.7978846, %v2102_v24  ;;  %v2107_v28 = vmul.f32 0.7978846, %v2103_v25 }
 0xc11   : > { %v2096_v29 = vmul.f32 0.044715, %v2092_v16  ;;  %v2097_v22 = vmul.f32 0.044715, %v2093_v26 }
 0xc12   : > { %3328 = vtanh.f32 %v2106_v27  ;;  %v2043_v30 = vpop.f32.mrf.mxu2  ;;  %v2056_v32 = vpop.f32.mrf.mxu3 }
 0xc13   : > { %3330 = vtanh.f32 %v2107_v28  ;;  %v2100_v34 = vadd.f32 %v2096_v29, %v2042_v14  ;;  %v2101_v35 = vadd.f32 %v2097_v22, %v2055_v15 }
 0xc15   : > { %v2104_v36 = vmul.f32 0.7978846, %v2100_v34  ;;  %v2105_v49 = vmul.f32 0.7978846, %v2101_v35 }
 0xc17   : > { %3332 = vtanh.f32 %v2104_v36 }
 0xc18   : > { %v3329_v39 = vpop.eup %3328  ;;  %3334 = vtanh.f32 %v2105_v49 }
 0xc19   : > { %v3331_v40 = vpop.eup %3330  ;;  %v2114_v33 = vadd.f32 1.0, %v3329_v39 }
 0xc1a   : > { %v2115_v38 = vadd.f32 1.0, %v3331_v40 }
 0xc1b   : > { %v2118_v42 = vmul.f32 %v2114_v33, %v2086_v31 }
 0xc1c   : > { %v2119_v43 = vmul.f32 %v2115_v38, %v2087_v41 }
 0xc1d   : > { %v3333_v0 = vpop.eup %3332  ;;  %v2122_v44 = vpack.c.bf16 %v2118_v42, %v2118_v42 }
 0xc1e   : > { %v3335_v45 = vpop.eup %3334  ;;  %v2123_v47 = vpack.c.bf16 %v2119_v43, %v2119_v43  ;;  %v2112_v19 = vadd.f32 1.0, %v3333_v0 }
 0xc1f   : > { %2418 = vmatmul.bf16.vlgmr.msrb.gmra.mxu0 %v2122_v44  ;;  %v2113_v50 = vadd.f32 1.0, %v3335_v45 }
 0xc20   : > { %2431 = vmatmul.bf16.vlgmr.msra.gmra.mxu1 %v2123_v47  ;;  %v2116_v51 = vmul.f32 %v2112_v19, %v2084_v46 }
 0xc21   : > { %v2117_v52 = vmul.f32 %v2113_v50, %v2085_v48 }
 0xc22   : > { %v2120_v53 = vpack.c.bf16 %v2116_v51, %v2116_v51 }
 0xc23   : > { %v2121_v55 = vpack.c.bf16 %v2117_v52, %v2117_v52 }
 0xc24   : > { %2392 = vmatmul.bf16.vlgmr.msrb.gmra.mxu2 %v2120_v53 }
 0xc25   : > { %2405 = vmatmul.bf16.vlgmr.msra.gmra.mxu3 %v2121_v55 }
 0xc9c   : > { %v2419_v56 = vpop.f32.mrf.mxu0 }
 0xc9d   : > { %v2432_v57 = vpop.f32.mrf.mxu1 }
 0xca4   : > { %v2421_v58 = vpop.f32.mrf.mxu0 }
 0xca5   : > { %v2434_v60 = vpop.f32.mrf.mxu1 }
 0xca7   : > { %v2393_v61 = vpop.f32.mrf.mxu2 }
 0xca8   : > { %v2394_v62 = vadd.f32 %v3287_v59, %v2393_v61  ;;  %v2406_v63 = vpop.f32.mrf.mxu3 }
 0xcaa   : > { %v2407_v1 = vadd.f32 %v2406_v63, %v2394_v62 }
 0xcac   : > { %v2420_v2 = vadd.f32 %v2419_v56, %v2407_v1 }
 0xcae   : > { %v2433_v3 = vadd.f32 %v2432_v57, %v2420_v2 }
 0xcaf   : > { %v2395_v54 = vpop.f32.mrf.mxu2 }
 0xcb0   : > { %v2436_v5 = vadd.f32 %v2433_v3, %v3913_v37  ;;  %v2408_v6 = vpop.f32.mrf.mxu3 }
 0xcb2   : > { %2437 = vst [vmem:[%s666_s27] sm:$0xff] %v2436_v5 }
 0xcb3 PF: > { %s4273_s0 = sld [smem:[#allocation15_spill]] }
 0xcb9   : > { %s40_s1 = sadd.s32 1, %s4273_s0  }
 0xcba   : > { %p37_p7 = scmp.ge.s32.totalorder %s40_s1, 4  }
 0xcbc   :  { %39 = sbr.rel (!%p37_p7) target bundleno = 23 (0x17), region = 142 }
 0xcc1   :  { %2457 = vsyncpa [#allocation5], 1 }
 0xcc2   :  { %2459 = vsyncpa [#allocation5 + $0x1], 1 }
 0xcc3   :  { %2460 = vsyncpa [#allocation7], 1 }
 0xcc4   :  { %2461 = vsyncpa [#allocation10], 1 }

</bundles_post_ra>
